<compile_context>
chip_gen: v6e
topology: v6e:2x2x1
jax: 0.10.0
libtpu: 0.0.40
codegen_flags: <defaults>
</compile_context>

<pallas_src>
import jax
import jax.numpy as jnp
from jax.experimental import pallas as pl
from jax.experimental.pallas import tpu as pltpu

KS = (2, 3, 4)          # conv kernel heights, fixed by the module
N_TAPS = sum(KS)        # 9 packed weight taps


def _round_up(x, m):
    return (x + m - 1) // m * m


def _choose_b_tile(batch, seq, max_rows=256):
    """Largest divisor of `batch` with b_tile*seq <= max_rows, keeping grid >= 2."""
    best = 1
    for d in range(1, batch + 1):
        if batch % d:
            continue
        if batch > 1 and batch // d < 2:
            continue                      # >= 2 grid steps: pipelining + both v7x TCs
        if d * seq <= max_rows:
            best = max(best, d)
    return best


# ------------------------------ Pallas kernel -------------------------------

def bwm_kernel(x_ref, w_ref, b_ref, o_ref):
    """One B_TILE-sample block per grid step.

    x_ref : (B_TILE, T, E)        token embeddings (f32 or bf16)
    w_ref : (E, 9*F)              all conv taps packed column-wise:
                                  [K=2 tap0..1 | K=3 tap0..2 | K=4 tap0..3]
    b_ref : (3, F)  f32           one bias row per K
    o_ref : (B_TILE, 3*SEC, F)    ReLU(conv_K) outputs, channels-last, each K
                                  section zero-padded to SEC rows
    """
    bt, T, E = x_ref.shape
    F = o_ref.shape[-1]
    sec = o_ref.shape[1] // len(KS)

    # Fold batch into the MXU M dimension: one wide matmul for all 9 taps.
    x2d = x_ref[...].reshape(bt * T, E)                               # (bt*T, E)
    y = jnp.dot(x2d, w_ref[...], preferred_element_type=jnp.float32)  # (bt*T, 9F)
    y = y.reshape(bt, T, N_TAPS * F)

    col = 0
    sections = []
    for idx, K in enumerate(KS):
        t_out = T - K + 1
        acc = b_ref[idx][None, None, :]                               # (1, 1, F) f32
        for k in range(K):                                            # shifted adds (VPU)
            acc = acc + y[:, k:k + t_out, col:col + F]
            col += F
        acc = jnp.maximum(acc, 0.0)                                   # ReLU
        pad = sec - t_out
        if pad:
            acc = jnp.concatenate(
                [acc, jnp.zeros((bt, pad, F), acc.dtype)], axis=1)
        sections.append(acc)

    # Single aligned, lane-dense store for all three conv outputs.
    o_ref[...] = jnp.concatenate(sections, axis=1).astype(o_ref.dtype)


# ------------------------------ param packing -------------------------------

def pack_bwm_params(params, compute_dtype=jnp.float32):
    """Pack once at init time (NOT per forward call).

    params["w"][i] : (K_i, 768, F)  conv taps for K_i
    params["b"][i] : (F,)           bias for K_i
    """
    w_packed = jnp.concatenate(
        [params["w"][i][k] for i, K in enumerate(KS) for k in range(K)],
        axis=1).astype(compute_dtype)                 # (768, 9F)
    b_packed = jnp.stack(params["b"], axis=0).astype(jnp.float32)   # (3, F)
    return {"w_packed": w_packed, "b_packed": b_packed}


# --------------------------------- wrapper ----------------------------------

def bert_word_mapping_forward(words_emb, packed):
    """words_emb: (B, T, 768).  Returns list of (B, F, T-K+1) f32 for K in KS."""
    B, T, E = words_emb.shape
    w_all = packed["w_packed"]                        # (E, 9F), pre-packed
    b_all = packed["b_packed"]                        # (3, F)
    F = w_all.shape[1] // N_TAPS
    assert w_all.shape[0] == E

    sec = _round_up(T - min(KS) + 1, 8)               # 8-sublane-aligned K-section
    b_tile = _choose_b_tile(B, T)                     # ~128-256 MXU rows, grid >= 2
    grid = (B // b_tile,)

    x = words_emb.astype(w_all.dtype)                 # bf16 path halves input DMA

    slab = pl.pallas_call(
        bwm_kernel,
        out_shape=jax.ShapeDtypeStruct((B, len(KS) * sec, F), jnp.float32),
        grid=grid,
        in_specs=[
            pl.BlockSpec((b_tile, T, E), lambda b: (b, 0, 0)),      # per-step samples
            pl.BlockSpec((E, N_TAPS * F), lambda b: (0, 0)),        # packed weights (resident)
            pl.BlockSpec((len(KS), F), lambda b: (0, 0)),           # biases (resident)
        ],
        out_specs=pl.BlockSpec((b_tile, len(KS) * sec, F), lambda b: (b, 0, 0)),
        compiler_params=pltpu.CompilerParams(dimension_semantics=("parallel",)),
    )(x, w_all, b_all)

    # Slice the valid rows of each K-section; channels-last -> PyTorch (B, F, T_out).
    outs = []
    for i, K in enumerate(KS):
        t_out = T - K + 1
        outs.append(jnp.transpose(slab[:, i * sec:i * sec + t_out, :], (0, 2, 1)))
    return outs


# ---------------------------- pure-JAX reference ----------------------------

def bert_word_mapping_reference(words_emb, params, compute_dtype=jnp.float32):
    B, T, E = words_emb.shape
    x = words_emb.astype(compute_dtype)
    outs = []
    for i, K in enumerate(KS):
        w = params["w"][i].astype(compute_dtype)      # (K, E, F)
        b = params["b"][i].astype(jnp.float32)        # (F,)
        t_out = T - K + 1
        y = sum(
            jnp.einsum("bte,ef->btf", x[:, k:k + t_out, :], w[k],
                       preferred_element_type=jnp.float32)
            for k in range(K)) + b
        outs.append(jnp.transpose(jnp.maximum(y, 0.0), (0, 2, 1)))
    return outs


# ----------------------------------- main ------------------------------------

if __name__ == "__main__":
    # E=768 fixed by the module (BERT hidden size = conv kernel width).
    # F=128 keeps stores lane-dense; B=16, T=16 so B_TILE=8 -> 128 MXU rows, grid=2.
    B, T, E, F = 16, 16, 768, 128

    key = jax.random.PRNGKey(0)
    kx, *kw = jax.random.split(key, 1 + 2 * len(KS))

    def nrm(k, shape, scale=0.05):
        return (scale * jax.random.normal(k, shape)).astype(jnp.float32)

    params = {
        "w": [nrm(kw[2 * i], (K, E, F)) for i, K in enumerate(KS)],   # per-K taps (K, E, F)
        "b": [nrm(kw[2 * i + 1], (F,)) for i, K in enumerate(KS)],
    }
    words_emb = jax.random.normal(kx, (B, T, E), jnp.float32)

    fwd = jax.jit(bert_word_mapping_forward)

    # --- f32 compute path: exact semantics vs. f32 reference ---
    packed_f32 = pack_bwm_params(params, jnp.float32)
    outs = jax.block_until_ready(fwd(words_emb, packed_f32))
    refs = jax.block_until_ready(bert_word_mapping_reference(words_emb, params))
    for K, o, r in zip(KS, outs, refs):
        assert o.shape == (B, F, T - K + 1), (K, o.shape)
        err = float(jnp.max(jnp.abs(o - r)))
        assert err < 1e-4, f"f32 K={K} mismatch vs reference: {err}"

    # --- bf16 compute path (v6e/v7x MXU-native), f32 accumulation ---
    packed_bf16 = pack_bwm_params(params, jnp.bfloat16)
    outs16 = jax.block_until_ready(fwd(words_emb, packed_bf16))
    refs16 = jax.block_until_ready(
        bert_word_mapping_reference(words_emb, params, jnp.bfloat16))
    for K, o, r in zip(KS, outs16, refs16):
        assert o.shape == (B, F, T - K + 1), (K, o.shape)
        err = float(jnp.max(jnp.abs(o - r)))
        assert err < 5e-2, f"bf16 K={K} mismatch vs bf16 reference: {err}"

    print("KERNEL_OK")
</pallas_src>

<mosaic_0001>
module attributes {stable_mosaic.version = 11 : i64} {
  func.func @bwm_kernel(%arg0: i32, %arg1: memref<8x16x768xf32, #tpu.memory_space<vmem>>, %arg2: memref<768x1152xf32, #tpu.memory_space<vmem>>, %arg3: memref<3x128xf32, #tpu.memory_space<vmem>>, %arg4: memref<8x48x128xf32, #tpu.memory_space<vmem>>) attributes {dimension_semantics = [#tpu.dimension_semantics<parallel>], iteration_bounds = array<i64: 2>, scalar_prefetch = 0 : i64, scratch_operands = 0 : i64, tpu.core_type = #tpu.core_type<tc>, window_params = [{transform_indices = @transform_0, window_bounds = array<i64: 8, 16, 768>}, {pipeline_mode = #tpu.pipeline_mode<synchronous>, transform_indices = @transform_1, window_bounds = array<i64: 768, 1152>}, {pipeline_mode = #tpu.pipeline_mode<synchronous>, transform_indices = @transform_2, window_bounds = array<i64: 3, 128>}, {transform_indices = @transform_3, window_bounds = array<i64: 8, 48, 128>}]} {
    %c0 = arith.constant 0 : index
    %c0_0 = arith.constant 0 : index
    %c0_1 = arith.constant 0 : index
    %0 = vector.load %arg1[%c0, %c0_0, %c0_1] : memref<8x16x768xf32, #tpu.memory_space<vmem>>, vector<8x16x768xf32>
    %1 = vector.shape_cast %0 : vector<8x16x768xf32> to vector<128x768xf32>
    %c0_2 = arith.constant 0 : index
    %c0_3 = arith.constant 0 : index
    %2 = vector.load %arg2[%c0_2, %c0_3] : memref<768x1152xf32, #tpu.memory_space<vmem>>, vector<768x1152xf32>
    %cst = arith.constant dense<0.000000e+00> : vector<128x1152xf32>
    %3 = tpu.matmul %1, %2, %cst {dimension_numbers = #tpu.dot_dimension_numbers<[1], [0], [0], [1], [0, 0, 1, 1], [], []>} : vector<128x768xf32>, vector<768x1152xf32>, vector<128x1152xf32> -> vector<128x1152xf32>
    %4 = vector.shape_cast %3 : vector<128x1152xf32> to vector<8x16x1152xf32>
    %c0_4 = arith.constant 0 : index
    %c0_5 = arith.constant 0 : index
    %5 = vector.load %arg3[%c0_4, %c0_5] : memref<3x128xf32, #tpu.memory_space<vmem>>, vector<1x128xf32>
    %6 = vector.shape_cast %5 : vector<1x128xf32> to vector<128xf32>
    %7 = vector.shape_cast %6 : vector<128xf32> to vector<1x1x128xf32>
    %8 = vector.extract_strided_slice %4 {offsets = [0, 0, 0], sizes = [8, 15, 128], strides = [1, 1, 1]} : vector<8x16x1152xf32> to vector<8x15x128xf32>
    %9 = vector.broadcast %7 : vector<1x1x128xf32> to vector<8x15x128xf32>
    %10 = arith.addf %9, %8 : vector<8x15x128xf32>
    %11 = vector.extract_strided_slice %4 {offsets = [0, 1, 128], sizes = [8, 15, 128], strides = [1, 1, 1]} : vector<8x16x1152xf32> to vector<8x15x128xf32>
    %12 = arith.addf %10, %11 : vector<8x15x128xf32>
    %cst_6 = arith.constant 0.000000e+00 : f32
    %13 = vector.broadcast %cst_6 : f32 to vector<8x15x128xf32>
    %14 = arith.maximumf %12, %13 : vector<8x15x128xf32>
    %cst_7 = arith.constant 0.000000e+00 : f32
    %15 = vector.broadcast %cst_7 : f32 to vector<8x1x128xf32>
    %16 = tpu.concatenate %14, %15 in 1 : vector<8x15x128xf32>, vector<8x1x128xf32> -> vector<8x16x128xf32>
    %c1 = arith.constant 1 : index
    %c0_8 = arith.constant 0 : index
    %17 = vector.load %arg3[%c1, %c0_8] : memref<3x128xf32, #tpu.memory_space<vmem>>, vector<1x128xf32>
    %18 = vector.shape_cast %17 : vector<1x128xf32> to vector<128xf32>
    %19 = vector.shape_cast %18 : vector<128xf32> to vector<1x1x128xf32>
    %20 = vector.extract_strided_slice %4 {offsets = [0, 0, 256], sizes = [8, 14, 128], strides = [1, 1, 1]} : vector<8x16x1152xf32> to vector<8x14x128xf32>
    %21 = vector.broadcast %19 : vector<1x1x128xf32> to vector<8x14x128xf32>
    %22 = arith.addf %21, %20 : vector<8x14x128xf32>
    %23 = vector.extract_strided_slice %4 {offsets = [0, 1, 384], sizes = [8, 14, 128], strides = [1, 1, 1]} : vector<8x16x1152xf32> to vector<8x14x128xf32>
    %24 = arith.addf %22, %23 : vector<8x14x128xf32>
    %25 = vector.extract_strided_slice %4 {offsets = [0, 2, 512], sizes = [8, 14, 128], strides = [1, 1, 1]} : vector<8x16x1152xf32> to vector<8x14x128xf32>
    %26 = arith.addf %24, %25 : vector<8x14x128xf32>
    %cst_9 = arith.constant 0.000000e+00 : f32
    %27 = vector.broadcast %cst_9 : f32 to vector<8x14x128xf32>
    %28 = arith.maximumf %26, %27 : vector<8x14x128xf32>
    %cst_10 = arith.constant 0.000000e+00 : f32
    %29 = vector.broadcast %cst_10 : f32 to vector<8x2x128xf32>
    %30 = tpu.concatenate %28, %29 in 1 : vector<8x14x128xf32>, vector<8x2x128xf32> -> vector<8x16x128xf32>
    %c2 = arith.constant 2 : index
    %c0_11 = arith.constant 0 : index
    %31 = vector.load %arg3[%c2, %c0_11] : memref<3x128xf32, #tpu.memory_space<vmem>>, vector<1x128xf32>
    %32 = vector.shape_cast %31 : vector<1x128xf32> to vector<128xf32>
    %33 = vector.shape_cast %32 : vector<128xf32> to vector<1x1x128xf32>
    %34 = vector.extract_strided_slice %4 {offsets = [0, 0, 640], sizes = [8, 13, 128], strides = [1, 1, 1]} : vector<8x16x1152xf32> to vector<8x13x128xf32>
    %35 = vector.broadcast %33 : vector<1x1x128xf32> to vector<8x13x128xf32>
    %36 = arith.addf %35, %34 : vector<8x13x128xf32>
    %37 = vector.extract_strided_slice %4 {offsets = [0, 1, 768], sizes = [8, 13, 128], strides = [1, 1, 1]} : vector<8x16x1152xf32> to vector<8x13x128xf32>
    %38 = arith.addf %36, %37 : vector<8x13x128xf32>
    %39 = vector.extract_strided_slice %4 {offsets = [0, 2, 896], sizes = [8, 13, 128], strides = [1, 1, 1]} : vector<8x16x1152xf32> to vector<8x13x128xf32>
    %40 = arith.addf %38, %39 : vector<8x13x128xf32>
    %41 = vector.extract_strided_slice %4 {offsets = [0, 3, 1024], sizes = [8, 13, 128], strides = [1, 1, 1]} : vector<8x16x1152xf32> to vector<8x13x128xf32>
    %42 = arith.addf %40, %41 : vector<8x13x128xf32>
    %cst_12 = arith.constant 0.000000e+00 : f32
    %43 = vector.broadcast %cst_12 : f32 to vector<8x13x128xf32>
    %44 = arith.maximumf %42, %43 : vector<8x13x128xf32>
    %cst_13 = arith.constant 0.000000e+00 : f32
    %45 = vector.broadcast %cst_13 : f32 to vector<8x3x128xf32>
    %46 = tpu.concatenate %44, %45 in 1 : vector<8x13x128xf32>, vector<8x3x128xf32> -> vector<8x16x128xf32>
    %47 = tpu.concatenate %16, %30, %46 in 1 : vector<8x16x128xf32>, vector<8x16x128xf32>, vector<8x16x128xf32> -> vector<8x48x128xf32>
    %c0_14 = arith.constant 0 : index
    %c0_15 = arith.constant 0 : index
    %c0_16 = arith.constant 0 : index
    %48 = vector.load %arg4[%c0_14, %c0_15, %c0_16] : memref<8x48x128xf32, #tpu.memory_space<vmem>>, vector<8x48x128xf32>
    tpu.vector_store %arg4[%c0_14, %c0_15, %c0_16], %47 {strides = array<i32>} : memref<8x48x128xf32, #tpu.memory_space<vmem>>, vector<8x48x128xf32>,
    return
  }
  func.func @transform_0(%arg0: i32) -> (i32, i32, i32) {
    %c0_i32 = arith.constant 0 : i32
    %c0_i32_0 = arith.constant 0 : i32
    %c0_i32_1 = arith.constant 0 : i32
    return %arg0, %c0_i32, %c0_i32_0 : i32, i32, i32
  }
  func.func @transform_1(%arg0: i32) -> (i32, i32) {
    %c0_i32 = arith.constant 0 : i32
    %c0_i32_0 = arith.constant 0 : i32
    %c0_i32_1 = arith.constant 0 : i32
    return %c0_i32, %c0_i32_0 : i32, i32
  }
  func.func @transform_2(%arg0: i32) -> (i32, i32) {
    %c0_i32 = arith.constant 0 : i32
    %c0_i32_0 = arith.constant 0 : i32
    %c0_i32_1 = arith.constant 0 : i32
    return %c0_i32, %c0_i32_0 : i32, i32
  }
  func.func @transform_3(%arg0: i32) -> (i32, i32, i32) {
    %c0_i32 = arith.constant 0 : i32
    %c0_i32_0 = arith.constant 0 : i32
    %c0_i32_1 = arith.constant 0 : i32
    return %arg0, %c0_i32, %c0_i32_0 : i32, i32, i32
  }
}

</mosaic_0001>

<bundles_post_ra>
// kernel: bert_word_mapping_forward.1
= control target key start
LH: loop header
LB: loop body
LE: loop exit
PB: predicated region body
PF: predicated region fallthrough
CT: control target
= control target key end

     0   :  { %8 = vsyncpa [#allocation3], 0  ;;  %s7164_s0 = inlined_call_operand.hbm [shape: f32[16,16,768], index: 0, kind: input, shape index: {}]   ;;  %s7165_s1 = inlined_call_operand.hbm [shape: f32[768,1152], index: 1, kind: input, shape index: {}]   ;;  %s7166_s2 = inlined_call_operand.hbm [shape: f32[3,128], index: 2, kind: input, shape index: {}]   ;;  %s7167_s3 = inlined_call_operand.vmem [shape: f32[16,48,128], index: 3, kind: output, shape index: {}]  }
   0x1   :  { %10 = vsyncpa [#allocation3 + $0x1], 0 }
   0x2   :  { %11 = vsyncpa [#allocation5], 0  ;;  %s4971_s12 = smov 0   ;;  %s4973_s13 = smov 0  }
   0x3   :  { %s4975_s14 = smov 0   ;;  %s4977_s15 = smov 0  }
   0x4 LB: > { %s4256_s16 = sadd.s32 4294967295, %s4942_s15   ;;  %p37_p0 = scmp.ne.s32.totalorder %s4934_s13, %s4930_s12  ;;  %s4942_s15 = sphi %s4977_s15, %s7530_s15   ;;  %s4938_s14 = sphi %s4975_s14, %s7529_s14   ;;  %s4934_s13 = sphi %s4973_s13, %s7528_s13   ;;  %s4930_s12 = sphi %s4971_s12, %s7527_s12  }
   0x5   : > { %p4993_p1 = scmp.eq.s32.totalorder %s4256_s16, 0  ;;  %p4258_p2 = scmp.ge.s32.totalorder %s4942_s15, 1 }
   0x6   : > { %p116_p3 = scmp.lt.s32.totalorder %s4942_s15, 3  ;;  %s4944_s20 = smov [#allocation4]  }
   0x7   : > { %s7193_s17 = scalar_select %p4993_p1, 1, 0 }
   0x8   : > { %p5001_p4 = por %p4993_p1, %p37_p0  ;;  %p5005_p5 = pnand %p4258_p2, %p116_p3 }
   0x9   : > { %s128_s21 = sshll.u32 %s4944_s20, 4  ;;  %s4945_s23 = smov [#allocation6]   ;;  %s129_s21 = int_to_ptr.vmem [resolvable:$true] %s128_s21 }
   0xa   : > { %s7194_s18 = scalar_select %p5001_p4, 1, 0 }
   0xb   : > { %s7195_s19 = scalar_select %p5005_p5, 1, 0 }
   0xc   : > { %p4561_p6 = pneg %p5005_p5  ;;  %s142_s24 = sshll.u32 %s4945_s23, 4  ;;  %s143_s24 = int_to_ptr.vmem [resolvable:$true] %s142_s24 }
   0xd   : > { %s4835_s25 = scalar_lea.vmem %s129_s21, 110592  ;;  %p4843_p12 = scmp.lt.s32.totalorder %s129_s21, %s129_s21 }
   0xe   : > { %p5013_p7 = pnand %p4561_p6, %p4993_p1  ;;  %p4836_p9 = scmp.ne.s32.totalorder %s129_s21, %s4835_s25 }
   0xf   : > { %p4844_p13 = scmp.lt.s32.totalorder %s4835_s25, %s4835_s25 }
  0x10   : > { %p4826_p8 = pneg %p5013_p7 }
  0x11   : > { %p4845_p0 = por %p4844_p13, %p4843_p12 }
  0x12   : > { %p4838_p10 = pnand %p4836_p9, %p4826_p8 }
  0x14   : > { %p4839_p11 = pneg %p4838_p10 }
  0x16   : > { %p4846_p2 = pnand %p4845_p0, %p4839_p11 }
  0x18   : > { %4849 = shalt.err (!%p4846_p2)
}
  0x19   : > { %s4946_s26 = smov 1152   ;;  %s4947_s27 = smov 72  }
  0x1a   : > { %4564 = dma.hbm_to_vmem [thread:$0]  (!%p5013_p7), %s7165_s1, 110592, %s129_s21, [#allocation5], %s4946_s26, %s4946_s26, %s4947_s27  }
  0x1b   : > { %s4861_s30 = scalar_lea.vmem %s143_s24, 64  ;;  %p4869_p10 = scmp.lt.s32.totalorder %s143_s24, %s143_s24 }
  0x1c   : > { %p4862_p3 = scmp.ne.s32.totalorder %s143_s24, %s4861_s30  ;;  %p4870_p1 = scmp.lt.s32.totalorder %s4861_s30, %s4861_s30 }
  0x1e   : > { %p4864_p6 = pnand %p4862_p3, %p4826_p8  ;;  %p4871_p12 = por %p4870_p1, %p4869_p10 }
  0x20   : > { %p4865_p9 = pneg %p4864_p6 }
  0x22   : > { %p4872_p11 = pnand %p4871_p12, %p4865_p9 }
  0x24   : > { %4875 = shalt.err (!%p4872_p11)
}
  0x25   : > { %4567 = dma.hbm_to_vmem [thread:$0]  (!%p5013_p7), %s7166_s2, 64, %s143_s24, [#allocation5]  }
  0x26   : > { %s5036_s6 = sadd.s32 1, %s4942_s15   ;;  %s24_s7 = sadd.s32 1, %s4938_s14 }
  0x27   : > { %s21_s8 = ssub.s32 %s4942_s15, %s5036_s6  ;;  %p31_p1 = scmp.ne.s32.totalorder %s4938_s14, %s4934_s13 }
  0x28   : > { %p22_p8 = scmp.eq.s32.totalorder %s21_s8, 0  ;;  %p32_p13 = scmp.eq.s32.totalorder %s4942_s15, 0 }
  0x29   : > { %p4574_p0 = scmp.lt.s32.totalorder %s4942_s15, 2  ;;  %s153_s9 = sand.u32 1, %s4938_s14  }
  0x2a   : > { %s5047_s10 = scalar_select %p22_p8, %s4938_s14, %s24_s7  }
  0x2b   : > { %p33_p2 = por %p32_p13, %p31_p1  ;;  %s4547_s11 = smul.u32 768, %s153_s9 }
  0x2c   : > { %s4548_s12 = smul.u32 12288, %s4942_s15  ;;  %s5061_s26 = scalar_lea.sflag [#allocation3], %s153_s9 }
  0x2d   : > { %p5050_p3 = pnand %p4574_p0, %p33_p2  ;;  %s157_s24 = scalar_lea.vmem [#allocation2], %s4547_s11 }
  0x2e   : > { %s5057_s23 = scalar_lea.hbm %s7164_s0, %s4548_s12  ;;  %s165_s25 = sshll.u32 %s157_s24, 4  ;;  %s5059_s25 = int_to_ptr.vmem [resolvable:$true] %s165_s25 }
  0x2f   : > { %s4876_s27 = scalar_lea.hbm %s5057_s23, 12288  ;;  %p4878_p6 = pneg %p5050_p3 }
  0x30   : > { %p4877_p7 = scmp.ne.s32.totalorder %s5057_s23, %s4876_s27  ;;  %s4881_s30 = scalar_lea.hbm %s7164_s0, 24576 }
  0x31   : > { %p4882_p12 = scmp.lt.s32.totalorder %s5057_s23, %s7164_s0  ;;  %p4883_p11 = scmp.lt.s32.totalorder %s4881_s30, %s4876_s27 }
  0x32   : > { %p4879_p9 = pnand %p4878_p6, %p4877_p7 }
  0x33   : > { %p4884_p1 = por %p4883_p11, %p4882_p12 }
  0x34   : > { %p4880_p10 = pneg %p4879_p9 }
  0x36   : > { %p4885_p8 = pnand %p4884_p1, %p4880_p10 }
  0x38   : > { %4888 = shalt.err (!%p4885_p8)
}
  0x39   : > { %s4889_s7 = scalar_lea.vmem %s5059_s25, 12288  ;;  %s4948_s8 = smov [#allocation2]  }
  0x3a   : > { %p4890_p13 = scmp.ne.s32.totalorder %s5059_s25, %s4889_s7  ;;  %s4894_s9 = sshll.u32 %s4948_s8, 4  ;;  %s4895_s9 = int_to_ptr.vmem [resolvable:$false] %s4894_s9 }
  0x3b   : > { %s4896_s11 = scalar_lea.vmem %s4895_s9, 24576  ;;  %p4897_p7 = scmp.lt.s32.totalorder %s5059_s25, %s4895_s9 }
  0x3c   : > { %p4892_p0 = pnand %p4890_p13, %p4878_p6  ;;  %p4898_p9 = scmp.lt.s32.totalorder %s4896_s11, %s4889_s7 }
  0x3e   : > { %p4893_p2 = pneg %p4892_p0  ;;  %p4899_p4 = por %p4898_p9, %p4897_p7 }
  0x40   : > { %p4900_p5 = pnand %p4899_p4, %p4893_p2 }
  0x42   : > { %4903 = shalt.err (!%p4900_p5)
}
  0x43   : > { %s4949_s12 = smov 768   ;;  %s4950_s21 = smov 48  }
  0x44   : > { %4571 = dma.hbm_to_vmem [thread:$0]  (!%p5050_p3), %s5057_s23, 12288, %s5059_s25, %s5061_s26, %s4949_s12, %s4949_s12, %s4950_s21  }
  0x45   : > { %p7198_p6 = scmp.ne.s32.totalorder %s7195_s19, 0 }
  0x47   : > { %177 = sbr.rel (%p7198_p6) target bundleno = 1010 (0x3f2), region = 32 }
  0x4c   : > { %s179_s22 = sand.u32 1, %s4934_s13   ;;  %p7199_p4 = scmp.ne.s32.totalorder %s7194_s18, 0 }
  0x4d   : > { %s4549_s24 = smul.u32 768, %s179_s22  ;;  %s180_s27 = scalar_lea.sflag [#allocation3], %s179_s22 }
  0x4f   : > { %s5085_s28 = scalar_lea.vmem [#allocation2], %s4549_s24 }
  0x50   : > { %4921 = dma.done.wait (%p7199_p4), %s180_s27, 12288  }
  0x51   : > { %4923 = vsyncadd (%p7199_p4), %s180_s27, 4294955008  ;;  %p7200_p5 = scmp.ne.s32.totalorder %s7193_s17, 0 }
  0x53   : > { %4925 = dma.done.wait (%p7200_p5), [#allocation5], 110656  }
  0x54   : > { %4927 = vsyncadd (%p7200_p5), [#allocation5], 4294856640  ;;  %v455_v0 = vld [vmem:[#allocation4 + $0x440] sm:$0xff]  ;;  %v454_v2 = vld [vmem:[#allocation4 + $0x438] sm:$0xff]  ;;  %s5696_s17 = sshll.u32 %s4256_s16, 3  ;;  %vm3587_vm0 = vcmask 1046528  }
  0x55   : > { %v743_v1 = vld [vmem:[#allocation4 + $0xd40] sm:$0xff]  ;;  %1183 = vmatprep.subr.mxu0 %v455_v0  ;;  %v742_v3 = vld [vmem:[#allocation4 + $0xd38] sm:$0xff]  ;;  %v445_v6 = vld [vmem:[#allocation4 + $0x3f0] sm:$0xff]  ;;  %p217_p3 = scmp.lt.s32.totalorder %s5696_s17, 15  ;;  %vm3777_vm1 = vcmask 1045504   ;;  %vm4039_vm2 = vcmask 1044480  }
  0x56   : > { %1344 = vmatprep.subr.mxu1 %v743_v1  ;;  %v446_v4 = vld [vmem:[#allocation4 + $0x3f8] sm:$0xff]  ;;  %1184 = vmatpush1.msra.mxu0 %v454_v2  ;;  %v733_v7 = vld [vmem:[#allocation4 + $0xcf0] sm:$0xff]  ;;  %v436_v10 = vld [vmem:[#allocation4 + $0x3a8] sm:$0xff] }
  0x57   : > { %v734_v5 = vld [vmem:[#allocation4 + $0xcf8] sm:$0xff]  ;;  %1345 = vmatpush1.msra.mxu1 %v742_v3  ;;  %v437_v8 = vld [vmem:[#allocation4 + $0x3b0] sm:$0xff]  ;;  %1185 = vmatprep.subr.mxu0 %v446_v4  ;;  %v724_v11 = vld [vmem:[#allocation4 + $0xca8] sm:$0xff]  ;;  %s7532_s17 = smov (!%p217_p3, %s5696_s17), 15 }
  0x58   : > { %1346 = vmatprep.subr.mxu1 %v734_v5  ;;  %v725_v9 = vld [vmem:[#allocation4 + $0xcb0] sm:$0xff]  ;;  %1186 = vmatpush1.msra.mxu0 %v445_v6  ;;  %v428_v12 = vld [vmem:[#allocation4 + $0x368] sm:$0xff]  ;;  %v427_v14 = vld [vmem:[#allocation4 + $0x360] sm:$0xff]  ;;  %s4550_s15 = smul.u32 48, %s7532_s17 }
  0x59   : > { %1347 = vmatpush1.msra.mxu1 %v733_v7  ;;  %v716_v13 = vld [vmem:[#allocation4 + $0xc68] sm:$0xff]  ;;  %1187 = vmatprep.subr.mxu0 %v437_v8  ;;  %v715_v15 = vld [vmem:[#allocation4 + $0xc60] sm:$0xff]  ;;  %v418_v18 = vld [vmem:[#allocation4 + $0x318] sm:$0xff] }
  0x5a   : > { %1348 = vmatprep.subr.mxu1 %v725_v9  ;;  %1188 = vmatpush1.msra.mxu0 %v436_v10  ;;  %v419_v16 = vld [vmem:[#allocation4 + $0x320] sm:$0xff]  ;;  %v706_v19 = vld [vmem:[#allocation4 + $0xc18] sm:$0xff]  ;;  %v409_v22 = vld [vmem:[#allocation4 + $0x2d0] sm:$0xff]  ;;  %s5739_s19 = scalar_lea.vmem %s7167_s3, %s4550_s15 }
  0x5b   : > { %1349 = vmatpush1.msra.mxu1 %v724_v11  ;;  %v707_v17 = vld [vmem:[#allocation4 + $0xc20] sm:$0xff]  ;;  %1189 = vmatprep.subr.mxu0 %v428_v12  ;;  %v410_v20 = vld [vmem:[#allocation4 + $0x2d8] sm:$0xff]  ;;  %v697_v23 = vld [vmem:[#allocation4 + $0xbd0] sm:$0xff] }
  0x5c   : > { %1350 = vmatprep.subr.mxu1 %v716_v13  ;;  %1190 = vmatpush1.msra.mxu0 %v427_v14  ;;  %v698_v21 = vld [vmem:[#allocation4 + $0xbd8] sm:$0xff]  ;;  %v401_v24 = vld [vmem:[#allocation4 + $0x290] sm:$0xff]  ;;  %v400_v26 = vld [vmem:[#allocation4 + $0x288] sm:$0xff] }
  0x5d   : > { %1351 = vmatpush1.msra.mxu1 %v715_v15  ;;  %1191 = vmatprep.subr.mxu0 %v419_v16  ;;  %v689_v25 = vld [vmem:[#allocation4 + $0xb90] sm:$0xff]  ;;  %v688_v27 = vld [vmem:[#allocation4 + $0xb88] sm:$0xff]  ;;  %v391_v30 = vld [vmem:[#allocation4 + $0x240] sm:$0xff] }
  0x5e   : > { %1352 = vmatprep.subr.mxu1 %v707_v17  ;;  %1192 = vmatpush1.msra.mxu0 %v418_v18  ;;  %v392_v28 = vld [vmem:[#allocation4 + $0x248] sm:$0xff]  ;;  %v679_v31 = vld [vmem:[#allocation4 + $0xb40] sm:$0xff]  ;;  %v382_v34 = vld [vmem:[#allocation4 + $0x1f8] sm:$0xff] }
  0x5f   : > { %1353 = vmatpush1.msra.mxu1 %v706_v19  ;;  %1193 = vmatprep.subr.mxu0 %v410_v20  ;;  %v680_v29 = vld [vmem:[#allocation4 + $0xb48] sm:$0xff]  ;;  %v383_v32 = vld [vmem:[#allocation4 + $0x200] sm:$0xff]  ;;  %v670_v35 = vld [vmem:[#allocation4 + $0xaf8] sm:$0xff] }
  0x60   : > { %1354 = vmatprep.subr.mxu1 %v698_v21  ;;  %1194 = vmatpush1.msra.mxu0 %v409_v22  ;;  %v671_v33 = vld [vmem:[#allocation4 + $0xb00] sm:$0xff]  ;;  %v374_v36 = vld [vmem:[#allocation4 + $0x1b8] sm:$0xff]  ;;  %v373_v38 = vld [vmem:[#allocation4 + $0x1b0] sm:$0xff] }
  0x61   : > { %1355 = vmatpush1.msra.mxu1 %v697_v23  ;;  %1195 = vmatprep.subr.mxu0 %v401_v24  ;;  %v662_v37 = vld [vmem:[#allocation4 + $0xab8] sm:$0xff]  ;;  %v661_v39 = vld [vmem:[#allocation4 + $0xab0] sm:$0xff]  ;;  %v364_v42 = vld [vmem:[#allocation4 + $0x168] sm:$0xff] }
  0x62   : > { %1356 = vmatprep.subr.mxu1 %v689_v25  ;;  %1196 = vmatpush1.msra.mxu0 %v400_v26  ;;  %v365_v40 = vld [vmem:[#allocation4 + $0x170] sm:$0xff]  ;;  %v652_v43 = vld [vmem:[#allocation4 + $0xa68] sm:$0xff]  ;;  %v355_v46 = vld [vmem:[#allocation4 + $0x120] sm:$0xff] }
  0x63   : > { %1357 = vmatpush1.msra.mxu1 %v688_v27  ;;  %1197 = vmatprep.subr.mxu0 %v392_v28  ;;  %v653_v41 = vld [vmem:[#allocation4 + $0xa70] sm:$0xff]  ;;  %v356_v44 = vld [vmem:[#allocation4 + $0x128] sm:$0xff]  ;;  %v643_v47 = vld [vmem:[#allocation4 + $0xa20] sm:$0xff] }
  0x64   : > { %1358 = vmatprep.subr.mxu1 %v680_v29  ;;  %1198 = vmatpush1.msra.mxu0 %v391_v30  ;;  %v644_v45 = vld [vmem:[#allocation4 + $0xa28] sm:$0xff]  ;;  %v347_v48 = vld [vmem:[#allocation4 + $0xe0] sm:$0xff]  ;;  %v346_v50 = vld [vmem:[#allocation4 + $0xd8] sm:$0xff] }
  0x65   : > { %1359 = vmatpush1.msra.mxu1 %v679_v31  ;;  %1199 = vmatprep.subr.mxu0 %v383_v32  ;;  %v635_v49 = vld [vmem:[#allocation4 + $0x9e0] sm:$0xff]  ;;  %v634_v51 = vld [vmem:[#allocation4 + $0x9d8] sm:$0xff]  ;;  %v337_v54 = vld [vmem:[#allocation4 + $0x90] sm:$0xff] }
  0x66   : > { %1360 = vmatprep.subr.mxu1 %v671_v33  ;;  %1200 = vmatpush1.msra.mxu0 %v382_v34  ;;  %v338_v52 = vld [vmem:[#allocation4 + $0x98] sm:$0xff]  ;;  %v625_v55 = vld [vmem:[#allocation4 + $0x990] sm:$0xff]  ;;  %v328_v58 = vld [vmem:[#allocation4 + $0x48] sm:$0xff] }
  0x67   : > { %1361 = vmatpush1.msra.mxu1 %v670_v35  ;;  %1201 = vmatprep.subr.mxu0 %v374_v36  ;;  %v626_v53 = vld [vmem:[#allocation4 + $0x998] sm:$0xff]  ;;  %v329_v56 = vld [vmem:[#allocation4 + $0x50] sm:$0xff]  ;;  %v616_v59 = vld [vmem:[#allocation4 + $0x948] sm:$0xff] }
  0x68   : > { %1362 = vmatprep.subr.mxu1 %v662_v37  ;;  %1202 = vmatpush1.msra.mxu0 %v373_v38  ;;  %v617_v57 = vld [vmem:[#allocation4 + $0x950] sm:$0xff]  ;;  %v320_v60 = vld [vmem:[#allocation4 + $0x8] sm:$0xff]  ;;  %v319_v62 = vld [vmem:[#allocation4] sm:$0xff] }
  0x69   : > { %1363 = vmatpush1.msra.mxu1 %v661_v39  ;;  %1203 = vmatprep.subr.mxu0 %v365_v40  ;;  %v608_v61 = vld [vmem:[#allocation4 + $0x908] sm:$0xff]  ;;  %v607_v63 = vld [vmem:[#allocation4 + $0x900] sm:$0xff]  ;;  %v598_v2 = vld [vmem:[#allocation4 + $0x8b8] sm:$0xff] }
  0x6a   : > { %1364 = vmatprep.subr.mxu1 %v653_v41  ;;  %1204 = vmatpush1.msra.mxu0 %v364_v42  ;;  %v599_v0 = vld [vmem:[#allocation4 + $0x8c0] sm:$0xff]  ;;  %v886_v3 = vld [vmem:[#allocation4 + $0x11b8] sm:$0xff]  ;;  %v589_v6 = vld [vmem:[#allocation4 + $0x870] sm:$0xff] }
  0x6b   : > { %1365 = vmatpush1.msra.mxu1 %v652_v43  ;;  %1205 = vmatprep.subr.mxu0 %v356_v44  ;;  %v887_v1 = vld [vmem:[#allocation4 + $0x11c0] sm:$0xff]  ;;  %v590_v4 = vld [vmem:[#allocation4 + $0x878] sm:$0xff]  ;;  %v877_v7 = vld [vmem:[#allocation4 + $0x1170] sm:$0xff] }
  0x6c   : > { %1366 = vmatprep.subr.mxu1 %v644_v45  ;;  %1206 = vmatpush1.msra.mxu0 %v355_v46  ;;  %v878_v5 = vld [vmem:[#allocation4 + $0x1178] sm:$0xff]  ;;  %v581_v8 = vld [vmem:[#allocation4 + $0x830] sm:$0xff]  ;;  %v580_v10 = vld [vmem:[#allocation4 + $0x828] sm:$0xff] }
  0x6d   : > { %1367 = vmatpush1.msra.mxu1 %v643_v47  ;;  %1207 = vmatprep.subr.mxu0 %v347_v48  ;;  %v869_v9 = vld [vmem:[#allocation4 + $0x1130] sm:$0xff]  ;;  %v868_v11 = vld [vmem:[#allocation4 + $0x1128] sm:$0xff]  ;;  %v571_v14 = vld [vmem:[#allocation4 + $0x7e0] sm:$0xff] }
  0x6e   : > { %1368 = vmatprep.subr.mxu1 %v635_v49  ;;  %1208 = vmatpush1.msra.mxu0 %v346_v50  ;;  %v572_v12 = vld [vmem:[#allocation4 + $0x7e8] sm:$0xff]  ;;  %v859_v15 = vld [vmem:[#allocation4 + $0x10e0] sm:$0xff]  ;;  %v562_v18 = vld [vmem:[#allocation4 + $0x798] sm:$0xff] }
  0x6f   : > { %1369 = vmatpush1.msra.mxu1 %v634_v51  ;;  %1209 = vmatprep.subr.mxu0 %v338_v52  ;;  %v860_v13 = vld [vmem:[#allocation4 + $0x10e8] sm:$0xff]  ;;  %v563_v16 = vld [vmem:[#allocation4 + $0x7a0] sm:$0xff]  ;;  %v850_v19 = vld [vmem:[#allocation4 + $0x1098] sm:$0xff] }
  0x70   : > { %1370 = vmatprep.subr.mxu1 %v626_v53  ;;  %1210 = vmatpush1.msra.mxu0 %v337_v54  ;;  %v851_v17 = vld [vmem:[#allocation4 + $0x10a0] sm:$0xff]  ;;  %v554_v20 = vld [vmem:[#allocation4 + $0x758] sm:$0xff]  ;;  %v553_v22 = vld [vmem:[#allocation4 + $0x750] sm:$0xff] }
  0x71   : > { %1371 = vmatpush1.msra.mxu1 %v625_v55  ;;  %1211 = vmatprep.subr.mxu0 %v329_v56  ;;  %v842_v21 = vld [vmem:[#allocation4 + $0x1058] sm:$0xff]  ;;  %v841_v23 = vld [vmem:[#allocation4 + $0x1050] sm:$0xff]  ;;  %v544_v26 = vld [vmem:[#allocation4 + $0x708] sm:$0xff] }
  0x72   : > { %1372 = vmatprep.subr.mxu1 %v617_v57  ;;  %1212 = vmatpush1.msra.mxu0 %v328_v58  ;;  %v545_v24 = vld [vmem:[#allocation4 + $0x710] sm:$0xff]  ;;  %v832_v27 = vld [vmem:[#allocation4 + $0x1008] sm:$0xff]  ;;  %v535_v30 = vld [vmem:[#allocation4 + $0x6c0] sm:$0xff] }
  0x73   : > { %1373 = vmatpush1.msra.mxu1 %v616_v59  ;;  %1213 = vmatprep.subr.mxu0 %v320_v60  ;;  %v833_v25 = vld [vmem:[#allocation4 + $0x1010] sm:$0xff]  ;;  %v536_v28 = vld [vmem:[#allocation4 + $0x6c8] sm:$0xff]  ;;  %v823_v31 = vld [vmem:[#allocation4 + $0xfc0] sm:$0xff] }
  0x74   : > { %1374 = vmatprep.subr.mxu1 %v608_v61  ;;  %1214 = vmatpush1.msra.mxu0 %v319_v62  ;;  %v824_v29 = vld [vmem:[#allocation4 + $0xfc8] sm:$0xff]  ;;  %v527_v32 = vld [vmem:[#allocation4 + $0x680] sm:$0xff]  ;;  %v526_v34 = vld [vmem:[#allocation4 + $0x678] sm:$0xff] }
  0x75   : > { %1375 = vmatpush1.msra.mxu1 %v607_v63  ;;  %1215 = vmatprep.subr.mxu0 %v599_v0  ;;  %v815_v33 = vld [vmem:[#allocation4 + $0xf80] sm:$0xff]  ;;  %v814_v35 = vld [vmem:[#allocation4 + $0xf78] sm:$0xff]  ;;  %v517_v38 = vld [vmem:[#allocation4 + $0x630] sm:$0xff] }
  0x76   : > { %1376 = vmatprep.subr.mxu1 %v887_v1  ;;  %1216 = vmatpush2.msra.mxu0 %v598_v2  ;;  %v518_v36 = vld [vmem:[#allocation4 + $0x638] sm:$0xff]  ;;  %v805_v39 = vld [vmem:[#allocation4 + $0xf30] sm:$0xff]  ;;  %v508_v42 = vld [vmem:[#allocation4 + $0x5e8] sm:$0xff] }
  0x77   : > { %1377 = vmatpush2.msra.mxu1 %v886_v3  ;;  %1217 = vmatprep.subr.mxu0 %v590_v4  ;;  %v806_v37 = vld [vmem:[#allocation4 + $0xf38] sm:$0xff]  ;;  %v509_v40 = vld [vmem:[#allocation4 + $0x5f0] sm:$0xff]  ;;  %v796_v43 = vld [vmem:[#allocation4 + $0xee8] sm:$0xff] }
  0x78   : > { %1378 = vmatprep.subr.mxu1 %v878_v5  ;;  %1218 = vmatpush2.msra.mxu0 %v589_v6  ;;  %v797_v41 = vld [vmem:[#allocation4 + $0xef0] sm:$0xff]  ;;  %v500_v44 = vld [vmem:[#allocation4 + $0x5a8] sm:$0xff]  ;;  %v499_v46 = vld [vmem:[#allocation4 + $0x5a0] sm:$0xff] }
  0x79   : > { %1379 = vmatpush2.msra.mxu1 %v877_v7  ;;  %1219 = vmatprep.subr.mxu0 %v581_v8  ;;  %v788_v45 = vld [vmem:[#allocation4 + $0xea8] sm:$0xff]  ;;  %v787_v47 = vld [vmem:[#allocation4 + $0xea0] sm:$0xff]  ;;  %v490_v50 = vld [vmem:[#allocation4 + $0x558] sm:$0xff] }
  0x7a   : > { %1380 = vmatprep.subr.mxu1 %v869_v9  ;;  %1220 = vmatpush2.msra.mxu0 %v580_v10  ;;  %v491_v48 = vld [vmem:[#allocation4 + $0x560] sm:$0xff]  ;;  %v778_v51 = vld [vmem:[#allocation4 + $0xe58] sm:$0xff]  ;;  %v481_v54 = vld [vmem:[#allocation4 + $0x510] sm:$0xff] }
  0x7b   : > { %1381 = vmatpush2.msra.mxu1 %v868_v11  ;;  %1221 = vmatprep.subr.mxu0 %v572_v12  ;;  %v779_v49 = vld [vmem:[#allocation4 + $0xe60] sm:$0xff]  ;;  %v482_v52 = vld [vmem:[#allocation4 + $0x518] sm:$0xff]  ;;  %v769_v55 = vld [vmem:[#allocation4 + $0xe10] sm:$0xff] }
  0x7c   : > { %1382 = vmatprep.subr.mxu1 %v860_v13  ;;  %1222 = vmatpush2.msra.mxu0 %v571_v14  ;;  %v770_v53 = vld [vmem:[#allocation4 + $0xe18] sm:$0xff]  ;;  %v473_v56 = vld [vmem:[#allocation4 + $0x4d0] sm:$0xff]  ;;  %v472_v58 = vld [vmem:[#allocation4 + $0x4c8] sm:$0xff] }
  0x7d   : > { %1383 = vmatpush2.msra.mxu1 %v859_v15  ;;  %1223 = vmatprep.subr.mxu0 %v563_v16  ;;  %v761_v57 = vld [vmem:[#allocation4 + $0xdd0] sm:$0xff]  ;;  %v760_v59 = vld [vmem:[#allocation4 + $0xdc8] sm:$0xff]  ;;  %v463_v62 = vld [vmem:[#allocation4 + $0x480] sm:$0xff] }
  0x7e   : > { %1384 = vmatprep.subr.mxu1 %v851_v17  ;;  %1224 = vmatpush2.msra.mxu0 %v562_v18  ;;  %v464_v60 = vld [vmem:[#allocation4 + $0x488] sm:$0xff]  ;;  %v751_v0 = vld [vmem:[#allocation4 + $0xd80] sm:$0xff]  ;;  %v226_v1 = vld [vmem:[%s5085_s28 + $0x18] sm:$0xff] }
  0x7f   : > { %1385 = vmatpush2.msra.mxu1 %v850_v19  ;;  %1225 = vmatprep.subr.mxu0 %v554_v20  ;;  %v752_v61 = vld [vmem:[#allocation4 + $0xd88] sm:$0xff]  ;;  %v5100_v2 = vld [vmem:[%s5085_s28] sm:$0xff]  ;;  %v225_v3 = vld [vmem:[%s5085_s28 + $0x10] sm:$0xff] }
  0x80   : > { %1386 = vmatprep.subr.mxu1 %v842_v21  ;;  %1226 = vmatpush2.msra.mxu0 %v553_v22  ;;  %v5096_v63 = vld [vmem:[%s5085_s28 + $0x8] sm:$0xff]  ;;  %v1031_v4 = vld [vmem:[#allocation4 + $0x1640] sm:$0xff]  ;;  %v457_v5 = vld [vmem:[#allocation4 + $0x450] sm:$0xff] }
  0x81   : > { %1387 = vmatpush2.msra.mxu1 %v841_v23  ;;  %1227 = vmatprep.subr.mxu0 %v545_v24  ;;  %v1030_v6 = vld [vmem:[#allocation4 + $0x1638] sm:$0xff]  ;;  %v456_v7 = vld [vmem:[#allocation4 + $0x448] sm:$0xff]  ;;  %v1021_v12 = vld [vmem:[#allocation4 + $0x15f0] sm:$0xff] }
  0x82   : > { %1388 = vmatprep.subr.mxu1 %v833_v25  ;;  %1228 = vmatpush2.msra.mxu0 %v544_v26  ;;  %v1022_v8 = vld [vmem:[#allocation4 + $0x15f8] sm:$0xff]  ;;  %v448_v9 = vld [vmem:[#allocation4 + $0x408] sm:$0xff]  ;;  %v447_v13 = vld [vmem:[#allocation4 + $0x400] sm:$0xff] }
  0x83   : > { %1389 = vmatpush2.msra.mxu1 %v832_v27  ;;  %1229 = vmatprep.subr.mxu0 %v536_v28  ;;  %v5106_v10 = vld [vmem:[%s5085_s28 + $0x38] sm:$0xff]  ;;  %v232_v11 = vld [vmem:[%s5085_s28 + $0x48] sm:$0xff]  ;;  %v5110_v14 = vld [vmem:[%s5085_s28 + $0x30] sm:$0xff] }
  0x84   : > { %1390 = vmatprep.subr.mxu1 %v824_v29  ;;  %1230 = vmatpush2.msra.mxu0 %v535_v30  ;;  %v231_v15 = vld [vmem:[%s5085_s28 + $0x40] sm:$0xff]  ;;  %v1013_v16 = vld [vmem:[#allocation4 + $0x15b0] sm:$0xff]  ;;  %v1012_v18 = vld [vmem:[#allocation4 + $0x15a8] sm:$0xff] }
  0x85   : > { %1391 = vmatpush2.msra.mxu1 %v823_v31  ;;  %1231 = vmatprep.subr.mxu0 %v527_v32  ;;  %v439_v17 = vld [vmem:[#allocation4 + $0x3c0] sm:$0xff]  ;;  %v438_v19 = vld [vmem:[#allocation4 + $0x3b8] sm:$0xff]  ;;  %v1004_v20 = vld [vmem:[#allocation4 + $0x1568] sm:$0xff] }
  0x86   : > { %1392 = vmatprep.subr.mxu1 %v815_v33  ;;  %1232 = vmatpush2.msra.mxu0 %v526_v34  ;;  %v430_v21 = vld [vmem:[#allocation4 + $0x378] sm:$0xff]  ;;  %v5116_v22 = vld [vmem:[%s5085_s28 + $0x68] sm:$0xff]  ;;  %v1003_v24 = vld [vmem:[#allocation4 + $0x1560] sm:$0xff] }
  0x87   : > { %1393 = vmatpush2.msra.mxu1 %v814_v35  ;;  %1233 = vmatprep.subr.mxu0 %v518_v36  ;;  %v238_v23 = vld [vmem:[%s5085_s28 + $0x78] sm:$0xff]  ;;  %v429_v25 = vld [vmem:[#allocation4 + $0x370] sm:$0xff]  ;;  %v5120_v26 = vld [vmem:[%s5085_s28 + $0x60] sm:$0xff] }
  0x88   : > { %1394 = vmatprep.subr.mxu1 %v806_v37  ;;  %1234 = vmatpush2.msra.mxu0 %v517_v38  ;;  %v237_v27 = vld [vmem:[%s5085_s28 + $0x70] sm:$0xff]  ;;  %v995_v28 = vld [vmem:[#allocation4 + $0x1520] sm:$0xff]  ;;  %v994_v30 = vld [vmem:[#allocation4 + $0x1518] sm:$0xff] }
  0x89   : > { %1395 = vmatpush2.msra.mxu1 %v805_v39  ;;  %1235 = vmatprep.subr.mxu0 %v509_v40  ;;  %v421_v29 = vld [vmem:[#allocation4 + $0x330] sm:$0xff]  ;;  %v420_v31 = vld [vmem:[#allocation4 + $0x328] sm:$0xff]  ;;  %v986_v32 = vld [vmem:[#allocation4 + $0x14d8] sm:$0xff] }
  0x8a   : > { %1396 = vmatprep.subr.mxu1 %v797_v41  ;;  %1236 = vmatpush2.msra.mxu0 %v508_v42  ;;  %v412_v33 = vld [vmem:[#allocation4 + $0x2e8] sm:$0xff]  ;;  %v5126_v34 = vld [vmem:[%s5085_s28 + $0x98] sm:$0xff]  ;;  %v985_v36 = vld [vmem:[#allocation4 + $0x14d0] sm:$0xff] }
  0x8b   : > { %1397 = vmatpush2.msra.mxu1 %v796_v43  ;;  %1237 = vmatprep.subr.mxu0 %v500_v44  ;;  %v244_v35 = vld [vmem:[%s5085_s28 + $0xa8] sm:$0xff]  ;;  %v411_v37 = vld [vmem:[#allocation4 + $0x2e0] sm:$0xff]  ;;  %v5130_v38 = vld [vmem:[%s5085_s28 + $0x90] sm:$0xff] }
  0x8c   : > { %1398 = vmatprep.subr.mxu1 %v788_v45  ;;  %1238 = vmatpush2.msra.mxu0 %v499_v46  ;;  %v243_v39 = vld [vmem:[%s5085_s28 + $0xa0] sm:$0xff]  ;;  %v977_v40 = vld [vmem:[#allocation4 + $0x1490] sm:$0xff]  ;;  %v976_v42 = vld [vmem:[#allocation4 + $0x1488] sm:$0xff] }
  0x8d   : > { %1399 = vmatpush2.msra.mxu1 %v787_v47  ;;  %1239 = vmatprep.subr.mxu0 %v491_v48  ;;  %v403_v41 = vld [vmem:[#allocation4 + $0x2a0] sm:$0xff]  ;;  %v402_v43 = vld [vmem:[#allocation4 + $0x298] sm:$0xff]  ;;  %v968_v44 = vld [vmem:[#allocation4 + $0x1448] sm:$0xff] }
  0x8e   : > { %1400 = vmatprep.subr.mxu1 %v779_v49  ;;  %1240 = vmatpush2.msra.mxu0 %v490_v50  ;;  %v394_v45 = vld [vmem:[#allocation4 + $0x258] sm:$0xff]  ;;  %v5136_v46 = vld [vmem:[%s5085_s28 + $0xc8] sm:$0xff]  ;;  %v967_v48 = vld [vmem:[#allocation4 + $0x1440] sm:$0xff] }
  0x8f   : > { %1401 = vmatpush2.msra.mxu1 %v778_v51  ;;  %1241 = vmatprep.subr.mxu0 %v482_v52  ;;  %v250_v47 = vld [vmem:[%s5085_s28 + $0xd8] sm:$0xff]  ;;  %v393_v49 = vld [vmem:[#allocation4 + $0x250] sm:$0xff]  ;;  %v5140_v50 = vld [vmem:[%s5085_s28 + $0xc0] sm:$0xff] }
  0x90   : > { %1402 = vmatprep.subr.mxu1 %v770_v53  ;;  %1242 = vmatpush2.msra.mxu0 %v481_v54  ;;  %v249_v51 = vld [vmem:[%s5085_s28 + $0xd0] sm:$0xff]  ;;  %v959_v52 = vld [vmem:[#allocation4 + $0x1400] sm:$0xff]  ;;  %v958_v54 = vld [vmem:[#allocation4 + $0x13f8] sm:$0xff] }
  0x91   : > { %1403 = vmatpush2.msra.mxu1 %v769_v55  ;;  %1243 = vmatprep.subr.mxu0 %v473_v56  ;;  %v385_v53 = vld [vmem:[#allocation4 + $0x210] sm:$0xff]  ;;  %v384_v55 = vld [vmem:[#allocation4 + $0x208] sm:$0xff]  ;;  %v950_v56 = vld [vmem:[#allocation4 + $0x13b8] sm:$0xff] }
  0x92   : > { %1404 = vmatprep.subr.mxu1 %v761_v57  ;;  %1244 = vmatpush2.msra.mxu0 %v472_v58  ;;  %v376_v57 = vld [vmem:[#allocation4 + $0x1c8] sm:$0xff]  ;;  %v5146_v58 = vld [vmem:[%s5085_s28 + $0xf8] sm:$0xff] }
  0x93   : > { %1405 = vmatpush2.msra.mxu1 %v760_v59  ;;  %1245 = vmatprep.subr.mxu0 %v464_v60  ;;  %v256_v59 = vld [vmem:[%s5085_s28 + $0x108] sm:$0xff]  ;;  %v949_v60 = vld [vmem:[#allocation4 + $0x13b0] sm:$0xff] }
  0x94   : > { %1406 = vmatprep.subr.mxu1 %v752_v61  ;;  %1246 = vmatpush2.msra.mxu0 %v463_v62  ;;  %v375_v61 = vld [vmem:[#allocation4 + $0x1c0] sm:$0xff]  ;;  %v5150_v62 = vld [vmem:[%s5085_s28 + $0xf0] sm:$0xff] }
  0x95   : > { %1247 = vmatprep.mubr.f32.mxu0 %v5096_v63  ;;  %1407 = vmatpush2.msra.mxu1 %v751_v0  ;;  %v255_v0 = vld [vmem:[%s5085_s28 + $0x100] sm:$0xff] }
  0x96   : > { %1408 = vmatprep.mubr.f32.mxu1 %v226_v1  ;;  %1248 = vmatmul.mubr.f32.vlgmr.msra.gmra.mxu0 %v5100_v2  ;;  %v941_v1 = vld [vmem:[#allocation4 + $0x1370] sm:$0xff] }
  0x97   : > { %1409 = vmatmul.mubr.f32.vlgmr.msra.gmra.mxu1 %v225_v3  ;;  %1505 = vmatprep.subr.mxu0 %v1031_v4  ;;  %v367_v3 = vld [vmem:[#allocation4 + $0x180] sm:$0xff]  ;;  %v940_v4 = vld [vmem:[#allocation4 + $0x1368] sm:$0xff] }
  0x98   : > { %1666 = vmatprep.subr.mxu1 %v457_v5  ;;  %1506 = vmatpush1.msra.mxu0 %v1030_v6  ;;  %v366_v5 = vld [vmem:[#allocation4 + $0x178] sm:$0xff]  ;;  %v932_v6 = vld [vmem:[#allocation4 + $0x1328] sm:$0xff] }
  0x99   : > { %1667 = vmatpush1.msra.mxu1 %v456_v7  ;;  %1507 = vmatprep.subr.mxu0 %v1022_v8  ;;  %v358_v7 = vld [vmem:[#allocation4 + $0x138] sm:$0xff]  ;;  %v5156_v8 = vld [vmem:[%s5085_s28 + $0x128] sm:$0xff] }
  0x9a   : > { %1668 = vmatprep.subr.mxu1 %v448_v9  ;;  %1253 = vmatprep.mubr.f32.mxu0 %v5106_v10  ;;  %v262_v9 = vld [vmem:[%s5085_s28 + $0x138] sm:$0xff] }
  0x9b   : > { %1414 = vmatprep.mubr.f32.mxu1 %v232_v11  ;;  %1508 = vmatpush1.msra.mxu0 %v1021_v12  ;;  %v931_v11 = vld [vmem:[#allocation4 + $0x1320] sm:$0xff]  ;;  %v357_v12 = vld [vmem:[#allocation4 + $0x130] sm:$0xff] }
  0x9c   : > { %1669 = vmatpush1.msra.mxu1 %v447_v13  ;;  %1254 = vmatmul.mubr.f32.gmra.mxu0 %v5110_v14  ;;  %v5160_v13 = vld [vmem:[%s5085_s28 + $0x120] sm:$0xff] }
  0x9d   : > { %1415 = vmatmul.mubr.f32.gmra.mxu1 %v231_v15  ;;  %1509 = vmatprep.subr.mxu0 %v1013_v16  ;;  %v261_v15 = vld [vmem:[%s5085_s28 + $0x130] sm:$0xff]  ;;  %v923_v16 = vld [vmem:[#allocation4 + $0x12e0] sm:$0xff] }
  0x9e   : > { %1670 = vmatprep.subr.mxu1 %v439_v17  ;;  %1510 = vmatpush1.msra.mxu0 %v1012_v18  ;;  %v349_v17 = vld [vmem:[#allocation4 + $0xf0] sm:$0xff]  ;;  %v922_v18 = vld [vmem:[#allocation4 + $0x12d8] sm:$0xff] }
  0x9f   : > { %1671 = vmatpush1.msra.mxu1 %v438_v19  ;;  %1511 = vmatprep.subr.mxu0 %v1004_v20  ;;  %v348_v19 = vld [vmem:[#allocation4 + $0xe8] sm:$0xff]  ;;  %v914_v20 = vld [vmem:[#allocation4 + $0x1298] sm:$0xff] }
  0xa0   : > { %1672 = vmatprep.subr.mxu1 %v430_v21  ;;  %1259 = vmatprep.mubr.f32.mxu0 %v5116_v22  ;;  %v340_v21 = vld [vmem:[#allocation4 + $0xa8] sm:$0xff] }
  0xa1   : > { %1420 = vmatprep.mubr.f32.mxu1 %v238_v23  ;;  %1512 = vmatpush1.msra.mxu0 %v1003_v24  ;;  %v5166_v23 = vld [vmem:[%s5085_s28 + $0x158] sm:$0xff]  ;;  %v268_v24 = vld [vmem:[%s5085_s28 + $0x168] sm:$0xff] }
  0xa2   : > { %1673 = vmatpush1.msra.mxu1 %v429_v25  ;;  %1260 = vmatmul.mubr.f32.gmra.mxu0 %v5120_v26  ;;  %v913_v25 = vld [vmem:[#allocation4 + $0x1290] sm:$0xff] }
  0xa3   : > { %1421 = vmatmul.mubr.f32.gmra.mxu1 %v237_v27  ;;  %1513 = vmatprep.subr.mxu0 %v995_v28  ;;  %v339_v27 = vld [vmem:[#allocation4 + $0xa0] sm:$0xff]  ;;  %v5170_v28 = vld [vmem:[%s5085_s28 + $0x150] sm:$0xff] }
  0xa4   : > { %1674 = vmatprep.subr.mxu1 %v421_v29  ;;  %1514 = vmatpush1.msra.mxu0 %v994_v30  ;;  %v267_v29 = vld [vmem:[%s5085_s28 + $0x160] sm:$0xff]  ;;  %v905_v30 = vld [vmem:[#allocation4 + $0x1250] sm:$0xff] }
  0xa5   : > { %1675 = vmatpush1.msra.mxu1 %v420_v31  ;;  %1515 = vmatprep.subr.mxu0 %v986_v32  ;;  %v331_v31 = vld [vmem:[#allocation4 + $0x60] sm:$0xff]  ;;  %v904_v32 = vld [vmem:[#allocation4 + $0x1248] sm:$0xff] }
  0xa6   : > { %1676 = vmatprep.subr.mxu1 %v412_v33  ;;  %1265 = vmatprep.mubr.f32.mxu0 %v5126_v34  ;;  %v330_v33 = vld [vmem:[#allocation4 + $0x58] sm:$0xff] }
  0xa7   : > { %1426 = vmatprep.mubr.f32.mxu1 %v244_v35  ;;  %1516 = vmatpush1.msra.mxu0 %v985_v36  ;;  %v896_v35 = vld [vmem:[#allocation4 + $0x1208] sm:$0xff]  ;;  %v322_v36 = vld [vmem:[#allocation4 + $0x18] sm:$0xff] }
  0xa8   : > { %1677 = vmatpush1.msra.mxu1 %v411_v37  ;;  %1266 = vmatmul.mubr.f32.gmra.mxu0 %v5130_v38  ;;  %v5176_v37 = vld [vmem:[%s5085_s28 + $0x188] sm:$0xff] }
  0xa9   : > { %1427 = vmatmul.mubr.f32.gmra.mxu1 %v243_v39  ;;  %1517 = vmatprep.subr.mxu0 %v977_v40  ;;  %v274_v39 = vld [vmem:[%s5085_s28 + $0x198] sm:$0xff]  ;;  %v895_v40 = vld [vmem:[#allocation4 + $0x1200] sm:$0xff] }
  0xaa   : > { %1678 = vmatprep.subr.mxu1 %v403_v41  ;;  %1518 = vmatpush1.msra.mxu0 %v976_v42  ;;  %v321_v41 = vld [vmem:[#allocation4 + $0x10] sm:$0xff]  ;;  %v5180_v42 = vld [vmem:[%s5085_s28 + $0x180] sm:$0xff] }
  0xab   : > { %1679 = vmatpush1.msra.mxu1 %v402_v43  ;;  %1519 = vmatprep.subr.mxu0 %v968_v44  ;;  %v273_v43 = vld [vmem:[%s5085_s28 + $0x190] sm:$0xff]  ;;  %v1175_v44 = vld [vmem:[#allocation4 + $0x1ac0] sm:$0xff] }
  0xac   : > { %1680 = vmatprep.subr.mxu1 %v394_v45  ;;  %1271 = vmatprep.mubr.f32.mxu0 %v5136_v46  ;;  %v601_v45 = vld [vmem:[#allocation4 + $0x8d0] sm:$0xff] }
  0xad   : > { %1432 = vmatprep.mubr.f32.mxu1 %v250_v47  ;;  %1520 = vmatpush1.msra.mxu0 %v967_v48  ;;  %v1174_v47 = vld [vmem:[#allocation4 + $0x1ab8] sm:$0xff]  ;;  %v600_v48 = vld [vmem:[#allocation4 + $0x8c8] sm:$0xff] }
  0xae   : > { %1681 = vmatpush1.msra.mxu1 %v393_v49  ;;  %1272 = vmatmul.mubr.f32.gmra.mxu0 %v5140_v50  ;;  %v1166_v49 = vld [vmem:[#allocation4 + $0x1a78] sm:$0xff] }
  0xaf   : > { %1433 = vmatmul.mubr.f32.gmra.mxu1 %v249_v51  ;;  %1521 = vmatprep.subr.mxu0 %v959_v52  ;;  %v592_v51 = vld [vmem:[#allocation4 + $0x888] sm:$0xff]  ;;  %v5186_v52 = vld [vmem:[%s5085_s28 + $0x1b8] sm:$0xff] }
  0xb0   : > { %1682 = vmatprep.subr.mxu1 %v385_v53  ;;  %1522 = vmatpush1.msra.mxu0 %v958_v54  ;;  %v280_v53 = vld [vmem:[%s5085_s28 + $0x1c8] sm:$0xff]  ;;  %v1165_v54 = vld [vmem:[#allocation4 + $0x1a70] sm:$0xff] }
  0xb1   : > { %1683 = vmatpush1.msra.mxu1 %v384_v55  ;;  %1523 = vmatprep.subr.mxu0 %v950_v56  ;;  %v591_v55 = vld [vmem:[#allocation4 + $0x880] sm:$0xff]  ;;  %v5190_v56 = vld [vmem:[%s5085_s28 + $0x1b0] sm:$0xff] }
  0xb2   : > { %1684 = vmatprep.subr.mxu1 %v376_v57  ;;  %1277 = vmatprep.mubr.f32.mxu0 %v5146_v58  ;;  %v279_v57 = vld [vmem:[%s5085_s28 + $0x1c0] sm:$0xff] }
  0xb3   : > { %1438 = vmatprep.mubr.f32.mxu1 %v256_v59  ;;  %1524 = vmatpush1.msra.mxu0 %v949_v60  ;;  %v1157_v59 = vld [vmem:[#allocation4 + $0x1a30] sm:$0xff]  ;;  %v583_v60 = vld [vmem:[#allocation4 + $0x840] sm:$0xff] }
  0xb4   : > { %1685 = vmatpush1.msra.mxu1 %v375_v61  ;;  %1278 = vmatmul.mubr.f32.gmra.mxu0 %v5150_v62  ;;  %v1156_v61 = vld [vmem:[#allocation4 + $0x1a28] sm:$0xff] }
  0xb5   : > { %1439 = vmatmul.mubr.f32.gmra.mxu1 %v255_v0  ;;  %1525 = vmatprep.subr.mxu0 %v941_v1  ;;  %v582_v0 = vld [vmem:[#allocation4 + $0x838] sm:$0xff]  ;;  %v1148_v1 = vld [vmem:[#allocation4 + $0x19e8] sm:$0xff] }
  0xb6   : > { %1686 = vmatprep.subr.mxu1 %v367_v3  ;;  %1526 = vmatpush1.msra.mxu0 %v940_v4  ;;  %v574_v3 = vld [vmem:[#allocation4 + $0x7f8] sm:$0xff]  ;;  %v5196_v4 = vld [vmem:[%s5085_s28 + $0x1e8] sm:$0xff] }
  0xb7   : > { %1687 = vmatpush1.msra.mxu1 %v366_v5  ;;  %1527 = vmatprep.subr.mxu0 %v932_v6  ;;  %v286_v5 = vld [vmem:[%s5085_s28 + $0x1f8] sm:$0xff]  ;;  %v1147_v6 = vld [vmem:[#allocation4 + $0x19e0] sm:$0xff] }
  0xb8   : > { %1688 = vmatprep.subr.mxu1 %v358_v7  ;;  %1283 = vmatprep.mubr.f32.mxu0 %v5156_v8  ;;  %v573_v7 = vld [vmem:[#allocation4 + $0x7f0] sm:$0xff] }
  0xb9   : > { %1444 = vmatprep.mubr.f32.mxu1 %v262_v9  ;;  %1528 = vmatpush1.msra.mxu0 %v931_v11  ;;  %v5200_v9 = vld [vmem:[%s5085_s28 + $0x1e0] sm:$0xff]  ;;  %v285_v11 = vld [vmem:[%s5085_s28 + $0x1f0] sm:$0xff] }
  0xba   : > { %1689 = vmatpush1.msra.mxu1 %v357_v12  ;;  %1284 = vmatmul.mubr.f32.gmra.mxu0 %v5160_v13  ;;  %v1139_v12 = vld [vmem:[#allocation4 + $0x19a0] sm:$0xff] }
  0xbb   : > { %1445 = vmatmul.mubr.f32.gmra.mxu1 %v261_v15  ;;  %1529 = vmatprep.subr.mxu0 %v923_v16  ;;  %v565_v15 = vld [vmem:[#allocation4 + $0x7b0] sm:$0xff]  ;;  %v1138_v16 = vld [vmem:[#allocation4 + $0x1998] sm:$0xff] }
  0xbc   : > { %1690 = vmatprep.subr.mxu1 %v349_v17  ;;  %1530 = vmatpush1.msra.mxu0 %v922_v18  ;;  %v564_v17 = vld [vmem:[#allocation4 + $0x7a8] sm:$0xff]  ;;  %v1130_v18 = vld [vmem:[#allocation4 + $0x1958] sm:$0xff] }
  0xbd   : > { %1691 = vmatpush1.msra.mxu1 %v348_v19  ;;  %1531 = vmatprep.subr.mxu0 %v914_v20  ;;  %v556_v19 = vld [vmem:[#allocation4 + $0x768] sm:$0xff]  ;;  %v5206_v20 = vld [vmem:[%s5085_s28 + $0x218] sm:$0xff] }
  0xbe   : > { %1692 = vmatprep.subr.mxu1 %v340_v21  ;;  %1289 = vmatprep.mubr.f32.mxu0 %v5166_v23  ;;  %v292_v21 = vld [vmem:[%s5085_s28 + $0x228] sm:$0xff] }
  0xbf   : > { %1450 = vmatprep.mubr.f32.mxu1 %v268_v24  ;;  %1532 = vmatpush1.msra.mxu0 %v913_v25  ;;  %v1129_v24 = vld [vmem:[#allocation4 + $0x1950] sm:$0xff]  ;;  %v555_v25 = vld [vmem:[#allocation4 + $0x760] sm:$0xff] }
  0xc0   : > { %1693 = vmatpush1.msra.mxu1 %v339_v27  ;;  %1290 = vmatmul.mubr.f32.gmra.mxu0 %v5170_v28  ;;  %v5210_v27 = vld [vmem:[%s5085_s28 + $0x210] sm:$0xff] }
  0xc1   : > { %1451 = vmatmul.mubr.f32.gmra.mxu1 %v267_v29  ;;  %1533 = vmatprep.subr.mxu0 %v905_v30  ;;  %v291_v29 = vld [vmem:[%s5085_s28 + $0x220] sm:$0xff]  ;;  %v1121_v30 = vld [vmem:[#allocation4 + $0x1910] sm:$0xff] }
  0xc2   : > { %1694 = vmatprep.subr.mxu1 %v331_v31  ;;  %1534 = vmatpush1.msra.mxu0 %v904_v32  ;;  %v547_v31 = vld [vmem:[#allocation4 + $0x720] sm:$0xff]  ;;  %v1120_v32 = vld [vmem:[#allocation4 + $0x1908] sm:$0xff] }
  0xc3   : > { %1695 = vmatpush1.msra.mxu1 %v330_v33  ;;  %1535 = vmatprep.subr.mxu0 %v896_v35  ;;  %v546_v33 = vld [vmem:[#allocation4 + $0x718] sm:$0xff]  ;;  %v1112_v35 = vld [vmem:[#allocation4 + $0x18c8] sm:$0xff] }
  0xc4   : > { %1696 = vmatprep.subr.mxu1 %v322_v36  ;;  %1295 = vmatprep.mubr.f32.mxu0 %v5176_v37  ;;  %v538_v36 = vld [vmem:[#allocation4 + $0x6d8] sm:$0xff] }
  0xc5   : > { %1456 = vmatprep.mubr.f32.mxu1 %v274_v39  ;;  %1536 = vmatpush1.msra.mxu0 %v895_v40  ;;  %v5216_v39 = vld [vmem:[%s5085_s28 + $0x248] sm:$0xff]  ;;  %v298_v40 = vld [vmem:[%s5085_s28 + $0x258] sm:$0xff] }
  0xc6   : > { %1697 = vmatpush1.msra.mxu1 %v321_v41  ;;  %1296 = vmatmul.mubr.f32.gmra.mxu0 %v5180_v42  ;;  %v1111_v41 = vld [vmem:[#allocation4 + $0x18c0] sm:$0xff] }
  0xc7   : > { %1457 = vmatmul.mubr.f32.gmra.mxu1 %v273_v43  ;;  %1537 = vmatprep.subr.mxu0 %v1175_v44  ;;  %v537_v43 = vld [vmem:[#allocation4 + $0x6d0] sm:$0xff]  ;;  %v5220_v44 = vld [vmem:[%s5085_s28 + $0x240] sm:$0xff] }
  0xc8   : > { %1698 = vmatprep.subr.mxu1 %v601_v45  ;;  %1538 = vmatpush2.msra.mxu0 %v1174_v47  ;;  %v297_v45 = vld [vmem:[%s5085_s28 + $0x250] sm:$0xff]  ;;  %v1103_v47 = vld [vmem:[#allocation4 + $0x1880] sm:$0xff] }
  0xc9   : > { %1699 = vmatpush2.msra.mxu1 %v600_v48  ;;  %1539 = vmatprep.subr.mxu0 %v1166_v49  ;;  %v529_v48 = vld [vmem:[#allocation4 + $0x690] sm:$0xff]  ;;  %v1102_v49 = vld [vmem:[#allocation4 + $0x1878] sm:$0xff] }
  0xca   : > { %1700 = vmatprep.subr.mxu1 %v592_v51  ;;  %1301 = vmatprep.mubr.f32.mxu0 %v5186_v52  ;;  %v528_v51 = vld [vmem:[#allocation4 + $0x688] sm:$0xff] }
  0xcb   : > { %1462 = vmatprep.mubr.f32.mxu1 %v280_v53  ;;  %1540 = vmatpush2.msra.mxu0 %v1165_v54  ;;  %v1094_v53 = vld [vmem:[#allocation4 + $0x1838] sm:$0xff]  ;;  %v520_v54 = vld [vmem:[#allocation4 + $0x648] sm:$0xff] }
  0xcc   : > { %1701 = vmatpush2.msra.mxu1 %v591_v55  ;;  %1302 = vmatmul.mubr.f32.gmra.mxu0 %v5190_v56  ;;  %v5226_v55 = vld [vmem:[%s5085_s28 + $0x278] sm:$0xff] }
  0xcd   : > { %1463 = vmatmul.mubr.f32.gmra.mxu1 %v279_v57  ;;  %1541 = vmatprep.subr.mxu0 %v1157_v59  ;;  %v304_v57 = vld [vmem:[%s5085_s28 + $0x288] sm:$0xff]  ;;  %v1093_v59 = vld [vmem:[#allocation4 + $0x1830] sm:$0xff] }
  0xce   : > { %1702 = vmatprep.subr.mxu1 %v583_v60  ;;  %1542 = vmatpush2.msra.mxu0 %v1156_v61  ;;  %v519_v60 = vld [vmem:[#allocation4 + $0x640] sm:$0xff]  ;;  %v5230_v61 = vld [vmem:[%s5085_s28 + $0x270] sm:$0xff] }
  0xcf   : > { %1703 = vmatpush2.msra.mxu1 %v582_v0  ;;  %1543 = vmatprep.subr.mxu0 %v1148_v1  ;;  %v303_v0 = vld [vmem:[%s5085_s28 + $0x280] sm:$0xff]  ;;  %v1085_v1 = vld [vmem:[#allocation4 + $0x17f0] sm:$0xff] }
  0xd0   : > { %1704 = vmatprep.subr.mxu1 %v574_v3  ;;  %1307 = vmatprep.mubr.f32.mxu0 %v5196_v4  ;;  %v511_v3 = vld [vmem:[#allocation4 + $0x600] sm:$0xff] }
  0xd1   : > { %1468 = vmatprep.mubr.f32.mxu1 %v286_v5  ;;  %1544 = vmatpush2.msra.mxu0 %v1147_v6  ;;  %v1084_v5 = vld [vmem:[#allocation4 + $0x17e8] sm:$0xff]  ;;  %v510_v6 = vld [vmem:[#allocation4 + $0x5f8] sm:$0xff] }
  0xd2   : > { %1705 = vmatpush2.msra.mxu1 %v573_v7  ;;  %1308 = vmatmul.mubr.f32.gmra.mxu0 %v5200_v9  ;;  %v1076_v7 = vld [vmem:[#allocation4 + $0x17a8] sm:$0xff] }
  0xd3   : > { %1469 = vmatmul.mubr.f32.gmra.mxu1 %v285_v11  ;;  %1545 = vmatprep.subr.mxu0 %v1139_v12  ;;  %v502_v11 = vld [vmem:[#allocation4 + $0x5b8] sm:$0xff]  ;;  %v5236_v12 = vld [vmem:[%s5085_s28 + $0x2a8] sm:$0xff] }
  0xd4   : > { %1706 = vmatprep.subr.mxu1 %v565_v15  ;;  %1546 = vmatpush2.msra.mxu0 %v1138_v16  ;;  %v310_v15 = vld [vmem:[%s5085_s28 + $0x2b8] sm:$0xff]  ;;  %v1075_v16 = vld [vmem:[#allocation4 + $0x17a0] sm:$0xff] }
  0xd5   : > { %1707 = vmatpush2.msra.mxu1 %v564_v17  ;;  %1547 = vmatprep.subr.mxu0 %v1130_v18  ;;  %v501_v17 = vld [vmem:[#allocation4 + $0x5b0] sm:$0xff]  ;;  %v5240_v18 = vld [vmem:[%s5085_s28 + $0x2a0] sm:$0xff] }
  0xd6   : > { %1708 = vmatprep.subr.mxu1 %v556_v19  ;;  %1313 = vmatprep.mubr.f32.mxu0 %v5206_v20  ;;  %v309_v19 = vld [vmem:[%s5085_s28 + $0x2b0] sm:$0xff] }
  0xd7   : > { %1474 = vmatprep.mubr.f32.mxu1 %v292_v21  ;;  %1548 = vmatpush2.msra.mxu0 %v1129_v24  ;;  %v1067_v21 = vld [vmem:[#allocation4 + $0x1760] sm:$0xff]  ;;  %v493_v24 = vld [vmem:[#allocation4 + $0x570] sm:$0xff] }
  0xd8   : > { %1709 = vmatpush2.msra.mxu1 %v555_v25  ;;  %1314 = vmatmul.mubr.f32.gmra.mxu0 %v5210_v27  ;;  %v1066_v25 = vld [vmem:[#allocation4 + $0x1758] sm:$0xff] }
  0xd9   : > { %1475 = vmatmul.mubr.f32.gmra.mxu1 %v291_v29  ;;  %1549 = vmatprep.subr.mxu0 %v1121_v30  ;;  %v492_v29 = vld [vmem:[#allocation4 + $0x568] sm:$0xff]  ;;  %v1058_v30 = vld [vmem:[#allocation4 + $0x1718] sm:$0xff] }
  0xda   : > { %1710 = vmatprep.subr.mxu1 %v547_v31  ;;  %1550 = vmatpush2.msra.mxu0 %v1120_v32  ;;  %v484_v31 = vld [vmem:[#allocation4 + $0x528] sm:$0xff]  ;;  %v5246_v32 = vld [vmem:[%s5085_s28 + $0x2d8] sm:$0xff] }
  0xdb   : > { %1711 = vmatpush2.msra.mxu1 %v546_v33  ;;  %1551 = vmatprep.subr.mxu0 %v1112_v35  ;;  %v316_v33 = vld [vmem:[%s5085_s28 + $0x2e8] sm:$0xff]  ;;  %v1057_v35 = vld [vmem:[#allocation4 + $0x1710] sm:$0xff] }
  0xdc   : > { %1712 = vmatprep.subr.mxu1 %v538_v36  ;;  %1319 = vmatprep.mubr.f32.mxu0 %v5216_v39  ;;  %v483_v36 = vld [vmem:[#allocation4 + $0x520] sm:$0xff] }
  0xdd   : > { %1480 = vmatprep.mubr.f32.mxu1 %v298_v40  ;;  %1552 = vmatpush2.msra.mxu0 %v1111_v41  ;;  %v5250_v40 = vld [vmem:[%s5085_s28 + $0x2d0] sm:$0xff]  ;;  %v315_v41 = vld [vmem:[%s5085_s28 + $0x2e0] sm:$0xff] }
  0xde   : > { %1713 = vmatpush2.msra.mxu1 %v537_v43  ;;  %1320 = vmatmul.mubr.f32.gmra.mxu0 %v5220_v44  ;;  %v1049_v43 = vld [vmem:[#allocation4 + $0x16d0] sm:$0xff] }
  0xdf   : > { %1481 = vmatmul.mubr.f32.gmra.mxu1 %v297_v45  ;;  %1553 = vmatprep.subr.mxu0 %v1103_v47  ;;  %v475_v45 = vld [vmem:[#allocation4 + $0x4e0] sm:$0xff]  ;;  %v1048_v47 = vld [vmem:[#allocation4 + $0x16c8] sm:$0xff] }
  0xe0   : > { %1714 = vmatprep.subr.mxu1 %v529_v48  ;;  %1554 = vmatpush2.msra.mxu0 %v1102_v49  ;;  %v474_v48 = vld [vmem:[#allocation4 + $0x4d8] sm:$0xff]  ;;  %v1040_v49 = vld [vmem:[#allocation4 + $0x1688] sm:$0xff] }
  0xe1   : > { %1715 = vmatpush2.msra.mxu1 %v528_v51  ;;  %1555 = vmatprep.subr.mxu0 %v1094_v53  ;;  %v466_v51 = vld [vmem:[#allocation4 + $0x498] sm:$0xff]  ;;  %v1039_v53 = vld [vmem:[#allocation4 + $0x1680] sm:$0xff] }
  0xe2   : > { %1716 = vmatprep.subr.mxu1 %v520_v54  ;;  %1325 = vmatprep.mubr.f32.mxu0 %v5226_v55  ;;  %v5256_v54 = vld [vmem:[%s5085_s28 + $0x28] sm:$0xff] }
  0xe3   : > { %1486 = vmatprep.mubr.f32.mxu1 %v304_v57  ;;  %1556 = vmatpush2.msra.mxu0 %v1093_v59  ;;  %v465_v57 = vld [vmem:[#allocation4 + $0x490] sm:$0xff]  ;;  %v5259_v59 = vld [vmem:[%s5085_s28 + $0x20] sm:$0xff] }
  0xe4   : > { %1717 = vmatpush2.msra.mxu1 %v519_v60  ;;  %1326 = vmatmul.mubr.f32.gmra.mxu0 %v5230_v61  ;;  %v745_v60 = vld [vmem:[#allocation4 + $0xd50] sm:$0xff] }
  0xe5   : > { %1487 = vmatmul.mubr.f32.gmra.mxu1 %v303_v0  ;;  %1557 = vmatprep.subr.mxu0 %v1085_v1  ;;  %v1033_v0 = vld [vmem:[#allocation4 + $0x1650] sm:$0xff]  ;;  %v744_v1 = vld [vmem:[#allocation4 + $0xd48] sm:$0xff] }
  0xe6   : > { %1718 = vmatprep.subr.mxu1 %v511_v3  ;;  %1558 = vmatpush2.msra.mxu0 %v1084_v5  ;;  %v1032_v3 = vld [vmem:[#allocation4 + $0x1648] sm:$0xff] }
  0xe7   : > { %1719 = vmatpush2.msra.mxu1 %v510_v6  ;;  %1559 = vmatprep.subr.mxu0 %v1076_v7  ;;  %v736_v5 = vld [vmem:[#allocation4 + $0xd08] sm:$0xff]  ;;  %v5266_v7 = vld [vmem:[%s5085_s28 + $0x58] sm:$0xff] }
  0xe8   : > { %1720 = vmatprep.subr.mxu1 %v502_v11  ;;  %1331 = vmatprep.mubr.f32.mxu0 %v5236_v12  ;;  %v1024_v6 = vld [vmem:[#allocation4 + $0x1608] sm:$0xff]  ;;  %v735_v11 = vld [vmem:[#allocation4 + $0xd00] sm:$0xff] }
  0xe9   : > { %1492 = vmatprep.mubr.f32.mxu1 %v310_v15  ;;  %1560 = vmatpush2.msra.mxu0 %v1075_v16  ;;  %v1023_v15 = vld [vmem:[#allocation4 + $0x1600] sm:$0xff] }
  0xea   : > { %1721 = vmatpush2.msra.mxu1 %v501_v17  ;;  %1332 = vmatmul.mubr.f32.gmra.mxu0 %v5240_v18  ;;  %v1015_v16 = vld [vmem:[#allocation4 + $0x15c0] sm:$0xff]  ;;  %v726_v17 = vld [vmem:[#allocation4 + $0xcb8] sm:$0xff] }
  0xeb   : > { %1493 = vmatmul.mubr.f32.gmra.mxu1 %v309_v19  ;;  %1561 = vmatprep.subr.mxu0 %v1067_v21  ;;  %v1014_v19 = vld [vmem:[#allocation4 + $0x15b8] sm:$0xff] }
  0xec   : > { %1722 = vmatprep.subr.mxu1 %v493_v24  ;;  %1562 = vmatpush2.msra.mxu0 %v1066_v25  ;;  %v718_v21 = vld [vmem:[#allocation4 + $0xc78] sm:$0xff]  ;;  %v5276_v25 = vld [vmem:[%s5085_s28 + $0x88] sm:$0xff] }
  0xed   : > { %1723 = vmatpush2.msra.mxu1 %v492_v29  ;;  %1563 = vmatprep.subr.mxu0 %v1058_v30  ;;  %v1006_v24 = vld [vmem:[#allocation4 + $0x1578] sm:$0xff]  ;;  %v1005_v29 = vld [vmem:[#allocation4 + $0x1570] sm:$0xff]  ;;  %v5279_v30 = vld [vmem:[%s5085_s28 + $0x80] sm:$0xff] }
  0xee   : > { %1724 = vmatprep.subr.mxu1 %v484_v31  ;;  %1337 = vmatprep.mubr.f32.mxu0 %v5246_v32  ;;  %v997_v31 = vld [vmem:[#allocation4 + $0x1530] sm:$0xff] }
  0xef   : > { %1498 = vmatprep.mubr.f32.mxu1 %v316_v33  ;;  %1564 = vmatpush2.msra.mxu0 %v1057_v35  ;;  %v708_v33 = vld [vmem:[#allocation4 + $0xc28] sm:$0xff] }
  0xf0   : > { %1725 = vmatpush2.msra.mxu1 %v483_v36  ;;  %1338 = vmatmul.mubr.f32.gmra.mxu0 %v5250_v40  ;;  %v996_v35 = vld [vmem:[#allocation4 + $0x1528] sm:$0xff] }
  0xf1   : > { %1499 = vmatmul.mubr.f32.gmra.mxu1 %v315_v41  ;;  %1565 = vmatprep.subr.mxu0 %v1049_v43  ;;  %v700_v36 = vld [vmem:[#allocation4 + $0xbe8] sm:$0xff]  ;;  %v5286_v43 = vld [vmem:[%s5085_s28 + $0xb8] sm:$0xff] }
  0xf2   : > { %1726 = vmatprep.subr.mxu1 %v475_v45  ;;  %1566 = vmatpush2.msra.mxu0 %v1048_v47  ;;  %v988_v41 = vld [vmem:[#allocation4 + $0x14e8] sm:$0xff]  ;;  %v987_v45 = vld [vmem:[#allocation4 + $0x14e0] sm:$0xff]  ;;  %v5289_v47 = vld [vmem:[%s5085_s28 + $0xb0] sm:$0xff] }
  0xf3   : > { %1727 = vmatpush2.msra.mxu1 %v474_v48  ;;  %1567 = vmatprep.subr.mxu0 %v1040_v49  ;;  %v979_v48 = vld [vmem:[#allocation4 + $0x14a0] sm:$0xff]  ;;  %v690_v49 = vld [vmem:[#allocation4 + $0xb98] sm:$0xff] }
  0xf4   : > { %1728 = vmatprep.subr.mxu1 %v466_v51  ;;  %1568 = vmatpush2.msra.mxu0 %v1039_v53  ;;  %v978_v51 = vld [vmem:[#allocation4 + $0x1498] sm:$0xff] }
  0xf5   : > { %1569 = vmatprep.mubr.f32.mxu0 %v5256_v54  ;;  %1729 = vmatpush2.msra.mxu1 %v465_v57  ;;  %v682_v53 = vld [vmem:[#allocation4 + $0xb58] sm:$0xff] }
  0xf6   : > { %1730 = vmatprep.mubr.f32.mxu1 %v5096_v63  ;;  %1570 = vmatmul.mubr.f32.vlgmr.msra.gmra.mxu0 %v5259_v59  ;;  %v5269_v63 = vld [vmem:[%s5085_s28 + $0x50] sm:$0xff]  ;;  %v970_v57 = vld [vmem:[#allocation4 + $0x1458] sm:$0xff] }
  0xf7   : > { %1731 = vmatmul.mubr.f32.vlgmr.msra.gmra.mxu1 %v5100_v2  ;;  %1827 = vmatprep.subr.mxu0 %v745_v60  ;;  %v727_v2 = vld [vmem:[#allocation4 + $0xcc0] sm:$0xff]  ;;  %v5296_v60 = vld [vmem:[%s5085_s28 + $0xe8] sm:$0xff] }
  0xf8   : > { %1988 = vmatprep.subr.mxu1 %v1033_v0  ;;  %1828 = vmatpush1.msra.mxu0 %v744_v1  ;;  %v969_v0 = vld [vmem:[#allocation4 + $0x1450] sm:$0xff]  ;;  %v5299_v1 = vld [vmem:[%s5085_s28 + $0xe0] sm:$0xff] }
  0xf9   : > { %1989 = vmatpush1.msra.mxu1 %v1032_v3  ;;  %1829 = vmatprep.subr.mxu0 %v736_v5  ;;  %v961_v3 = vld [vmem:[#allocation4 + $0x1410] sm:$0xff]  ;;  %v672_v5 = vld [vmem:[#allocation4 + $0xb08] sm:$0xff] }
  0xfa   : > { %1990 = vmatprep.subr.mxu1 %v1024_v6  ;;  %1575 = vmatprep.mubr.f32.mxu0 %v5266_v7  ;;  %v960_v6 = vld [vmem:[#allocation4 + $0x1408] sm:$0xff] }
  0xfb   : > { %1736 = vmatprep.mubr.f32.mxu1 %v5106_v10  ;;  %1830 = vmatpush1.msra.mxu0 %v735_v11  ;;  %v717_v10 = vld [vmem:[#allocation4 + $0xc70] sm:$0xff]  ;;  %v664_v11 = vld [vmem:[#allocation4 + $0xac8] sm:$0xff] }
  0xfc   : > { %1991 = vmatpush1.msra.mxu1 %v1023_v15  ;;  %1576 = vmatmul.mubr.f32.gmra.mxu0 %v5269_v63  ;;  %v952_v15 = vld [vmem:[#allocation4 + $0x13c8] sm:$0xff] }
  0xfd   : > { %1737 = vmatmul.mubr.f32.gmra.mxu1 %v5110_v14  ;;  %1831 = vmatprep.subr.mxu0 %v727_v2  ;;  %v709_v14 = vld [vmem:[#allocation4 + $0xc30] sm:$0xff]  ;;  %v5306_v2 = vld [vmem:[%s5085_s28 + $0x118] sm:$0xff] }
  0xfe   : > { %1992 = vmatprep.subr.mxu1 %v1015_v16  ;;  %1832 = vmatpush1.msra.mxu0 %v726_v17  ;;  %v951_v16 = vld [vmem:[#allocation4 + $0x13c0] sm:$0xff]  ;;  %v5309_v17 = vld [vmem:[%s5085_s28 + $0x110] sm:$0xff] }
  0xff   : > { %1993 = vmatpush1.msra.mxu1 %v1014_v19  ;;  %1833 = vmatprep.subr.mxu0 %v718_v21  ;;  %v943_v19 = vld [vmem:[#allocation4 + $0x1380] sm:$0xff]  ;;  %v654_v21 = vld [vmem:[#allocation4 + $0xa78] sm:$0xff] }
 0x100   : > { %1994 = vmatprep.subr.mxu1 %v1006_v24  ;;  %1581 = vmatprep.mubr.f32.mxu0 %v5276_v25  ;;  %v942_v24 = vld [vmem:[#allocation4 + $0x1378] sm:$0xff] }
 0x101   : > { %1742 = vmatprep.mubr.f32.mxu1 %v5116_v22  ;;  %1834 = vmatpush1.msra.mxu0 %v717_v10  ;;  %v699_v22 = vld [vmem:[#allocation4 + $0xbe0] sm:$0xff]  ;;  %v646_v10 = vld [vmem:[#allocation4 + $0xa38] sm:$0xff] }
 0x102   : > { %1995 = vmatpush1.msra.mxu1 %v1005_v29  ;;  %1582 = vmatmul.mubr.f32.gmra.mxu0 %v5279_v30  ;;  %v934_v29 = vld [vmem:[#allocation4 + $0x1338] sm:$0xff] }
 0x103   : > { %1743 = vmatmul.mubr.f32.gmra.mxu1 %v5120_v26  ;;  %1835 = vmatprep.subr.mxu0 %v709_v14  ;;  %v691_v26 = vld [vmem:[#allocation4 + $0xba0] sm:$0xff]  ;;  %v5316_v14 = vld [vmem:[%s5085_s28 + $0x148] sm:$0xff] }
 0x104   : > { %1996 = vmatprep.subr.mxu1 %v997_v31  ;;  %1836 = vmatpush1.msra.mxu0 %v708_v33  ;;  %v933_v31 = vld [vmem:[#allocation4 + $0x1330] sm:$0xff]  ;;  %v5319_v33 = vld [vmem:[%s5085_s28 + $0x140] sm:$0xff] }
 0x105   : > { %1997 = vmatpush1.msra.mxu1 %v996_v35  ;;  %1837 = vmatprep.subr.mxu0 %v700_v36  ;;  %v925_v35 = vld [vmem:[#allocation4 + $0x12f0] sm:$0xff]  ;;  %v636_v36 = vld [vmem:[#allocation4 + $0x9e8] sm:$0xff] }
 0x106   : > { %1998 = vmatprep.subr.mxu1 %v988_v41  ;;  %1587 = vmatprep.mubr.f32.mxu0 %v5286_v43  ;;  %v924_v41 = vld [vmem:[#allocation4 + $0x12e8] sm:$0xff] }
 0x107   : > { %1748 = vmatprep.mubr.f32.mxu1 %v5126_v34  ;;  %1838 = vmatpush1.msra.mxu0 %v699_v22  ;;  %v681_v34 = vld [vmem:[#allocation4 + $0xb50] sm:$0xff]  ;;  %v628_v22 = vld [vmem:[#allocation4 + $0x9a8] sm:$0xff] }
 0x108   : > { %1999 = vmatpush1.msra.mxu1 %v987_v45  ;;  %1588 = vmatmul.mubr.f32.gmra.mxu0 %v5289_v47  ;;  %v916_v45 = vld [vmem:[#allocation4 + $0x12a8] sm:$0xff] }
 0x109   : > { %1749 = vmatmul.mubr.f32.gmra.mxu1 %v5130_v38  ;;  %1839 = vmatprep.subr.mxu0 %v691_v26  ;;  %v673_v38 = vld [vmem:[#allocation4 + $0xb10] sm:$0xff]  ;;  %v5326_v26 = vld [vmem:[%s5085_s28 + $0x178] sm:$0xff] }
 0x10a   : > { %2000 = vmatprep.subr.mxu1 %v979_v48  ;;  %1840 = vmatpush1.msra.mxu0 %v690_v49  ;;  %v915_v48 = vld [vmem:[#allocation4 + $0x12a0] sm:$0xff]  ;;  %v5329_v49 = vld [vmem:[%s5085_s28 + $0x170] sm:$0xff] }
 0x10b   : > { %2001 = vmatpush1.msra.mxu1 %v978_v51  ;;  %1841 = vmatprep.subr.mxu0 %v682_v53  ;;  %v907_v51 = vld [vmem:[#allocation4 + $0x1260] sm:$0xff]  ;;  %v618_v53 = vld [vmem:[#allocation4 + $0x958] sm:$0xff] }
 0x10c   : > { %2002 = vmatprep.subr.mxu1 %v970_v57  ;;  %1593 = vmatprep.mubr.f32.mxu0 %v5296_v60  ;;  %v906_v57 = vld [vmem:[#allocation4 + $0x1258] sm:$0xff] }
 0x10d   : > { %1754 = vmatprep.mubr.f32.mxu1 %v5136_v46  ;;  %1842 = vmatpush1.msra.mxu0 %v681_v34  ;;  %v663_v46 = vld [vmem:[#allocation4 + $0xac0] sm:$0xff]  ;;  %v610_v34 = vld [vmem:[#allocation4 + $0x918] sm:$0xff] }
 0x10e   : > { %2003 = vmatpush1.msra.mxu1 %v969_v0  ;;  %1594 = vmatmul.mubr.f32.gmra.mxu0 %v5299_v1  ;;  %v898_v0 = vld [vmem:[#allocation4 + $0x1218] sm:$0xff] }
 0x10f   : > { %1755 = vmatmul.mubr.f32.gmra.mxu1 %v5140_v50  ;;  %1843 = vmatprep.subr.mxu0 %v673_v38  ;;  %v655_v50 = vld [vmem:[#allocation4 + $0xa80] sm:$0xff]  ;;  %v5336_v38 = vld [vmem:[%s5085_s28 + $0x1a8] sm:$0xff] }
 0x110   : > { %2004 = vmatprep.subr.mxu1 %v961_v3  ;;  %1844 = vmatpush1.msra.mxu0 %v672_v5  ;;  %v897_v3 = vld [vmem:[#allocation4 + $0x1210] sm:$0xff]  ;;  %v5339_v5 = vld [vmem:[%s5085_s28 + $0x1a0] sm:$0xff] }
 0x111   : > { %2005 = vmatpush1.msra.mxu1 %v960_v6  ;;  %1845 = vmatprep.subr.mxu0 %v664_v11  ;;  %v1177_v6 = vld [vmem:[#allocation4 + $0x1ad0] sm:$0xff]  ;;  %v888_v11 = vld [vmem:[#allocation4 + $0x11c8] sm:$0xff] }
 0x112   : > { %2006 = vmatprep.subr.mxu1 %v952_v15  ;;  %1599 = vmatprep.mubr.f32.mxu0 %v5306_v2  ;;  %v1176_v15 = vld [vmem:[#allocation4 + $0x1ac8] sm:$0xff] }
 0x113   : > { %1760 = vmatprep.mubr.f32.mxu1 %v5146_v58  ;;  %1846 = vmatpush1.msra.mxu0 %v663_v46  ;;  %v645_v58 = vld [vmem:[#allocation4 + $0xa30] sm:$0xff]  ;;  %v880_v46 = vld [vmem:[#allocation4 + $0x1188] sm:$0xff] }
 0x114   : > { %2007 = vmatpush1.msra.mxu1 %v951_v16  ;;  %1600 = vmatmul.mubr.f32.gmra.mxu0 %v5309_v17  ;;  %v1168_v16 = vld [vmem:[#allocation4 + $0x1a88] sm:$0xff] }
 0x115   : > { %1761 = vmatmul.mubr.f32.gmra.mxu1 %v5150_v62  ;;  %1847 = vmatprep.subr.mxu0 %v655_v50  ;;  %v637_v62 = vld [vmem:[#allocation4 + $0x9f0] sm:$0xff]  ;;  %v5346_v50 = vld [vmem:[%s5085_s28 + $0x1d8] sm:$0xff] }
 0x116   : > { %2008 = vmatprep.subr.mxu1 %v943_v19  ;;  %1848 = vmatpush1.msra.mxu0 %v654_v21  ;;  %v1167_v19 = vld [vmem:[#allocation4 + $0x1a80] sm:$0xff]  ;;  %v5349_v21 = vld [vmem:[%s5085_s28 + $0x1d0] sm:$0xff] }
 0x117   : > { %2009 = vmatpush1.msra.mxu1 %v942_v24  ;;  %1849 = vmatprep.subr.mxu0 %v646_v10  ;;  %v1159_v24 = vld [vmem:[#allocation4 + $0x1a40] sm:$0xff]  ;;  %v870_v10 = vld [vmem:[#allocation4 + $0x1138] sm:$0xff] }
 0x118   : > { %2010 = vmatprep.subr.mxu1 %v934_v29  ;;  %1605 = vmatprep.mubr.f32.mxu0 %v5316_v14  ;;  %v1158_v29 = vld [vmem:[#allocation4 + $0x1a38] sm:$0xff] }
 0x119   : > { %1766 = vmatprep.mubr.f32.mxu1 %v5156_v8  ;;  %1850 = vmatpush1.msra.mxu0 %v645_v58  ;;  %v627_v8 = vld [vmem:[#allocation4 + $0x9a0] sm:$0xff]  ;;  %v862_v58 = vld [vmem:[#allocation4 + $0x10f8] sm:$0xff] }
 0x11a   : > { %2011 = vmatpush1.msra.mxu1 %v933_v31  ;;  %1606 = vmatmul.mubr.f32.gmra.mxu0 %v5319_v33  ;;  %v1150_v31 = vld [vmem:[#allocation4 + $0x19f8] sm:$0xff] }
 0x11b   : > { %1767 = vmatmul.mubr.f32.gmra.mxu1 %v5160_v13  ;;  %1851 = vmatprep.subr.mxu0 %v637_v62  ;;  %v619_v13 = vld [vmem:[#allocation4 + $0x960] sm:$0xff]  ;;  %v5356_v62 = vld [vmem:[%s5085_s28 + $0x208] sm:$0xff] }
 0x11c   : > { %2012 = vmatprep.subr.mxu1 %v925_v35  ;;  %1852 = vmatpush1.msra.mxu0 %v636_v36  ;;  %v1149_v35 = vld [vmem:[#allocation4 + $0x19f0] sm:$0xff]  ;;  %v5359_v36 = vld [vmem:[%s5085_s28 + $0x200] sm:$0xff] }
 0x11d   : > { %2013 = vmatpush1.msra.mxu1 %v924_v41  ;;  %1853 = vmatprep.subr.mxu0 %v628_v22  ;;  %v1141_v41 = vld [vmem:[#allocation4 + $0x19b0] sm:$0xff]  ;;  %v852_v22 = vld [vmem:[#allocation4 + $0x10a8] sm:$0xff] }
 0x11e   : > { %2014 = vmatprep.subr.mxu1 %v916_v45  ;;  %1611 = vmatprep.mubr.f32.mxu0 %v5326_v26  ;;  %v1140_v45 = vld [vmem:[#allocation4 + $0x19a8] sm:$0xff] }
 0x11f   : > { %1772 = vmatprep.mubr.f32.mxu1 %v5166_v23  ;;  %1854 = vmatpush1.msra.mxu0 %v627_v8  ;;  %v609_v23 = vld [vmem:[#allocation4 + $0x910] sm:$0xff]  ;;  %v844_v8 = vld [vmem:[#allocation4 + $0x1068] sm:$0xff] }
 0x120   : > { %2015 = vmatpush1.msra.mxu1 %v915_v48  ;;  %1612 = vmatmul.mubr.f32.gmra.mxu0 %v5329_v49  ;;  %v1132_v48 = vld [vmem:[#allocation4 + $0x1968] sm:$0xff] }
 0x121   : > { %1773 = vmatmul.mubr.f32.gmra.mxu1 %v5170_v28  ;;  %1855 = vmatprep.subr.mxu0 %v619_v13  ;;  %v889_v28 = vld [vmem:[#allocation4 + $0x11d0] sm:$0xff]  ;;  %v5366_v13 = vld [vmem:[%s5085_s28 + $0x238] sm:$0xff] }
 0x122   : > { %2016 = vmatprep.subr.mxu1 %v907_v51  ;;  %1856 = vmatpush1.msra.mxu0 %v618_v53  ;;  %v1131_v51 = vld [vmem:[#allocation4 + $0x1960] sm:$0xff]  ;;  %v5369_v53 = vld [vmem:[%s5085_s28 + $0x230] sm:$0xff] }
 0x123   : > { %2017 = vmatpush1.msra.mxu1 %v906_v57  ;;  %1857 = vmatprep.subr.mxu0 %v610_v34  ;;  %v1123_v57 = vld [vmem:[#allocation4 + $0x1920] sm:$0xff]  ;;  %v834_v34 = vld [vmem:[#allocation4 + $0x1018] sm:$0xff] }
 0x124   : > { %2018 = vmatprep.subr.mxu1 %v898_v0  ;;  %1617 = vmatprep.mubr.f32.mxu0 %v5336_v38  ;;  %v1122_v0 = vld [vmem:[#allocation4 + $0x1918] sm:$0xff] }
 0x125   : > { %1778 = vmatprep.mubr.f32.mxu1 %v5176_v37  ;;  %1858 = vmatpush1.msra.mxu0 %v609_v23  ;;  %v879_v37 = vld [vmem:[#allocation4 + $0x1180] sm:$0xff]  ;;  %v826_v23 = vld [vmem:[#allocation4 + $0xfd8] sm:$0xff] }
 0x126   : > { %2019 = vmatpush1.msra.mxu1 %v897_v3  ;;  %1618 = vmatmul.mubr.f32.gmra.mxu0 %v5339_v5  ;;  %v1114_v3 = vld [vmem:[#allocation4 + $0x18d8] sm:$0xff] }
 0x127   : > { %1779 = vmatmul.mubr.f32.gmra.mxu1 %v5180_v42  ;;  %1859 = vmatprep.subr.mxu0 %v889_v28  ;;  %v871_v42 = vld [vmem:[#allocation4 + $0x1140] sm:$0xff]  ;;  %v5376_v28 = vld [vmem:[%s5085_s28 + $0x268] sm:$0xff] }
 0x128   : > { %2020 = vmatprep.subr.mxu1 %v1177_v6  ;;  %1860 = vmatpush2.msra.mxu0 %v888_v11  ;;  %v1113_v6 = vld [vmem:[#allocation4 + $0x18d0] sm:$0xff]  ;;  %v5379_v11 = vld [vmem:[%s5085_s28 + $0x260] sm:$0xff] }
 0x129   : > { %2021 = vmatpush2.msra.mxu1 %v1176_v15  ;;  %1861 = vmatprep.subr.mxu0 %v880_v46  ;;  %v1105_v15 = vld [vmem:[#allocation4 + $0x1890] sm:$0xff]  ;;  %v816_v46 = vld [vmem:[#allocation4 + $0xf88] sm:$0xff] }
 0x12a   : > { %2022 = vmatprep.subr.mxu1 %v1168_v16  ;;  %1623 = vmatprep.mubr.f32.mxu0 %v5346_v50  ;;  %v1104_v16 = vld [vmem:[#allocation4 + $0x1888] sm:$0xff] }
 0x12b   : > { %1784 = vmatprep.mubr.f32.mxu1 %v5186_v52  ;;  %1862 = vmatpush2.msra.mxu0 %v879_v37  ;;  %v861_v52 = vld [vmem:[#allocation4 + $0x10f0] sm:$0xff]  ;;  %v808_v37 = vld [vmem:[#allocation4 + $0xf48] sm:$0xff] }
 0x12c   : > { %2023 = vmatpush2.msra.mxu1 %v1167_v19  ;;  %1624 = vmatmul.mubr.f32.gmra.mxu0 %v5349_v21  ;;  %v1096_v19 = vld [vmem:[#allocation4 + $0x1848] sm:$0xff] }
 0x12d   : > { %1785 = vmatmul.mubr.f32.gmra.mxu1 %v5190_v56  ;;  %1863 = vmatprep.subr.mxu0 %v871_v42  ;;  %v853_v56 = vld [vmem:[#allocation4 + $0x10b0] sm:$0xff]  ;;  %v5386_v42 = vld [vmem:[%s5085_s28 + $0x298] sm:$0xff] }
 0x12e   : > { %2024 = vmatprep.subr.mxu1 %v1159_v24  ;;  %1864 = vmatpush2.msra.mxu0 %v870_v10  ;;  %v1095_v24 = vld [vmem:[#allocation4 + $0x1840] sm:$0xff]  ;;  %v5389_v10 = vld [vmem:[%s5085_s28 + $0x290] sm:$0xff] }
 0x12f   : > { %2025 = vmatpush2.msra.mxu1 %v1158_v29  ;;  %1865 = vmatprep.subr.mxu0 %v862_v58  ;;  %v1087_v29 = vld [vmem:[#allocation4 + $0x1800] sm:$0xff]  ;;  %v798_v58 = vld [vmem:[#allocation4 + $0xef8] sm:$0xff] }
 0x130   : > { %2026 = vmatprep.subr.mxu1 %v1150_v31  ;;  %1629 = vmatprep.mubr.f32.mxu0 %v5356_v62  ;;  %v1086_v31 = vld [vmem:[#allocation4 + $0x17f8] sm:$0xff] }
 0x131   : > { %1790 = vmatprep.mubr.f32.mxu1 %v5196_v4  ;;  %1866 = vmatpush2.msra.mxu0 %v861_v52  ;;  %v843_v4 = vld [vmem:[#allocation4 + $0x1060] sm:$0xff]  ;;  %v790_v52 = vld [vmem:[#allocation4 + $0xeb8] sm:$0xff] }
 0x132   : > { %2027 = vmatpush2.msra.mxu1 %v1149_v35  ;;  %1630 = vmatmul.mubr.f32.gmra.mxu0 %v5359_v36  ;;  %v1078_v35 = vld [vmem:[#allocation4 + $0x17b8] sm:$0xff] }
 0x133   : > { %1791 = vmatmul.mubr.f32.gmra.mxu1 %v5200_v9  ;;  %1867 = vmatprep.subr.mxu0 %v853_v56  ;;  %v835_v9 = vld [vmem:[#allocation4 + $0x1020] sm:$0xff]  ;;  %v5396_v56 = vld [vmem:[%s5085_s28 + $0x2c8] sm:$0xff] }
 0x134   : > { %2028 = vmatprep.subr.mxu1 %v1141_v41  ;;  %1868 = vmatpush2.msra.mxu0 %v852_v22  ;;  %v1077_v41 = vld [vmem:[#allocation4 + $0x17b0] sm:$0xff]  ;;  %v5399_v22 = vld [vmem:[%s5085_s28 + $0x2c0] sm:$0xff] }
 0x135   : > { %2029 = vmatpush2.msra.mxu1 %v1140_v45  ;;  %1869 = vmatprep.subr.mxu0 %v844_v8  ;;  %v1069_v45 = vld [vmem:[#allocation4 + $0x1770] sm:$0xff]  ;;  %v780_v8 = vld [vmem:[#allocation4 + $0xe68] sm:$0xff] }
 0x136   : > { %2030 = vmatprep.subr.mxu1 %v1132_v48  ;;  %1635 = vmatprep.mubr.f32.mxu0 %v5366_v13  ;;  %v1068_v48 = vld [vmem:[#allocation4 + $0x1768] sm:$0xff] }
 0x137   : > { %1796 = vmatprep.mubr.f32.mxu1 %v5206_v20  ;;  %1870 = vmatpush2.msra.mxu0 %v843_v4  ;;  %v825_v20 = vld [vmem:[#allocation4 + $0xfd0] sm:$0xff]  ;;  %v772_v4 = vld [vmem:[#allocation4 + $0xe28] sm:$0xff] }
 0x138   : > { %2031 = vmatpush2.msra.mxu1 %v1131_v51  ;;  %1636 = vmatmul.mubr.f32.gmra.mxu0 %v5369_v53  ;;  %v1060_v51 = vld [vmem:[#allocation4 + $0x1728] sm:$0xff] }
 0x139   : > { %1797 = vmatmul.mubr.f32.gmra.mxu1 %v5210_v27  ;;  %1871 = vmatprep.subr.mxu0 %v835_v9  ;;  %v817_v27 = vld [vmem:[#allocation4 + $0xf90] sm:$0xff]  ;;  %v5406_v9 = vld [vmem:[%s5085_s28 + $0x2f8] sm:$0xff] }
 0x13a   : > { %2032 = vmatprep.subr.mxu1 %v1123_v57  ;;  %1872 = vmatpush2.msra.mxu0 %v834_v34  ;;  %v1059_v57 = vld [vmem:[#allocation4 + $0x1720] sm:$0xff]  ;;  %v5409_v34 = vld [vmem:[%s5085_s28 + $0x2f0] sm:$0xff] }
 0x13b   : > { %2033 = vmatpush2.msra.mxu1 %v1122_v0  ;;  %1873 = vmatprep.subr.mxu0 %v826_v23  ;;  %v763_v0 = vld [vmem:[#allocation4 + $0xde0] sm:$0xff]  ;;  %v762_v23 = vld [vmem:[#allocation4 + $0xdd8] sm:$0xff] }
 0x13c   : > { %2034 = vmatprep.subr.mxu1 %v1114_v3  ;;  %1641 = vmatprep.mubr.f32.mxu0 %v5376_v28  ;;  %v1050_v3 = vld [vmem:[#allocation4 + $0x16d8] sm:$0xff] }
 0x13d   : > { %1802 = vmatprep.mubr.f32.mxu1 %v5216_v39  ;;  %1874 = vmatpush2.msra.mxu0 %v825_v20  ;;  %v807_v39 = vld [vmem:[#allocation4 + $0xf40] sm:$0xff]  ;;  %v754_v20 = vld [vmem:[#allocation4 + $0xd98] sm:$0xff] }
 0x13e   : > { %2035 = vmatpush2.msra.mxu1 %v1113_v6  ;;  %1642 = vmatmul.mubr.f32.gmra.mxu0 %v5379_v11  ;;  %v1042_v6 = vld [vmem:[#allocation4 + $0x1698] sm:$0xff] }
 0x13f   : > { %1803 = vmatmul.mubr.f32.gmra.mxu1 %v5220_v44  ;;  %1875 = vmatprep.subr.mxu0 %v817_v27  ;;  %v799_v44 = vld [vmem:[#allocation4 + $0xf00] sm:$0xff]  ;;  %v753_v27 = vld [vmem:[#allocation4 + $0xd90] sm:$0xff] }
 0x140   : > { %2036 = vmatprep.subr.mxu1 %v1105_v15  ;;  %1876 = vmatpush2.msra.mxu0 %v816_v46  ;;  %v5416_v15 = vld [vmem:[%s5085_s28 + $0x18] sm:$0xff]  ;;  %v459_v46 = vld [vmem:[#allocation4 + $0x460] sm:$0xff] }
 0x141   : > { %2037 = vmatpush2.msra.mxu1 %v1104_v16  ;;  %1877 = vmatprep.subr.mxu0 %v808_v37  ;;  %v747_v16 = vld [vmem:[#allocation4 + $0xd60] sm:$0xff]  ;;  %v746_v37 = vld [vmem:[#allocation4 + $0xd58] sm:$0xff] }
 0x142   : > { %2038 = vmatprep.subr.mxu1 %v1096_v19  ;;  %1647 = vmatprep.mubr.f32.mxu0 %v5386_v42  ;;  %v5421_v19 = vld [vmem:[%s5085_s28 + $0x10] sm:$0xff] }
 0x143   : > { %1808 = vmatprep.mubr.f32.mxu1 %v5226_v55  ;;  %1878 = vmatpush2.msra.mxu0 %v807_v39  ;;  %v789_v55 = vld [vmem:[#allocation4 + $0xeb0] sm:$0xff]  ;;  %v450_v39 = vld [vmem:[#allocation4 + $0x418] sm:$0xff] }
 0x144   : > { %2039 = vmatpush2.msra.mxu1 %v1095_v24  ;;  %1648 = vmatmul.mubr.f32.gmra.mxu0 %v5389_v10  ;;  %v738_v24 = vld [vmem:[#allocation4 + $0xd18] sm:$0xff] }
 0x145   : > { %1809 = vmatmul.mubr.f32.gmra.mxu1 %v5230_v61  ;;  %1879 = vmatprep.subr.mxu0 %v799_v44  ;;  %v781_v61 = vld [vmem:[#allocation4 + $0xe70] sm:$0xff] }
 0x146   : > { %2040 = vmatprep.subr.mxu1 %v1087_v29  ;;  %1880 = vmatpush2.msra.mxu0 %v798_v58  ;;  %v737_v58 = vld [vmem:[#allocation4 + $0xd10] sm:$0xff] }
 0x147   : > { %2041 = vmatpush2.msra.mxu1 %v1086_v31  ;;  %1881 = vmatprep.subr.mxu0 %v790_v52 }
 0x148   : > { %2042 = vmatprep.subr.mxu1 %v1078_v35  ;;  %1653 = vmatprep.mubr.f32.mxu0 %v5396_v56  ;;  %v441_v35 = vld [vmem:[#allocation4 + $0x3d0] sm:$0xff] }
 0x149   : > { %1814 = vmatprep.mubr.f32.mxu1 %v5236_v12  ;;  %1882 = vmatpush2.msra.mxu0 %v789_v55  ;;  %v771_v12 = vld [vmem:[#allocation4 + $0xe20] sm:$0xff]  ;;  %v729_v55 = vld [vmem:[#allocation4 + $0xcd0] sm:$0xff] }
 0x14a   : > { %2043 = vmatpush2.msra.mxu1 %v1077_v41  ;;  %1654 = vmatmul.mubr.f32.gmra.mxu0 %v5399_v22  ;;  %v440_v41 = vld [vmem:[#allocation4 + $0x3c8] sm:$0xff] }
 0x14b   : > { %1815 = vmatmul.mubr.f32.gmra.mxu1 %v5240_v18  ;;  %1883 = vmatprep.subr.mxu0 %v781_v61  ;;  %v1051_v18 = vld [vmem:[#allocation4 + $0x16e0] sm:$0xff]  ;;  %v728_v61 = vld [vmem:[#allocation4 + $0xcc8] sm:$0xff] }
 0x14c   : > { %2044 = vmatprep.subr.mxu1 %v1069_v45  ;;  %1884 = vmatpush2.msra.mxu0 %v780_v8  ;;  %v5439_v45 = vld [vmem:[%s5085_s28 + $0x40] sm:$0xff]  ;;  %v432_v8 = vld [vmem:[#allocation4 + $0x388] sm:$0xff] }
 0x14d   : > { %2045 = vmatpush2.msra.mxu1 %v1068_v48  ;;  %1885 = vmatprep.subr.mxu0 %v772_v4  ;;  %v720_v48 = vld [vmem:[#allocation4 + $0xc88] sm:$0xff] }
 0x14e   : > { %2046 = vmatprep.subr.mxu1 %v1060_v51  ;;  %1659 = vmatprep.mubr.f32.mxu0 %v5406_v9 }
 0x14f   : > { %1820 = vmatprep.mubr.f32.mxu1 %v5246_v32  ;;  %1886 = vmatpush2.msra.mxu0 %v771_v12  ;;  %v1041_v32 = vld [vmem:[#allocation4 + $0x1690] sm:$0xff]  ;;  %v719_v12 = vld [vmem:[#allocation4 + $0xc80] sm:$0xff] }
 0x150   : > { %2047 = vmatpush2.msra.mxu1 %v1059_v57  ;;  %1660 = vmatmul.mubr.f32.gmra.mxu0 %v5409_v34 }
 0x151   : > { %1821 = vmatmul.mubr.f32.gmra.mxu1 %v5250_v40  ;;  %1887 = vmatprep.subr.mxu0 %v763_v0  ;;  %v458_v40 = vld [vmem:[#allocation4 + $0x458] sm:$0xff] }
 0x152   : > { %2048 = vmatprep.subr.mxu1 %v1051_v18  ;;  %1888 = vmatpush2.msra.mxu0 %v762_v23  ;;  %v423_v18 = vld [vmem:[#allocation4 + $0x340] sm:$0xff] }
 0x153   : > { %2049 = vmatpush2.msra.mxu1 %v1050_v3  ;;  %1889 = vmatprep.subr.mxu0 %v754_v20  ;;  %v711_v23 = vld [vmem:[#allocation4 + $0xc40] sm:$0xff]  ;;  %v422_v3 = vld [vmem:[#allocation4 + $0x338] sm:$0xff] }
 0x154   : > { %2050 = vmatprep.subr.mxu1 %v1042_v6  ;;  %1890 = vmatpush2.msra.mxu0 %v753_v27  ;;  %v710_v20 = vld [vmem:[#allocation4 + $0xc38] sm:$0xff]  ;;  %v5457_v6 = vld [vmem:[%s5085_s28 + $0x70] sm:$0xff] }
 0x155   : > { %1891 = vmatprep.mubr.f32.mxu0 %v5416_v15  ;;  %2051 = vmatpush2.msra.mxu1 %v1041_v32  ;;  %v414_v27 = vld [vmem:[#allocation4 + $0x2f8] sm:$0xff] }
 0x156   : > { %2052 = vmatprep.mubr.f32.mxu1 %v5256_v54  ;;  %1892 = vmatmul.mubr.f32.vlgmr.msra.gmra.mxu0 %v5421_v19  ;;  %v5425_v44 = vpop.f32.mrf.mxu0  ;;  %v449_v54 = vld [vmem:[#allocation4 + $0x410] sm:$0xff]  ;;  %v702_v32 = vld [vmem:[#allocation4 + $0xbf8] sm:$0xff] }
 0x157   : > { %2053 = vmatmul.mubr.f32.vlgmr.msra.gmra.mxu1 %v5259_v59  ;;  %v5427_v29 = vpop.f32.mrf.mxu1  ;;  %2149 = vmatprep.subr.mxu0 %v459_v46  ;;  %v5434_v59 = vld [vmem:[%s5085_s28 + $0x48] sm:$0xff] }
 0x158   : > { %2310 = vmatprep.subr.mxu1 %v747_v16  ;;  %2150 = vmatpush1.msra.mxu0 %v458_v40  ;;  %v5429_v31 = vpop.f32.mrf.mxu0  ;;  %v701_v40 = vld [vmem:[#allocation4 + $0xbf0] sm:$0xff] }
 0x159   : > { %2311 = vmatpush1.msra.mxu1 %v746_v37  ;;  %v5431_v52 = vpop.f32.mrf.mxu1  ;;  %2151 = vmatprep.subr.mxu0 %v450_v39 }
 0x15a   : > { %2312 = vmatprep.subr.mxu1 %v738_v24  ;;  %1897 = vmatprep.mubr.f32.mxu0 %v5434_v59  ;;  %v405_v24 = vld [vmem:[#allocation4 + $0x2b0] sm:$0xff] }
 0x15b   : > { %2058 = vmatprep.mubr.f32.mxu1 %v5266_v7  ;;  %2152 = vmatpush1.msra.mxu0 %v449_v54  ;;  %v431_v7 = vld [vmem:[#allocation4 + $0x380] sm:$0xff]  ;;  %v693_v54 = vld [vmem:[#allocation4 + $0xbb0] sm:$0xff] }
 0x15c   : > { %2313 = vmatpush1.msra.mxu1 %v737_v58  ;;  %1898 = vmatmul.mubr.f32.gmra.mxu0 %v5439_v45  ;;  %v5443_v4 = vpop.f32.mrf.mxu0  ;;  %v404_v58 = vld [vmem:[#allocation4 + $0x2a8] sm:$0xff] }
 0x15d   : > { %2059 = vmatmul.mubr.f32.gmra.mxu1 %v5269_v63  ;;  %v5445_v51 = vpop.f32.mrf.mxu1  ;;  %2153 = vmatprep.subr.mxu0 %v441_v35  ;;  %v5452_v63 = vld [vmem:[%s5085_s28 + $0x78] sm:$0xff]  ;;  %v692_v35 = vld [vmem:[#allocation4 + $0xba8] sm:$0xff] }
 0x15e   : > { %2314 = vmatprep.subr.mxu1 %v729_v55  ;;  %2154 = vmatpush1.msra.mxu0 %v440_v41  ;;  %v5447_v57 = vpop.f32.mrf.mxu0  ;;  %v5475_v55 = vld [vmem:[%s5085_s28 + $0xa0] sm:$0xff]  ;;  %v396_v41 = vld [vmem:[#allocation4 + $0x268] sm:$0xff] }
 0x15f   : > { %2315 = vmatpush1.msra.mxu1 %v728_v61  ;;  %v5449_v0 = vpop.f32.mrf.mxu1  ;;  %2155 = vmatprep.subr.mxu0 %v432_v8  ;;  %v684_v61 = vld [vmem:[#allocation4 + $0xb68] sm:$0xff] }
 0x160   : > { %2316 = vmatprep.subr.mxu1 %v720_v48  ;;  %1903 = vmatprep.mubr.f32.mxu0 %v5452_v63 }
 0x161   : > { %2064 = vmatprep.mubr.f32.mxu1 %v5276_v25  ;;  %2156 = vmatpush1.msra.mxu0 %v431_v7  ;;  %v413_v25 = vld [vmem:[#allocation4 + $0x2f0] sm:$0xff]  ;;  %v683_v7 = vld [vmem:[#allocation4 + $0xb60] sm:$0xff] }
 0x162   : > { %2317 = vmatpush1.msra.mxu1 %v719_v12  ;;  %1904 = vmatmul.mubr.f32.gmra.mxu0 %v5457_v6  ;;  %v5461_v46 = vpop.f32.mrf.mxu0 }
 0x163   : > { %2065 = vmatmul.mubr.f32.gmra.mxu1 %v5279_v30  ;;  %v5463_v16 = vpop.f32.mrf.mxu1  ;;  %2157 = vmatprep.subr.mxu0 %v423_v18  ;;  %v5470_v30 = vld [vmem:[%s5085_s28 + $0xa8] sm:$0xff] }
 0x164   : > { %2318 = vmatprep.subr.mxu1 %v711_v23  ;;  %2158 = vmatpush1.msra.mxu0 %v422_v3  ;;  %v5465_v37 = vpop.f32.mrf.mxu0  ;;  %v387_v23 = vld [vmem:[#allocation4 + $0x220] sm:$0xff] }
 0x165   : > { %2319 = vmatpush1.msra.mxu1 %v710_v20  ;;  %v5467_v39 = vpop.f32.mrf.mxu1  ;;  %2159 = vmatprep.subr.mxu0 %v414_v27  ;;  %v675_v3 = vld [vmem:[#allocation4 + $0xb20] sm:$0xff]  ;;  %v386_v20 = vld [vmem:[#allocation4 + $0x218] sm:$0xff] }
 0x166   : > { %2320 = vmatprep.subr.mxu1 %v702_v32  ;;  %1909 = vmatprep.mubr.f32.mxu0 %v5470_v30  ;;  %v674_v27 = vld [vmem:[#allocation4 + $0xb18] sm:$0xff]  ;;  %v5493_v32 = vld [vmem:[%s5085_s28 + $0xd0] sm:$0xff] }
 0x167   : > { %2070 = vmatprep.mubr.f32.mxu1 %v5286_v43  ;;  %2160 = vmatpush1.msra.mxu0 %v413_v25  ;;  %v395_v43 = vld [vmem:[#allocation4 + $0x260] sm:$0xff]  ;;  %v378_v25 = vld [vmem:[#allocation4 + $0x1d8] sm:$0xff] }
 0x168   : > { %2321 = vmatpush1.msra.mxu1 %v701_v40  ;;  %1910 = vmatmul.mubr.f32.gmra.mxu0 %v5475_v55  ;;  %v5479_v8 = vpop.f32.mrf.mxu0  ;;  %v666_v40 = vld [vmem:[#allocation4 + $0xad8] sm:$0xff] }
 0x169   : > { %2071 = vmatmul.mubr.f32.gmra.mxu1 %v5289_v47  ;;  %v5481_v48 = vpop.f32.mrf.mxu1  ;;  %2161 = vmatprep.subr.mxu0 %v405_v24  ;;  %v5488_v47 = vld [vmem:[%s5085_s28 + $0xd8] sm:$0xff] }
 0x16a   : > { %2322 = vmatprep.subr.mxu1 %v693_v54  ;;  %2162 = vmatpush1.msra.mxu0 %v404_v58  ;;  %v5483_v12 = vpop.f32.mrf.mxu0  ;;  %v665_v58 = vld [vmem:[#allocation4 + $0xad0] sm:$0xff] }
 0x16b   : > { %2323 = vmatpush1.msra.mxu1 %v692_v35  ;;  %v5485_v18 = vpop.f32.mrf.mxu1  ;;  %2163 = vmatprep.subr.mxu0 %v396_v41 }
 0x16c   : > { %2324 = vmatprep.subr.mxu1 %v684_v61  ;;  %1915 = vmatprep.mubr.f32.mxu0 %v5488_v47  ;;  %v369_v61 = vld [vmem:[#allocation4 + $0x190] sm:$0xff] }
 0x16d   : > { %2076 = vmatprep.mubr.f32.mxu1 %v5296_v60  ;;  %2164 = vmatpush1.msra.mxu0 %v395_v43  ;;  %v377_v60 = vld [vmem:[#allocation4 + $0x1d0] sm:$0xff] }
 0x16e   : > { %2325 = vmatpush1.msra.mxu1 %v683_v7  ;;  %1916 = vmatmul.mubr.f32.gmra.mxu0 %v5493_v32  ;;  %v5497_v24 = vpop.f32.mrf.mxu0  ;;  %v657_v43 = vld [vmem:[#allocation4 + $0xa90] sm:$0xff]  ;;  %v368_v7 = vld [vmem:[#allocation4 + $0x188] sm:$0xff] }
 0x16f   : > { %2077 = vmatmul.mubr.f32.gmra.mxu1 %v5299_v1  ;;  %v5499_v54 = vpop.f32.mrf.mxu1  ;;  %2165 = vmatprep.subr.mxu0 %v387_v23  ;;  %v5506_v1 = vld [vmem:[%s5085_s28 + $0x108] sm:$0xff] }
 0x170   : > { %7201 = vst [vmem:[#allocation9_spill] sm:$0xff] %v5499_v54  ;;  %2326 = vmatprep.subr.mxu1 %v675_v3  ;;  %2166 = vmatpush1.msra.mxu0 %v386_v20  ;;  %v5501_v35 = vpop.f32.mrf.mxu0  ;;  %v656_v23 = vld [vmem:[#allocation4 + $0xa88] sm:$0xff]  ;;  %v5511_v3 = vld [vmem:[%s5085_s28 + $0x100] sm:$0xff] }
 0x171   : > { %2327 = vmatpush1.msra.mxu1 %v674_v27  ;;  %v5503_v41 = vpop.f32.mrf.mxu1  ;;  %2167 = vmatprep.subr.mxu0 %v378_v25  ;;  %7202 = vst [vmem:[#allocation10_spill] sm:$0xff] %v5511_v3  ;;  %v360_v20 = vld [vmem:[#allocation4 + $0x148] sm:$0xff] }
 0x172   : > { %2328 = vmatprep.subr.mxu1 %v666_v40  ;;  %1921 = vmatprep.mubr.f32.mxu0 %v5506_v1  ;;  %v648_v27 = vld [vmem:[#allocation4 + $0xa48] sm:$0xff] }
 0x173   : > { %2082 = vmatprep.mubr.f32.mxu1 %v5306_v2  ;;  %2168 = vmatpush1.msra.mxu0 %v377_v60  ;;  %v359_v2 = vld [vmem:[#allocation4 + $0x140] sm:$0xff] }
 0x174   : > { %2329 = vmatpush1.msra.mxu1 %v665_v58  ;;  %1922 = vmatmul.mubr.f32.gmra.mxu0 %v5511_v3  ;;  %v5515_v25 = vpop.f32.mrf.mxu0  ;;  %v647_v60 = vld [vmem:[#allocation4 + $0xa40] sm:$0xff] }
 0x175   : > { %2083 = vmatmul.mubr.f32.gmra.mxu1 %v5309_v17  ;;  %v5517_v40 = vpop.f32.mrf.mxu1  ;;  %2169 = vmatprep.subr.mxu0 %v369_v61  ;;  %v5524_v17 = vld [vmem:[%s5085_s28 + $0x138] sm:$0xff]  ;;  %v351_v3 = vld [vmem:[#allocation4 + $0x100] sm:$0xff] }
 0x176   : > { %2330 = vmatprep.subr.mxu1 %v657_v43  ;;  %2170 = vmatpush1.msra.mxu0 %v368_v7  ;;  %v5519_v58 = vpop.f32.mrf.mxu0  ;;  %7205 = vst [vmem:[#allocation13_spill] sm:$0xff] %v5524_v17  ;;  %v639_v61 = vld [vmem:[#allocation4 + $0xa00] sm:$0xff]  ;;  %v350_v43 = vld [vmem:[#allocation4 + $0xf8] sm:$0xff] }
 0x177   : > { %2331 = vmatpush1.msra.mxu1 %v656_v23  ;;  %7203 = vst [vmem:[#allocation11_spill] sm:$0xff] %v5519_v58  ;;  %v5521_v54 = vpop.f32.mrf.mxu1  ;;  %2171 = vmatprep.subr.mxu0 %v360_v20  ;;  %v638_v7 = vld [vmem:[#allocation4 + $0x9f8] sm:$0xff]  ;;  %v5529_v23 = vld [vmem:[%s5085_s28 + $0x130] sm:$0xff] }
 0x178   : > { %7204 = vst [vmem:[#allocation12_spill] sm:$0xff] %v5521_v54  ;;  %2332 = vmatprep.subr.mxu1 %v648_v27  ;;  %1927 = vmatprep.mubr.f32.mxu0 %v5524_v17  ;;  %v342_v20 = vld [vmem:[#allocation4 + $0xb8] sm:$0xff] }
 0x179   : > { %2088 = vmatprep.mubr.f32.mxu1 %v5316_v14  ;;  %2172 = vmatpush1.msra.mxu0 %v359_v2  ;;  %v630_v27 = vld [vmem:[#allocation4 + $0x9b8] sm:$0xff]  ;;  %v341_v14 = vld [vmem:[#allocation4 + $0xb0] sm:$0xff] }
 0x17a   : > { %2333 = vmatpush1.msra.mxu1 %v647_v60  ;;  %1928 = vmatmul.mubr.f32.gmra.mxu0 %v5529_v23  ;;  %v5533_v54 = vpop.f32.mrf.mxu0  ;;  %v629_v2 = vld [vmem:[#allocation4 + $0x9b0] sm:$0xff] }
 0x17b   : > { %2089 = vmatmul.mubr.f32.gmra.mxu1 %v5319_v33  ;;  %7206 = vst [vmem:[#allocation14_spill] sm:$0xff] %v5533_v54  ;;  %v5535_v17 = vpop.f32.mrf.mxu1  ;;  %2173 = vmatprep.subr.mxu0 %v351_v3  ;;  %v5542_v33 = vld [vmem:[%s5085_s28 + $0x168] sm:$0xff]  ;;  %v621_v3 = vld [vmem:[#allocation4 + $0x970] sm:$0xff] }
 0x17c   : > { %7207 = vst [vmem:[#allocation15_spill] sm:$0xff] %v5535_v17  ;;  %2334 = vmatprep.subr.mxu1 %v639_v61  ;;  %2174 = vmatpush1.msra.mxu0 %v350_v43  ;;  %v5537_v60 = vpop.f32.mrf.mxu0  ;;  %v333_v17 = vld [vmem:[#allocation4 + $0x70] sm:$0xff]  ;;  %v332_v61 = vld [vmem:[#allocation4 + $0x68] sm:$0xff] }
 0x17d   : > { %2335 = vmatpush1.msra.mxu1 %v638_v7  ;;  %7208 = vst [vmem:[#allocation16_spill] sm:$0xff] %v5537_v60  ;;  %v5539_v58 = vpop.f32.mrf.mxu1  ;;  %2175 = vmatprep.subr.mxu0 %v342_v20  ;;  %v620_v43 = vld [vmem:[#allocation4 + $0x968] sm:$0xff]  ;;  %v5547_v7 = vld [vmem:[%s5085_s28 + $0x160] sm:$0xff] }
 0x17e   : > { %7209 = vst [vmem:[#allocation17_spill] sm:$0xff] %v5539_v58  ;;  %2336 = vmatprep.subr.mxu1 %v630_v27  ;;  %1933 = vmatprep.mubr.f32.mxu0 %v5542_v33  ;;  %7210 = vst [vmem:[#allocation18_spill] sm:$0xff] %v5547_v7  ;;  %v324_v20 = vld [vmem:[#allocation4 + $0x28] sm:$0xff] }
 0x17f   : > { %2094 = vmatprep.mubr.f32.mxu1 %v5326_v26  ;;  %2176 = vmatpush1.msra.mxu0 %v341_v14  ;;  %v612_v27 = vld [vmem:[#allocation4 + $0x928] sm:$0xff]  ;;  %v323_v26 = vld [vmem:[#allocation4 + $0x20] sm:$0xff] }
 0x180   : > { %2337 = vmatpush1.msra.mxu1 %v629_v2  ;;  %1934 = vmatmul.mubr.f32.gmra.mxu0 %v5547_v7  ;;  %v5551_v54 = vpop.f32.mrf.mxu0  ;;  %v611_v14 = vld [vmem:[#allocation4 + $0x920] sm:$0xff] }
 0x181   : > { %2095 = vmatmul.mubr.f32.gmra.mxu1 %v5329_v49  ;;  %v5553_v58 = vpop.f32.mrf.mxu1  ;;  %2177 = vmatprep.subr.mxu0 %v333_v17  ;;  %v5560_v49 = vld [vmem:[%s5085_s28 + $0x198] sm:$0xff]  ;;  %v603_v7 = vld [vmem:[#allocation4 + $0x8e0] sm:$0xff] }
 0x182   : > { %2338 = vmatprep.subr.mxu1 %v621_v3  ;;  %2178 = vmatpush1.msra.mxu0 %v332_v61  ;;  %v5555_v2 = vpop.f32.mrf.mxu0  ;;  %7213 = vst [vmem:[#allocation21_spill] sm:$0xff] %v5560_v49  ;;  %v891_v17 = vld [vmem:[#allocation4 + $0x11e0] sm:$0xff]  ;;  %v602_v3 = vld [vmem:[#allocation4 + $0x8d8] sm:$0xff] }
 0x183   : > { %2339 = vmatpush1.msra.mxu1 %v620_v43  ;;  %7211 = vst [vmem:[#allocation19_spill] sm:$0xff] %v5555_v2  ;;  %v5557_v60 = vpop.f32.mrf.mxu1  ;;  %2179 = vmatprep.subr.mxu0 %v324_v20  ;;  %v890_v61 = vld [vmem:[#allocation4 + $0x11d8] sm:$0xff]  ;;  %v5565_v43 = vld [vmem:[%s5085_s28 + $0x190] sm:$0xff] }
 0x184   : > { %7212 = vst [vmem:[#allocation20_spill] sm:$0xff] %v5557_v60  ;;  %2340 = vmatprep.subr.mxu1 %v612_v27  ;;  %1939 = vmatprep.mubr.f32.mxu0 %v5560_v49  ;;  %v594_v20 = vld [vmem:[#allocation4 + $0x898] sm:$0xff] }
 0x185   : > { %2100 = vmatprep.mubr.f32.mxu1 %v5336_v38  ;;  %2180 = vmatpush1.msra.mxu0 %v323_v26  ;;  %v882_v27 = vld [vmem:[#allocation4 + $0x1198] sm:$0xff]  ;;  %v593_v38 = vld [vmem:[#allocation4 + $0x890] sm:$0xff] }
 0x186   : > { %2341 = vmatpush1.msra.mxu1 %v611_v14  ;;  %1940 = vmatmul.mubr.f32.gmra.mxu0 %v5565_v43  ;;  %v5569_v60 = vpop.f32.mrf.mxu0  ;;  %v881_v26 = vld [vmem:[#allocation4 + $0x1190] sm:$0xff] }
 0x187   : > { %2101 = vmatmul.mubr.f32.gmra.mxu1 %v5339_v5  ;;  %7214 = vst [vmem:[#allocation22_spill] sm:$0xff] %v5569_v60  ;;  %v5571_v49 = vpop.f32.mrf.mxu1  ;;  %2181 = vmatprep.subr.mxu0 %v603_v7  ;;  %v5578_v5 = vld [vmem:[%s5085_s28 + $0x1c8] sm:$0xff]  ;;  %v873_v7 = vld [vmem:[#allocation4 + $0x1150] sm:$0xff] }
 0x188   : > { %7215 = vst [vmem:[#allocation23_spill] sm:$0xff] %v5571_v49  ;;  %2342 = vmatprep.subr.mxu1 %v891_v17  ;;  %2182 = vmatpush2.msra.mxu0 %v602_v3  ;;  %v5573_v14 = vpop.f32.mrf.mxu0  ;;  %v585_v49 = vld [vmem:[#allocation4 + $0x850] sm:$0xff]  ;;  %v584_v17 = vld [vmem:[#allocation4 + $0x848] sm:$0xff] }
 0x189   : > { %2343 = vmatpush2.msra.mxu1 %v890_v61  ;;  %7216 = vst [vmem:[#allocation24_spill] sm:$0xff] %v5573_v14  ;;  %v5575_v2 = vpop.f32.mrf.mxu1  ;;  %2183 = vmatprep.subr.mxu0 %v594_v20  ;;  %v872_v3 = vld [vmem:[#allocation4 + $0x1148] sm:$0xff]  ;;  %v5583_v61 = vld [vmem:[%s5085_s28 + $0x1c0] sm:$0xff] }
 0x18a   : > { %7217 = vst [vmem:[#allocation25_spill] sm:$0xff] %v5575_v2  ;;  %2344 = vmatprep.subr.mxu1 %v882_v27  ;;  %1945 = vmatprep.mubr.f32.mxu0 %v5578_v5  ;;  %7218 = vst [vmem:[#allocation26_spill] sm:$0xff] %v5583_v61  ;;  %v576_v20 = vld [vmem:[#allocation4 + $0x808] sm:$0xff] }
 0x18b   : > { %2106 = vmatprep.mubr.f32.mxu1 %v5346_v50  ;;  %2184 = vmatpush2.msra.mxu0 %v593_v38  ;;  %v864_v27 = vld [vmem:[#allocation4 + $0x1108] sm:$0xff]  ;;  %v575_v50 = vld [vmem:[#allocation4 + $0x800] sm:$0xff] }
 0x18c   : > { %2345 = vmatpush2.msra.mxu1 %v881_v26  ;;  %1946 = vmatmul.mubr.f32.gmra.mxu0 %v5583_v61  ;;  %v5587_v60 = vpop.f32.mrf.mxu0  ;;  %v863_v38 = vld [vmem:[#allocation4 + $0x1100] sm:$0xff] }
 0x18d   : > { %2107 = vmatmul.mubr.f32.gmra.mxu1 %v5349_v21  ;;  %v5589_v2 = vpop.f32.mrf.mxu1  ;;  %2185 = vmatprep.subr.mxu0 %v585_v49  ;;  %v5596_v21 = vld [vmem:[%s5085_s28 + $0x1f8] sm:$0xff]  ;;  %v567_v61 = vld [vmem:[#allocation4 + $0x7c0] sm:$0xff] }
 0x18e   : > { %2346 = vmatprep.subr.mxu1 %v873_v7  ;;  %2186 = vmatpush2.msra.mxu0 %v584_v17  ;;  %v5591_v26 = vpop.f32.mrf.mxu0  ;;  %7221 = vst [vmem:[#allocation29_spill] sm:$0xff] %v5596_v21  ;;  %v855_v49 = vld [vmem:[#allocation4 + $0x10c0] sm:$0xff]  ;;  %v566_v7 = vld [vmem:[#allocation4 + $0x7b8] sm:$0xff] }
 0x18f   : > { %2347 = vmatpush2.msra.mxu1 %v872_v3  ;;  %7219 = vst [vmem:[#allocation27_spill] sm:$0xff] %v5591_v26  ;;  %v5593_v14 = vpop.f32.mrf.mxu1  ;;  %2187 = vmatprep.subr.mxu0 %v576_v20  ;;  %v854_v17 = vld [vmem:[#allocation4 + $0x10b8] sm:$0xff]  ;;  %v5601_v3 = vld [vmem:[%s5085_s28 + $0x1f0] sm:$0xff] }
 0x190   : > { %7220 = vst [vmem:[#allocation28_spill] sm:$0xff] %v5593_v14  ;;  %2348 = vmatprep.subr.mxu1 %v864_v27  ;;  %1951 = vmatprep.mubr.f32.mxu0 %v5596_v21  ;;  %v558_v20 = vld [vmem:[#allocation4 + $0x778] sm:$0xff] }
 0x191   : > { %2112 = vmatprep.mubr.f32.mxu1 %v5356_v62  ;;  %2188 = vmatpush2.msra.mxu0 %v575_v50  ;;  %v846_v27 = vld [vmem:[#allocation4 + $0x1078] sm:$0xff]  ;;  %v557_v62 = vld [vmem:[#allocation4 + $0x770] sm:$0xff] }
 0x192   : > { %2349 = vmatpush2.msra.mxu1 %v863_v38  ;;  %1952 = vmatmul.mubr.f32.gmra.mxu0 %v5601_v3  ;;  %v5605_v14 = vpop.f32.mrf.mxu0  ;;  %v845_v50 = vld [vmem:[#allocation4 + $0x1070] sm:$0xff] }
 0x193   : > { %2113 = vmatmul.mubr.f32.gmra.mxu1 %v5359_v36  ;;  %7222 = vst [vmem:[#allocation30_spill] sm:$0xff] %v5605_v14  ;;  %v5607_v21 = vpop.f32.mrf.mxu1  ;;  %2189 = vmatprep.subr.mxu0 %v567_v61  ;;  %v5614_v36 = vld [vmem:[%s5085_s28 + $0x228] sm:$0xff]  ;;  %v837_v61 = vld [vmem:[#allocation4 + $0x1030] sm:$0xff] }
 0x194   : > { %7223 = vst [vmem:[#allocation31_spill] sm:$0xff] %v5607_v21  ;;  %2350 = vmatprep.subr.mxu1 %v855_v49  ;;  %2190 = vmatpush2.msra.mxu0 %v566_v7  ;;  %v5609_v38 = vpop.f32.mrf.mxu0  ;;  %v549_v21 = vld [vmem:[#allocation4 + $0x730] sm:$0xff]  ;;  %v548_v49 = vld [vmem:[#allocation4 + $0x728] sm:$0xff] }
 0x195   : > { %2351 = vmatpush2.msra.mxu1 %v854_v17  ;;  %7224 = vst [vmem:[#allocation32_spill] sm:$0xff] %v5609_v38  ;;  %v5611_v26 = vpop.f32.mrf.mxu1  ;;  %2191 = vmatprep.subr.mxu0 %v558_v20  ;;  %v836_v7 = vld [vmem:[#allocation4 + $0x1028] sm:$0xff]  ;;  %v5619_v17 = vld [vmem:[%s5085_s28 + $0x220] sm:$0xff] }
 0x196   : > { %7225 = vst [vmem:[#allocation33_spill] sm:$0xff] %v5611_v26  ;;  %2352 = vmatprep.subr.mxu1 %v846_v27  ;;  %1957 = vmatprep.mubr.f32.mxu0 %v5614_v36  ;;  %7226 = vst [vmem:[#allocation34_spill] sm:$0xff] %v5619_v17  ;;  %v540_v20 = vld [vmem:[#allocation4 + $0x6e8] sm:$0xff] }
 0x197   : > { %2118 = vmatprep.mubr.f32.mxu1 %v5366_v13  ;;  %2192 = vmatpush2.msra.mxu0 %v557_v62  ;;  %v828_v27 = vld [vmem:[#allocation4 + $0xfe8] sm:$0xff]  ;;  %v539_v13 = vld [vmem:[#allocation4 + $0x6e0] sm:$0xff] }
 0x198   : > { %2353 = vmatpush2.msra.mxu1 %v845_v50  ;;  %1958 = vmatmul.mubr.f32.gmra.mxu0 %v5619_v17  ;;  %v5623_v14 = vpop.f32.mrf.mxu0  ;;  %v827_v62 = vld [vmem:[#allocation4 + $0xfe0] sm:$0xff] }
 0x199   : > { %2119 = vmatmul.mubr.f32.gmra.mxu1 %v5369_v53  ;;  %v5625_v26 = vpop.f32.mrf.mxu1  ;;  %2193 = vmatprep.subr.mxu0 %v549_v21  ;;  %v5632_v53 = vld [vmem:[%s5085_s28 + $0x258] sm:$0xff]  ;;  %v531_v17 = vld [vmem:[#allocation4 + $0x6a0] sm:$0xff] }
 0x19a   : > { %2354 = vmatprep.subr.mxu1 %v837_v61  ;;  %2194 = vmatpush2.msra.mxu0 %v548_v49  ;;  %v5627_v50 = vpop.f32.mrf.mxu0  ;;  %7229 = vst [vmem:[#allocation37_spill] sm:$0xff] %v5632_v53  ;;  %v819_v21 = vld [vmem:[#allocation4 + $0xfa0] sm:$0xff]  ;;  %v530_v61 = vld [vmem:[#allocation4 + $0x698] sm:$0xff] }
 0x19b   : > { %2355 = vmatpush2.msra.mxu1 %v836_v7  ;;  %7227 = vst [vmem:[#allocation35_spill] sm:$0xff] %v5627_v50  ;;  %v5629_v38 = vpop.f32.mrf.mxu1  ;;  %2195 = vmatprep.subr.mxu0 %v540_v20  ;;  %v818_v49 = vld [vmem:[#allocation4 + $0xf98] sm:$0xff]  ;;  %v5637_v7 = vld [vmem:[%s5085_s28 + $0x250] sm:$0xff] }
 0x19c   : > { %7228 = vst [vmem:[#allocation36_spill] sm:$0xff] %v5629_v38  ;;  %2356 = vmatprep.subr.mxu1 %v828_v27  ;;  %1963 = vmatprep.mubr.f32.mxu0 %v5632_v53  ;;  %v522_v20 = vld [vmem:[#allocation4 + $0x658] sm:$0xff] }
 0x19d   : > { %2124 = vmatprep.mubr.f32.mxu1 %v5376_v28  ;;  %2196 = vmatpush2.msra.mxu0 %v539_v13  ;;  %v810_v27 = vld [vmem:[#allocation4 + $0xf58] sm:$0xff]  ;;  %v521_v28 = vld [vmem:[#allocation4 + $0x650] sm:$0xff] }
 0x19e   : > { %2357 = vmatpush2.msra.mxu1 %v827_v62  ;;  %1964 = vmatmul.mubr.f32.gmra.mxu0 %v5637_v7  ;;  %v5641_v38 = vpop.f32.mrf.mxu0  ;;  %v809_v13 = vld [vmem:[#allocation4 + $0xf50] sm:$0xff] }
 0x19f   : > { %2125 = vmatmul.mubr.f32.gmra.mxu1 %v5379_v11  ;;  %7230 = vst [vmem:[#allocation38_spill] sm:$0xff] %v5641_v38  ;;  %v5643_v53 = vpop.f32.mrf.mxu1  ;;  %2197 = vmatprep.subr.mxu0 %v531_v17  ;;  %v5650_v11 = vld [vmem:[%s5085_s28 + $0x288] sm:$0xff]  ;;  %v801_v17 = vld [vmem:[#allocation4 + $0xf10] sm:$0xff] }
 0x1a0   : > { %7231 = vst [vmem:[#allocation39_spill] sm:$0xff] %v5643_v53  ;;  %2358 = vmatprep.subr.mxu1 %v819_v21  ;;  %2198 = vmatpush2.msra.mxu0 %v530_v61  ;;  %v5645_v62 = vpop.f32.mrf.mxu0  ;;  %v513_v53 = vld [vmem:[#allocation4 + $0x610] sm:$0xff]  ;;  %v512_v21 = vld [vmem:[#allocation4 + $0x608] sm:$0xff] }
 0x1a1   : > { %2359 = vmatpush2.msra.mxu1 %v818_v49  ;;  %7232 = vst [vmem:[#allocation40_spill] sm:$0xff] %v5645_v62  ;;  %v5647_v50 = vpop.f32.mrf.mxu1  ;;  %2199 = vmatprep.subr.mxu0 %v522_v20  ;;  %v800_v61 = vld [vmem:[#allocation4 + $0xf08] sm:$0xff]  ;;  %v4642_v49 = vld [vmem:[%s5085_s28 + $0x280] sm:$0xff] }
 0x1a2   : > { %7233 = vst [vmem:[#allocation41_spill] sm:$0xff] %v5647_v50  ;;  %2360 = vmatprep.subr.mxu1 %v810_v27  ;;  %1969 = vmatprep.mubr.f32.mxu0 %v5650_v11  ;;  %v504_v38 = vld [vmem:[#allocation4 + $0x5c8] sm:$0xff] }
 0x1a3   : > { %2130 = vmatprep.mubr.f32.mxu1 %v5386_v42  ;;  %2200 = vmatpush2.msra.mxu0 %v521_v28  ;;  %v792_v20 = vld [vmem:[#allocation4 + $0xec8] sm:$0xff]  ;;  %v503_v42 = vld [vmem:[#allocation4 + $0x5c0] sm:$0xff] }
 0x1a4   : > { %2361 = vmatpush2.msra.mxu1 %v809_v13  ;;  %1970 = vmatmul.mubr.f32.gmra.mxu0 %v4642_v49  ;;  %v5656_v27 = vpop.f32.mrf.mxu0  ;;  %v791_v28 = vld [vmem:[#allocation4 + $0xec0] sm:$0xff] }
 0x1a5   : > { %2131 = vmatmul.mubr.f32.gmra.mxu1 %v5389_v10  ;;  %7234 = vst [vmem:[#allocation42_spill] sm:$0xff] %v5656_v27  ;;  %v5658_v50 = vpop.f32.mrf.mxu1  ;;  %2201 = vmatprep.subr.mxu0 %v513_v53  ;;  %v4643_v10 = vld [vmem:[%s5085_s28 + $0x2b8] sm:$0xff]  ;;  %v495_v49 = vld [vmem:[#allocation4 + $0x580] sm:$0xff] }
 0x1a6   : > { %2362 = vmatprep.subr.mxu1 %v801_v17  ;;  %2202 = vmatpush2.msra.mxu0 %v512_v21  ;;  %v5660_v13 = vpop.f32.mrf.mxu0  ;;  %v783_v27 = vld [vmem:[#allocation4 + $0xe80] sm:$0xff]  ;;  %v494_v53 = vld [vmem:[#allocation4 + $0x578] sm:$0xff]  ;;  %v4644_v21 = vld [vmem:[%s5085_s28 + $0x2b0] sm:$0xff] }
 0x1a7   : > { %2363 = vmatpush2.msra.mxu1 %v800_v61  ;;  %7235 = vst [vmem:[#allocation43_spill] sm:$0xff] %v5660_v13  ;;  %v5662_v62 = vpop.f32.mrf.mxu1  ;;  %2203 = vmatprep.subr.mxu0 %v504_v38  ;;  %v782_v17 = vld [vmem:[#allocation4 + $0xe78] sm:$0xff] }
 0x1a8   : > { %7236 = vst [vmem:[#allocation44_spill] sm:$0xff] %v5662_v62  ;;  %2364 = vmatprep.subr.mxu1 %v792_v20  ;;  %1975 = vmatprep.mubr.f32.mxu0 %v4643_v10  ;;  %v486_v61 = vld [vmem:[#allocation4 + $0x538] sm:$0xff]  ;;  %v773_v20 = vld [vmem:[#allocation4 + $0xe30] sm:$0xff] }
 0x1a9   : > { %2136 = vmatprep.mubr.f32.mxu1 %v5396_v56  ;;  %2204 = vmatpush2.msra.mxu0 %v503_v42  ;;  %v774_v13 = vld [vmem:[#allocation4 + $0xe38] sm:$0xff]  ;;  %v485_v56 = vld [vmem:[#allocation4 + $0x530] sm:$0xff] }
 0x1aa   : > { %2365 = vmatpush2.msra.mxu1 %v791_v28  ;;  %1976 = vmatmul.mubr.f32.gmra.mxu0 %v4644_v21  ;;  %v5668_v62 = vpop.f32.mrf.mxu0  ;;  %v477_v10 = vld [vmem:[#allocation4 + $0x4f0] sm:$0xff] }
 0x1ab   : > { %2137 = vmatmul.mubr.f32.gmra.mxu1 %v5399_v22  ;;  %7237 = vst [vmem:[#allocation45_spill] sm:$0xff] %v5668_v62  ;;  %v5670_v38 = vpop.f32.mrf.mxu1  ;;  %2205 = vmatprep.subr.mxu0 %v495_v49  ;;  %v4645_v22 = vld [vmem:[%s5085_s28 + $0x2e8] sm:$0xff]  ;;  %v765_v21 = vld [vmem:[#allocation4 + $0xdf0] sm:$0xff] }
 0x1ac   : > { %7238 = vst [vmem:[#allocation46_spill] sm:$0xff] %v5670_v38  ;;  %2366 = vmatprep.subr.mxu1 %v783_v27  ;;  %2206 = vmatpush2.msra.mxu0 %v494_v53  ;;  %v5672_v42 = vpop.f32.mrf.mxu0  ;;  %v476_v27 = vld [vmem:[#allocation4 + $0x4e8] sm:$0xff]  ;;  %v4646_v53 = vld [vmem:[%s5085_s28 + $0x2e0] sm:$0xff] }
 0x1ad   : > { %2367 = vmatpush2.msra.mxu1 %v782_v17  ;;  %v5674_v28 = vpop.f32.mrf.mxu1  ;;  %2207 = vmatprep.subr.mxu0 %v486_v61  ;;  %v764_v49 = vld [vmem:[#allocation4 + $0xde8] sm:$0xff]  ;;  %v755_v61 = vld [vmem:[#allocation4 + $0xda0] sm:$0xff] }
 0x1ae   : > { %2368 = vmatprep.subr.mxu1 %v774_v13  ;;  %1981 = vmatprep.mubr.f32.mxu0 %v4645_v22  ;;  %v468_v17 = vld [vmem:[#allocation4 + $0x4a8] sm:$0xff]  ;;  %v1035_v22 = vld [vmem:[#allocation4 + $0x1660] sm:$0xff] }
 0x1af   : > { %2142 = vmatprep.mubr.f32.mxu1 %v5406_v9  ;;  %2208 = vmatpush2.msra.mxu0 %v485_v56  ;;  %v756_v38 = vld [vmem:[#allocation4 + $0xda8] sm:$0xff]  ;;  %v467_v9 = vld [vmem:[#allocation4 + $0x4a0] sm:$0xff] }
 0x1b0   : > { %2369 = vmatpush2.msra.mxu1 %v773_v20  ;;  %1982 = vmatmul.mubr.f32.gmra.mxu0 %v4646_v53  ;;  %v5680_v62 = vpop.f32.mrf.mxu0  ;;  %v461_v53 = vld [vmem:[#allocation4 + $0x470] sm:$0xff] }
 0x1b1   : > { %2143 = vmatmul.mubr.f32.gmra.mxu1 %v5409_v34  ;;  %v5682_v13 = vpop.f32.mrf.mxu1  ;;  %2209 = vmatprep.subr.mxu0 %v477_v10  ;;  %v4647_v34 = vld [vmem:[%s5085_s28 + $0x8] sm:$0xff]  ;;  %v1034_v10 = vld [vmem:[#allocation4 + $0x1658] sm:$0xff] }
 0x1b2   : > { %2370 = vmatprep.subr.mxu1 %v765_v21  ;;  %2210 = vmatpush2.msra.mxu0 %v476_v27  ;;  %v5684_v56 = vpop.f32.mrf.mxu0  ;;  %v460_v21 = vld [vmem:[#allocation4 + $0x468] sm:$0xff]  ;;  %v4648_v27 = vld [vmem:[%s5085_s28] sm:$0xff] }
 0x1b3   : > { %2371 = vmatpush2.msra.mxu1 %v764_v49  ;;  %v5686_v20 = vpop.f32.mrf.mxu1  ;;  %2211 = vmatprep.subr.mxu0 %v468_v17  ;;  %v1026_v49 = vld [vmem:[#allocation4 + $0x1618] sm:$0xff] }
 0x1b4   : > { %7239 = vst [vmem:[#allocation47_spill] sm:$0xff] %v5686_v20  ;;  %2372 = vmatprep.subr.mxu1 %v756_v38  ;;  %2212 = vmatpush2.msra.mxu0 %v467_v9  ;;  %v452_v20 = vld [vmem:[#allocation4 + $0x428] sm:$0xff]  ;;  %v451_v9 = vld [vmem:[#allocation4 + $0x420] sm:$0xff] }
 0x1b5   : > { %2213 = vmatprep.mubr.f32.mxu0 %v4647_v34  ;;  %2373 = vmatpush2.msra.mxu1 %v755_v61 }
 0x1b6   : > { %2374 = vmatprep.mubr.f32.mxu1 %v5416_v15  ;;  %2214 = vmatmul.mubr.f32.vlgmr.msra.gmra.mxu0 %v4648_v27  ;;  %v1571_v17 = vpop.f32.mrf.mxu0  ;;  %v1025_v15 = vld [vmem:[#allocation4 + $0x1610] sm:$0xff] }
 0x1b7   : > { %2375 = vmatmul.mubr.f32.vlgmr.msra.gmra.mxu1 %v5421_v19  ;;  %v5692_v38 = vpop.f32.mrf.mxu1  ;;  %2471 = vmatprep.subr.mxu0 %v1035_v22  ;;  %v4649_v19 = vld [vmem:[%s5085_s28 + $0x38] sm:$0xff]  ;;  %v1017_v27 = vld [vmem:[#allocation4 + $0x15d0] sm:$0xff]  ;;  %v1413_v22 = vadd.f32 %v5431_v52, %v5429_v31  ;;  %v1419_v52 = vadd.f32 %v5449_v0, %v5447_v57  ;;  %v4651_v0 = vld [vmem:[%s5085_s28 + $0x68] sm:$0xff] }
 0x1b8   : > { %7240 = vst [vmem:[#allocation48_spill] sm:$0xff] %v5692_v38  ;;  %2632 = vmatprep.subr.mxu1 %v461_v53  ;;  %2472 = vmatpush1.msra.mxu0 %v1034_v10  ;;  %v1573_v61 = vpop.f32.mrf.mxu0  ;;  %v443_v38 = vld [vmem:[#allocation4 + $0x3e0] sm:$0xff]  ;;  %v1417_v53 = vadd.f32 %v5445_v51, %v5443_v4  ;;  %v1016_v10 = vld [vmem:[#allocation4 + $0x15c8] sm:$0xff] }
 0x1b9   : > { %2633 = vmatpush1.msra.mxu1 %v460_v21  ;;  %v5698_v34 = vpop.f32.mrf.mxu1  ;;  %2473 = vmatprep.subr.mxu0 %v1026_v49  ;;  %v442_v21 = vld [vmem:[#allocation4 + $0x3d8] sm:$0xff]  ;;  %v4650_v49 = vld [vmem:[%s5085_s28 + $0x30] sm:$0xff]  ;;  %v1574_v4 = vadd.f32 %v1573_v61, %v1413_v22  ;;  %v999_v61 = vld [vmem:[#allocation4 + $0x1540] sm:$0xff] }
 0x1ba   : > { %7241 = vst [vmem:[#allocation49_spill] sm:$0xff] %v5698_v34  ;;  %2634 = vmatprep.subr.mxu1 %v452_v20  ;;  %2219 = vmatprep.mubr.f32.mxu0 %v4649_v19  ;;  %v1411_v20 = vadd.f32 %v5427_v29, %v5425_v44  ;;  %v434_v19 = vld [vmem:[#allocation4 + $0x398] sm:$0xff]  ;;  %v1007_v44 = vld [vmem:[#allocation4 + $0x1580] sm:$0xff]  ;;  %v433_v29 = vld [vmem:[#allocation4 + $0x390] sm:$0xff] }
 0x1bb   : > { %2380 = vmatprep.mubr.f32.mxu1 %v5434_v59  ;;  %2474 = vmatpush1.msra.mxu0 %v1025_v15  ;;  %v1008_v59 = vld [vmem:[#allocation4 + $0x1588] sm:$0xff]  ;;  %v3588_v22 = vrot.slane %v1574_v4, 1 }
 0x1bc   : > { %2635 = vmatpush1.msra.mxu1 %v451_v9  ;;  %2220 = vmatmul.mubr.f32.gmra.mxu0 %v4650_v49  ;;  %v1577_v34 = vpop.f32.mrf.mxu0  ;;  %v416_v49 = vld [vmem:[#allocation4 + $0x308] sm:$0xff] }
 0x1bd   : > { %2381 = vmatmul.mubr.f32.gmra.mxu1 %v5439_v45  ;;  %v5711_v31 = vpop.f32.mrf.mxu1  ;;  %2475 = vmatprep.subr.mxu0 %v1017_v27  ;;  %v1578_v51 = vadd.f32 %v1577_v34, %v1417_v53  ;;  %v1572_v45 = vadd.f32 %v1571_v17, %v1411_v20  ;;  %v425_v34 = vld [vmem:[#allocation4 + $0x350] sm:$0xff]  ;;  %v998_v17 = vld [vmem:[#allocation4 + $0x1538] sm:$0xff]  ;;  %v424_v27 = vld [vmem:[#allocation4 + $0x348] sm:$0xff] }
 0x1be   : > { %2636 = vmatprep.subr.mxu1 %v443_v38  ;;  %2476 = vmatpush1.msra.mxu0 %v1016_v10  ;;  %v1579_v15 = vpop.f32.mrf.mxu0  ;;  %v5722_v38 = vld [vmem:[#allocation6] ss:$0 sm:$0xff]  ;;  %v990_v20 = vld [vmem:[#allocation4 + $0x14f8] sm:$0xff] }
 0x1bf   : > { %2637 = vmatpush1.msra.mxu1 %v442_v21  ;;  %v5720_v9 = vpop.f32.mrf.mxu1  ;;  %2477 = vmatprep.subr.mxu0 %v1008_v59  ;;  %v1580_v57 = vadd.f32 %v1579_v15, %v1419_v52  ;;  %v3556_v53 = vadd.f32 %v5722_v38, %v1578_v51  ;;  %v4652_v21 = vld [vmem:[%s5085_s28 + $0x60] sm:$0xff]  ;;  %v989_v51 = vld [vmem:[#allocation4 + $0x14f0] sm:$0xff] }
 0x1c0   : > { %2638 = vmatprep.subr.mxu1 %v434_v19  ;;  %2225 = vmatprep.mubr.f32.mxu0 %v4651_v0  ;;  %v981_v0 = vld [vmem:[#allocation4 + $0x14b0] sm:$0xff] }
 0x1c1   : > { %2386 = vmatprep.mubr.f32.mxu1 %v5452_v63  ;;  %2478 = vmatpush1.msra.mxu0 %v1007_v44  ;;  %v3589_v10 = vrot.slane %v1580_v57, 1  ;;  %v3555_v63 = vadd.f32 %v5722_v38, %v1572_v45  ;;  %v415_v44 = vld [vmem:[#allocation4 + $0x300] sm:$0xff]  ;;  %v4653_v57 = vld [vmem:[%s5085_s28 + $0x98] sm:$0xff] }
 0x1c2   : > { %2639 = vmatpush1.msra.mxu1 %v433_v29  ;;  %2226 = vmatmul.mubr.f32.gmra.mxu0 %v4652_v21  ;;  %v1583_v59 = vpop.f32.mrf.mxu0  ;;  %v4654_v21 = vld [vmem:[%s5085_s28 + $0x90] sm:$0xff] }
 0x1c3   : > { %2387 = vmatmul.mubr.f32.gmra.mxu1 %v5457_v6  ;;  %v5731_v19 = vpop.f32.mrf.mxu1  ;;  %2479 = vmatprep.subr.mxu0 %v999_v61  ;;  %v3590_v52 = vsel %vm3587_vm0, %v3588_v22, %v3589_v10  ;;  %v3629_v4 = vadd.f32 %v3589_v10, %v3556_v53  ;;  %v407_v61 = vld [vmem:[#allocation4 + $0x2c0] sm:$0xff]  ;;  %v980_v22 = vld [vmem:[#allocation4 + $0x14a8] sm:$0xff]  ;;  %v406_v53 = vld [vmem:[#allocation4 + $0x2b8] sm:$0xff] }
 0x1c4   : > { %2640 = vmatprep.subr.mxu1 %v425_v34  ;;  %2480 = vmatpush1.msra.mxu0 %v998_v17  ;;  %v3628_v29 = vadd.f32 %v3590_v52, %v3555_v63  ;;  %v1585_v15 = vpop.f32.mrf.mxu0  ;;  %v1425_v17 = vadd.f32 %v5467_v39, %v5465_v37 }
 0x1c5   : > { %2641 = vmatpush1.msra.mxu1 %v424_v27  ;;  %v5734_v6 = vpop.f32.mrf.mxu1  ;;  %2481 = vmatprep.subr.mxu0 %v990_v20  ;;  %v3645_v45 = vmax.f32 %v3629_v4, 0.0  ;;  %v1429_v27 = vadd.f32 %v5481_v48, %v5479_v8  ;;  %v972_v20 = vld [vmem:[#allocation4 + $0x1468] sm:$0xff]  ;;  %v1431_v8 = vadd.f32 %v5485_v18, %v5483_v12  ;;  %v389_v12 = vld [vmem:[#allocation4 + $0x230] sm:$0xff]  ;;  %v962_v18 = vld [vmem:[#allocation4 + $0x1418] sm:$0xff] }
 0x1c6   : > { %7242 = vst [vmem:[#allocation50_spill] sm:$0xff] %v5734_v6  ;;  %2642 = vmatprep.subr.mxu1 %v416_v49  ;;  %2231 = vmatprep.mubr.f32.mxu0 %v4653_v57  ;;  %v3644_v34 = vmax.f32 %v3628_v29, 0.0  ;;  %v398_v49 = vld [vmem:[#allocation4 + $0x278] sm:$0xff]  ;;  %v1586_v48 = vadd.f32 %v1585_v15, %v1425_v17  ;;  %v963_v29 = vld [vmem:[#allocation4 + $0x1420] sm:$0xff]  ;;  %v388_v15 = vld [vmem:[#allocation4 + $0x228] sm:$0xff] }
 0x1c7   : > { %2392 = vmatprep.mubr.f32.mxu1 %v5470_v30  ;;  %2482 = vmatpush1.msra.mxu0 %v989_v51  ;;  %v3660_v10 = vsel %vm3587_vm0, %v3645_v45, 0.0  ;;  %v1423_v30 = vadd.f32 %v5463_v16, %v5461_v46  ;;  %v971_v46 = vld [vmem:[#allocation4 + $0x1460] sm:$0xff]  ;;  %v397_v16 = vld [vmem:[#allocation4 + $0x270] sm:$0xff]  ;;  %v6075_v6 = vld [vmem:[%s5085_s28 + $0xe8] sm:$0xff] }
 0x1c8   : > { %2643 = vmatpush1.msra.mxu1 %v415_v44  ;;  %2232 = vmatmul.mubr.f32.gmra.mxu0 %v4654_v21  ;;  %4120 = vst [vmem:[%s5739_s19] sm:$0xff] %v3644_v34  ;;  %4121 = vst [vmem:[%s5739_s19 + $0x8] sm:$0xff] %v3660_v10  ;;  %v1589_v37 = vpop.f32.mrf.mxu0  ;;  %v4655_v44 = vld [vmem:[%s5085_s28 + $0xc8] sm:$0xff]  ;;  %v3591_v45 = vrot.slane %v1586_v48, 1  ;;  %v953_v10 = vld [vmem:[#allocation4 + $0x13d0] sm:$0xff] }
 0x1c9   : > { %2393 = vmatmul.mubr.f32.gmra.mxu1 %v5475_v55  ;;  %v5754_v39 = vpop.f32.mrf.mxu1  ;;  %2483 = vmatprep.subr.mxu0 %v981_v0  ;;  %v1590_v63 = vadd.f32 %v1589_v37, %v1429_v27  ;;  %v1584_v55 = vadd.f32 %v1583_v59, %v1423_v30  ;;  %v4656_v0 = vld [vmem:[%s5085_s28 + $0xc0] sm:$0xff]  ;;  %v380_v34 = vld [vmem:[#allocation4 + $0x1e8] sm:$0xff]  ;;  %v4657_v37 = vld [vmem:[%s5085_s28 + $0xf8] sm:$0xff] }
 0x1ca   : > { %2644 = vmatprep.subr.mxu1 %v407_v61  ;;  %2484 = vmatpush1.msra.mxu0 %v980_v22  ;;  %v1591_v52 = vpop.f32.mrf.mxu0  ;;  %v954_v61 = vld [vmem:[#allocation4 + $0x13d8] sm:$0xff]  ;;  %v379_v30 = vld [vmem:[#allocation4 + $0x1e0] sm:$0xff] }
 0x1cb   : > { %2645 = vmatpush1.msra.mxu1 %v406_v53  ;;  %v5758_v4 = vpop.f32.mrf.mxu1  ;;  %2485 = vmatprep.subr.mxu0 %v972_v20  ;;  %v1592_v51 = vadd.f32 %v1591_v52, %v1431_v8  ;;  %v3558_v59 = vadd.f32 %v5722_v38, %v1590_v63  ;;  %v3557_v17 = vadd.f32 %v5722_v38, %v1584_v55  ;;  %v945_v8 = vld [vmem:[#allocation4 + $0x1390] sm:$0xff]  ;;  %v371_v48 = vld [vmem:[#allocation4 + $0x1a0] sm:$0xff]  ;;  %v944_v55 = vld [vmem:[#allocation4 + $0x1388] sm:$0xff] }
 0x1cc   : > { %7243 = vst [vmem:[#allocation51_spill] sm:$0xff] %v5758_v4  ;;  %2646 = vmatprep.subr.mxu1 %v398_v49  ;;  %2237 = vmatprep.mubr.f32.mxu0 %v4655_v44  ;;  %v370_v52 = vld [vmem:[#allocation4 + $0x198] sm:$0xff]  ;;  %v7245_v44 = vld [vmem:[#allocation9_spill] sm:$0xff] }
 0x1cd   : > { %2398 = vmatprep.mubr.f32.mxu1 %v5488_v47  ;;  %2486 = vmatpush1.msra.mxu0 %v971_v46  ;;  %v3592_v57 = vrot.slane %v1592_v51, 1  ;;  %v1437_v46 = vadd.f32 %v5503_v41, %v5501_v35  ;;  %v6109_v4 = vld [vmem:[%s5085_s28 + $0x148] sm:$0xff] }
 0x1ce   : > { %2647 = vmatpush1.msra.mxu1 %v397_v16  ;;  %2238 = vmatmul.mubr.f32.gmra.mxu0 %v4656_v0  ;;  %v1595_v27 = vpop.f32.mrf.mxu0  ;;  %v1441_v16 = vadd.f32 %v5517_v40, %v5515_v25  ;;  %v7247_v25 = vld [vmem:[#allocation11_spill] sm:$0xff]  ;;  %v7248_v40 = vld [vmem:[#allocation12_spill] sm:$0xff] }
 0x1cf   : > { %2399 = vmatmul.mubr.f32.gmra.mxu1 %v5493_v32  ;;  %v5766_v47 = vpop.f32.mrf.mxu1  ;;  %2487 = vmatprep.subr.mxu0 %v963_v29  ;;  %v3593_v22 = vsel %vm3587_vm0, %v3591_v45, %v3592_v57  ;;  %v3631_v53 = vadd.f32 %v3592_v57, %v3558_v59  ;;  %v4658_v29 = vld [vmem:[%s5085_s28 + $0xf0] sm:$0xff]  ;;  %v1443_v45 = vadd.f32 %v7248_v40, %v7247_v25  ;;  %v335_v40 = vld [vmem:[#allocation4 + $0x80] sm:$0xff] }
 0x1d0   : > { %2648 = vmatprep.subr.mxu1 %v389_v12  ;;  %2488 = vmatpush1.msra.mxu0 %v962_v18  ;;  %v3630_v21 = vadd.f32 %v3593_v22, %v3557_v17  ;;  %v1597_v20 = vpop.f32.mrf.mxu0  ;;  %v7246_v12 = vld [vmem:[#allocation10_spill] sm:$0xff] }
 0x1d1   : > { %2649 = vmatpush1.msra.mxu1 %v388_v15  ;;  %v5769_v32 = vpop.f32.mrf.mxu1  ;;  %2489 = vmatprep.subr.mxu0 %v954_v61  ;;  %v3647_v49 = vmax.f32 %v3631_v53, 0.0  ;;  %v936_v18 = vld [vmem:[#allocation4 + $0x1348] sm:$0xff]  ;;  %v362_v15 = vld [vmem:[#allocation4 + $0x158] sm:$0xff]  ;;  %v1598_v59 = vadd.f32 %v1597_v20, %v1437_v46  ;;  %v361_v0 = vld [vmem:[#allocation4 + $0x150] sm:$0xff] }
 0x1d2   : > { %7244 = vst [vmem:[#allocation52_spill] sm:$0xff] %v5769_v32  ;;  %2650 = vmatprep.subr.mxu1 %v380_v34  ;;  %2243 = vmatprep.mubr.f32.mxu0 %v4657_v37  ;;  %v3646_v63 = vmax.f32 %v3630_v21, 0.0  ;;  %v5791_v53 = vld [vmem:[%s5085_s28 + $0x128] sm:$0xff]  ;;  %v353_v21 = vld [vmem:[#allocation4 + $0x110] sm:$0xff]  ;;  %v926_v20 = vld [vmem:[#allocation4 + $0x12f8] sm:$0xff] }
 0x1d3   : > { %2404 = vmatprep.mubr.f32.mxu1 %v5506_v1  ;;  %2490 = vmatpush1.msra.mxu0 %v953_v10  ;;  %v3661_v51 = vsel %vm3587_vm0, %v3647_v49, 0.0  ;;  %v1435_v1 = vadd.f32 %v7245_v44, %v5497_v24  ;;  %v935_v24 = vld [vmem:[#allocation4 + $0x1340] sm:$0xff]  ;;  %v352_v49 = vld [vmem:[#allocation4 + $0x108] sm:$0xff]  ;;  %v909_v25 = vld [vmem:[#allocation4 + $0x1270] sm:$0xff] }
 0x1d4   : > { %2651 = vmatpush1.msra.mxu1 %v379_v30  ;;  %2244 = vmatmul.mubr.f32.gmra.mxu0 %v4658_v29  ;;  %4126 = vst [vmem:[%s5739_s19 + $0x30] sm:$0xff] %v3646_v63  ;;  %4127 = vst [vmem:[%s5739_s19 + $0x38] sm:$0xff] %v3661_v51  ;;  %v1601_v35 = vpop.f32.mrf.mxu0  ;;  %v7250_v10 = vld [vmem:[#allocation13_spill] sm:$0xff]  ;;  %v918_v63 = vld [vmem:[#allocation4 + $0x12b8] sm:$0xff] }
 0x1d5   : > { %2405 = vmatmul.mubr.f32.gmra.mxu1 %v7246_v12  ;;  %v5784_v41 = vpop.f32.mrf.mxu1  ;;  %2491 = vmatprep.subr.mxu0 %v945_v8  ;;  %v1602_v57 = vadd.f32 %v1601_v35, %v1441_v16  ;;  %v1596_v61 = vadd.f32 %v1595_v27, %v1435_v1  ;;  %v927_v30 = vld [vmem:[#allocation4 + $0x1300] sm:$0xff]  ;;  %v3594_v27 = vrot.slane %v1598_v59, 1  ;;  %v344_v46 = vld [vmem:[#allocation4 + $0xc8] sm:$0xff]  ;;  %v917_v1 = vld [vmem:[#allocation4 + $0x12b0] sm:$0xff] }
 0x1d6   : > { %2652 = vmatprep.subr.mxu1 %v371_v48  ;;  %2492 = vmatpush1.msra.mxu0 %v944_v55  ;;  %v1603_v34 = vpop.f32.mrf.mxu0  ;;  %v5797_v48 = vld [vmem:[%s5085_s28 + $0x120] sm:$0xff]  ;;  %v5808_v35 = vld [vmem:[%s5085_s28 + $0x158] sm:$0xff] }
 0x1d7   : > { %2653 = vmatpush1.msra.mxu1 %v370_v52  ;;  %v5788_v17 = vpop.f32.mrf.mxu1  ;;  %2493 = vmatprep.subr.mxu0 %v936_v18  ;;  %v1604_v22 = vadd.f32 %v1603_v34, %v1443_v45  ;;  %v3560_v37 = vadd.f32 %v5722_v38, %v1602_v57  ;;  %v3559_v16 = vadd.f32 %v5722_v38, %v1596_v61  ;;  %v343_v29 = vld [vmem:[#allocation4 + $0xc0] sm:$0xff]  ;;  %v908_v61 = vld [vmem:[#allocation4 + $0x1268] sm:$0xff]  ;;  %v334_v34 = vld [vmem:[#allocation4 + $0x78] sm:$0xff] }
 0x1d8   : > { %7249 = vst [vmem:[#allocation9_spill] sm:$0xff] %v5788_v17  ;;  %2654 = vmatprep.subr.mxu1 %v362_v15  ;;  %2249 = vmatprep.mubr.f32.mxu0 %v5791_v53  ;;  %v7252_v59 = vld [vmem:[#allocation16_spill] sm:$0xff]  ;;  %v7253_v57 = vld [vmem:[#allocation17_spill] sm:$0xff] }
 0x1d9   : > { %2410 = vmatprep.mubr.f32.mxu1 %v7250_v10  ;;  %2494 = vmatpush1.msra.mxu0 %v935_v24  ;;  %v3595_v8 = vrot.slane %v1604_v22, 1  ;;  %v1449_v24 = vadd.f32 %v7253_v57, %v7252_v59  ;;  %v7254_v10 = vld [vmem:[#allocation14_spill] sm:$0xff]  ;;  %v1178_v59 = vld [vmem:[#allocation4 + $0x1ad8] sm:$0xff] }
 0x1da   : > { %2655 = vmatpush1.msra.mxu1 %v361_v0  ;;  %2250 = vmatmul.mubr.f32.gmra.mxu0 %v5797_v48  ;;  %v1607_v55 = vpop.f32.mrf.mxu0  ;;  %v1453_v0 = vadd.f32 %v5553_v58, %v5551_v54  ;;  %v7257_v54 = vld [vmem:[#allocation19_spill] sm:$0xff]  ;;  %v7258_v58 = vld [vmem:[#allocation20_spill] sm:$0xff]  ;;  %v604_v57 = vld [vmem:[#allocation4 + $0x8e8] sm:$0xff] }
 0x1db   : > { %2411 = vmatmul.mubr.f32.gmra.mxu1 %v5529_v23  ;;  %v5802_v52 = vpop.f32.mrf.mxu1  ;;  %2495 = vmatprep.subr.mxu0 %v927_v30  ;;  %v3596_v51 = vsel %vm3587_vm0, %v3594_v27, %v3595_v8  ;;  %v3633_v44 = vadd.f32 %v3595_v8, %v3560_v37  ;;  %v7255_v30 = vld [vmem:[#allocation15_spill] sm:$0xff] }
 0x1dc   : > { %2656 = vmatprep.subr.mxu1 %v353_v21  ;;  %2496 = vmatpush1.msra.mxu0 %v926_v20  ;;  %v3632_v12 = vadd.f32 %v3596_v51, %v3559_v16  ;;  %v1609_v18 = vpop.f32.mrf.mxu0  ;;  %v5820_v21 = vld [vmem:[%s5085_s28 + $0x150] sm:$0xff]  ;;  %v326_v27 = vld [vmem:[#allocation4 + $0x38] sm:$0xff]  ;;  %v899_v51 = vld [vmem:[#allocation4 + $0x1220] sm:$0xff] }
 0x1dd   : > { %2657 = vmatpush1.msra.mxu1 %v352_v49  ;;  %v5805_v23 = vpop.f32.mrf.mxu1  ;;  %2497 = vmatprep.subr.mxu0 %v918_v63  ;;  %v3649_v15 = vmax.f32 %v3633_v44, 0.0  ;;  %v7256_v20 = vld [vmem:[#allocation18_spill] sm:$0xff]  ;;  %v1455_v63 = vadd.f32 %v7258_v58, %v7257_v54  ;;  %v6058_v17 = vld [vmem:[%s5085_s28 + $0xb8] sm:$0xff] }
 0x1de   : > { %7251 = vst [vmem:[#allocation10_spill] sm:$0xff] %v5805_v23  ;;  %2658 = vmatprep.subr.mxu1 %v344_v46  ;;  %2255 = vmatprep.mubr.f32.mxu0 %v5808_v35  ;;  %v3648_v45 = vmax.f32 %v3632_v12, 0.0  ;;  %v900_v49 = vld [vmem:[#allocation4 + $0x1228] sm:$0xff]  ;;  %v1610_v46 = vadd.f32 %v1609_v18, %v1449_v24  ;;  %v325_v44 = vld [vmem:[#allocation4 + $0x30] sm:$0xff]  ;;  %v1179_v18 = vld [vmem:[#allocation4 + $0x1ae0] sm:$0xff] }
 0x1df   : > { %2416 = vmatprep.mubr.f32.mxu1 %v5542_v33  ;;  %2498 = vmatpush1.msra.mxu0 %v917_v1  ;;  %v3662_v22 = vsel %vm3587_vm0, %v3649_v15, 0.0  ;;  %v1447_v33 = vadd.f32 %v7255_v30, %v7254_v10 }
 0x1e0   : > { %2659 = vmatpush1.msra.mxu1 %v343_v29  ;;  %2256 = vmatmul.mubr.f32.gmra.mxu0 %v5820_v21  ;;  %4132 = vst [vmem:[%s5739_s19 + $0x60] sm:$0xff] %v3648_v45  ;;  %4133 = vst [vmem:[%s5739_s19 + $0x68] sm:$0xff] %v3662_v22  ;;  %v1613_v37 = vpop.f32.mrf.mxu0  ;;  %v5833_v45 = vld [vmem:[%s5085_s28 + $0x188] sm:$0xff] }
 0x1e1   : > { %2417 = vmatmul.mubr.f32.gmra.mxu1 %v7256_v20  ;;  %v5826_v8 = vpop.f32.mrf.mxu1  ;;  %2499 = vmatprep.subr.mxu0 %v909_v25  ;;  %v1614_v16 = vadd.f32 %v1613_v37, %v1453_v0  ;;  %v1608_v1 = vadd.f32 %v1607_v55, %v1447_v33  ;;  %v7260_v25 = vld [vmem:[#allocation21_spill] sm:$0xff]  ;;  %v3597_v55 = vrot.slane %v1610_v46, 1  ;;  %v5850_v46 = vld [vmem:[%s5085_s28 + $0x1b8] sm:$0xff] }
 0x1e2   : > { %2660 = vmatprep.subr.mxu1 %v335_v40  ;;  %2500 = vmatpush1.msra.mxu0 %v908_v61  ;;  %v1615_v29 = vpop.f32.mrf.mxu0  ;;  %v605_v40 = vld [vmem:[#allocation4 + $0x8f0] sm:$0xff]  ;;  %v5839_v61 = vld [vmem:[%s5085_s28 + $0x180] sm:$0xff]  ;;  %v596_v22 = vld [vmem:[#allocation4 + $0x8a8] sm:$0xff] }
 0x1e3   : > { %2661 = vmatpush1.msra.mxu1 %v334_v34  ;;  %v5830_v12 = vpop.f32.mrf.mxu1  ;;  %2501 = vmatprep.subr.mxu0 %v900_v49  ;;  %v1616_v15 = vadd.f32 %v1615_v29, %v1455_v63  ;;  %v3562_v24 = vadd.f32 %v5722_v38, %v1614_v16  ;;  %v1170_v34 = vld [vmem:[#allocation4 + $0x1a98] sm:$0xff]  ;;  %v3561_v10 = vadd.f32 %v5722_v38, %v1608_v1  ;;  %v595_v37 = vld [vmem:[#allocation4 + $0x8a0] sm:$0xff]  ;;  %v1161_v16 = vld [vmem:[#allocation4 + $0x1a50] sm:$0xff] }
 0x1e4   : > { %7259 = vst [vmem:[#allocation11_spill] sm:$0xff] %v5830_v12  ;;  %2662 = vmatprep.subr.mxu1 %v326_v27  ;;  %2261 = vmatprep.mubr.f32.mxu0 %v5833_v45  ;;  %v1169_v27 = vld [vmem:[#allocation4 + $0x1a90] sm:$0xff]  ;;  %v7262_v1 = vld [vmem:[#allocation24_spill] sm:$0xff]  ;;  %v7263_v29 = vld [vmem:[#allocation25_spill] sm:$0xff] }
 0x1e5   : > { %2422 = vmatprep.mubr.f32.mxu1 %v7260_v25  ;;  %2502 = vmatpush1.msra.mxu0 %v899_v51  ;;  %v3598_v0 = vrot.slane %v1616_v15, 1  ;;  %v587_v51 = vld [vmem:[#allocation4 + $0x860] sm:$0xff]  ;;  %v1461_v15 = vadd.f32 %v7263_v29, %v7262_v1  ;;  %v1465_v25 = vadd.f32 %v5589_v2, %v5587_v60  ;;  %v7267_v60 = vld [vmem:[#allocation27_spill] sm:$0xff] }
 0x1e6   : > { %2663 = vmatpush1.msra.mxu1 %v325_v44  ;;  %2262 = vmatmul.mubr.f32.gmra.mxu0 %v5839_v61  ;;  %v1619_v30 = vpop.f32.mrf.mxu0  ;;  %v7268_v2 = vld [vmem:[#allocation28_spill] sm:$0xff] }
 0x1e7   : > { %2423 = vmatmul.mubr.f32.gmra.mxu1 %v5565_v43  ;;  %v5844_v33 = vpop.f32.mrf.mxu1  ;;  %2503 = vmatprep.subr.mxu0 %v1179_v18  ;;  %v3599_v20 = vsel %vm3587_vm0, %v3597_v55, %v3598_v0  ;;  %v3635_v49 = vadd.f32 %v3598_v0, %v3562_v24  ;;  %v1160_v18 = vld [vmem:[#allocation4 + $0x1a48] sm:$0xff]  ;;  %v7265_v55 = vld [vmem:[#allocation23_spill] sm:$0xff] }
 0x1e8   : > { %2664 = vmatprep.subr.mxu1 %v605_v40  ;;  %2504 = vmatpush2.msra.mxu0 %v1178_v59  ;;  %v3634_v54 = vadd.f32 %v3599_v20, %v3561_v10  ;;  %v1621_v58 = vpop.f32.mrf.mxu0  ;;  %v586_v40 = vld [vmem:[#allocation4 + $0x858] sm:$0xff]  ;;  %v5862_v24 = vld [vmem:[%s5085_s28 + $0x1b0] sm:$0xff] }
 0x1e9   : > { %2665 = vmatpush2.msra.mxu1 %v604_v57  ;;  %v5847_v43 = vpop.f32.mrf.mxu1  ;;  %2505 = vmatprep.subr.mxu0 %v1170_v34  ;;  %v3651_v63 = vmax.f32 %v3635_v49, 0.0  ;;  %v7264_v57 = vld [vmem:[#allocation22_spill] sm:$0xff]  ;;  %v1467_v49 = vadd.f32 %v7268_v2, %v7267_v60 }
 0x1ea   : > { %7261 = vst [vmem:[#allocation12_spill] sm:$0xff] %v5847_v43  ;;  %2666 = vmatprep.subr.mxu1 %v596_v22  ;;  %2267 = vmatprep.mubr.f32.mxu0 %v5850_v46  ;;  %v3650_v44 = vmax.f32 %v3634_v54, 0.0  ;;  %v7266_v0 = vld [vmem:[#allocation26_spill] sm:$0xff]  ;;  %v578_v22 = vld [vmem:[#allocation4 + $0x818] sm:$0xff]  ;;  %v1151_v54 = vld [vmem:[#allocation4 + $0x1a00] sm:$0xff] }
 0x1eb   : > { %2428 = vmatprep.mubr.f32.mxu1 %v5578_v5  ;;  %2506 = vmatpush2.msra.mxu0 %v1169_v27  ;;  %v3663_v59 = vsel %vm3587_vm0, %v3651_v63, 0.0  ;;  %v1459_v5 = vadd.f32 %v7265_v55, %v7264_v57  ;;  %v1152_v34 = vld [vmem:[#allocation4 + $0x1a08] sm:$0xff]  ;;  %v1622_v27 = vadd.f32 %v1621_v58, %v1461_v15  ;;  %v577_v63 = vld [vmem:[#allocation4 + $0x810] sm:$0xff]  ;;  %v1143_v58 = vld [vmem:[#allocation4 + $0x19c0] sm:$0xff] }
 0x1ec   : > { %2667 = vmatpush2.msra.mxu1 %v595_v37  ;;  %2268 = vmatmul.mubr.f32.gmra.mxu0 %v5862_v24  ;;  %4138 = vst [vmem:[%s5739_s19 + $0x90] sm:$0xff] %v3650_v44  ;;  %4139 = vst [vmem:[%s5739_s19 + $0x98] sm:$0xff] %v3663_v59  ;;  %v1625_v10 = vpop.f32.mrf.mxu0  ;;  %v5875_v59 = vld [vmem:[%s5085_s28 + $0x1e8] sm:$0xff]  ;;  %v1142_v15 = vld [vmem:[#allocation4 + $0x19b8] sm:$0xff] }
 0x1ed   : > { %2429 = vmatmul.mubr.f32.gmra.mxu1 %v7266_v0  ;;  %v5868_v20 = vpop.f32.mrf.mxu1  ;;  %2507 = vmatprep.subr.mxu0 %v1161_v16  ;;  %v1626_v37 = vadd.f32 %v1625_v10, %v1465_v25  ;;  %v1620_v1 = vadd.f32 %v1619_v30, %v1459_v5  ;;  %v7270_v16 = vld [vmem:[#allocation29_spill] sm:$0xff]  ;;  %v3600_v30 = vrot.slane %v1622_v27, 1  ;;  %v1134_v5 = vld [vmem:[#allocation4 + $0x1978] sm:$0xff] }
 0x1ee   : > { %2668 = vmatprep.subr.mxu1 %v587_v51  ;;  %2508 = vmatpush2.msra.mxu0 %v1160_v18  ;;  %v1627_v29 = vpop.f32.mrf.mxu0  ;;  %v569_v51 = vld [vmem:[#allocation4 + $0x7d0] sm:$0xff]  ;;  %v568_v25 = vld [vmem:[#allocation4 + $0x7c8] sm:$0xff]  ;;  %v5881_v55 = vld [vmem:[%s5085_s28 + $0x1e0] sm:$0xff] }
 0x1ef   : > { %2669 = vmatpush2.msra.mxu1 %v586_v40  ;;  %v5872_v57 = vpop.f32.mrf.mxu1  ;;  %2509 = vmatprep.subr.mxu0 %v1152_v34  ;;  %v1628_v44 = vadd.f32 %v1627_v29, %v1467_v49  ;;  %v3564_v18 = vadd.f32 %v5722_v38, %v1626_v37  ;;  %v560_v0 = vld [vmem:[#allocation4 + $0x788] sm:$0xff]  ;;  %v3563_v34 = vadd.f32 %v5722_v38, %v1620_v1  ;;  %v1133_v49 = vld [vmem:[#allocation4 + $0x1970] sm:$0xff]  ;;  %v559_v27 = vld [vmem:[#allocation4 + $0x780] sm:$0xff] }
 0x1f0   : > { %7269 = vst [vmem:[#allocation13_spill] sm:$0xff] %v5872_v57  ;;  %2670 = vmatprep.subr.mxu1 %v578_v22  ;;  %2273 = vmatprep.mubr.f32.mxu0 %v5875_v59  ;;  %v5892_v1 = vld [vmem:[%s5085_s28 + $0x218] sm:$0xff]  ;;  %v1125_v29 = vld [vmem:[#allocation4 + $0x1930] sm:$0xff] }
 0x1f1   : > { %2434 = vmatprep.mubr.f32.mxu1 %v7270_v16  ;;  %2510 = vmatpush2.msra.mxu0 %v1151_v54  ;;  %v3601_v40 = vrot.slane %v1628_v44, 1  ;;  %v551_v44 = vld [vmem:[#allocation4 + $0x740] sm:$0xff] }
 0x1f2   : > { %2671 = vmatpush2.msra.mxu1 %v577_v63  ;;  %2274 = vmatmul.mubr.f32.gmra.mxu0 %v5881_v55  ;;  %v1631_v22 = vpop.f32.mrf.mxu0 }
 0x1f3   : > { %2435 = vmatmul.mubr.f32.gmra.mxu1 %v5601_v3  ;;  %v5886_v10 = vpop.f32.mrf.mxu1  ;;  %2511 = vmatprep.subr.mxu0 %v1143_v58  ;;  %v3602_v60 = vsel %vm3587_vm0, %v3600_v30, %v3601_v40  ;;  %v3637_v2 = vadd.f32 %v3601_v40, %v3564_v18  ;;  %v7272_v58 = vld [vmem:[#allocation32_spill] sm:$0xff]  ;;  %v1124_v30 = vld [vmem:[#allocation4 + $0x1928] sm:$0xff] }
 0x1f4   : > { %2672 = vmatprep.subr.mxu1 %v569_v51  ;;  %2512 = vmatpush2.msra.mxu0 %v1142_v15  ;;  %v3636_v37 = vadd.f32 %v3602_v60, %v3563_v34  ;;  %v1633_v54 = vpop.f32.mrf.mxu0  ;;  %v7273_v51 = vld [vmem:[#allocation33_spill] sm:$0xff]  ;;  %v550_v18 = vld [vmem:[#allocation4 + $0x738] sm:$0xff]  ;;  %v5904_v34 = vld [vmem:[%s5085_s28 + $0x210] sm:$0xff] }
 0x1f5   : > { %2673 = vmatpush2.msra.mxu1 %v568_v25  ;;  %v5889_v3 = vpop.f32.mrf.mxu1  ;;  %2513 = vmatprep.subr.mxu0 %v1134_v5  ;;  %v3653_v63 = vmax.f32 %v3637_v2, 0.0  ;;  %v1473_v15 = vadd.f32 %v7273_v51, %v7272_v58  ;;  %v1477_v25 = vadd.f32 %v5625_v26, %v5623_v14  ;;  %v7274_v5 = vld [vmem:[#allocation30_spill] sm:$0xff]  ;;  %v7277_v14 = vld [vmem:[#allocation35_spill] sm:$0xff]  ;;  %v7278_v26 = vld [vmem:[#allocation36_spill] sm:$0xff] }
 0x1f6   : > { %7271 = vst [vmem:[#allocation16_spill] sm:$0xff] %v5889_v3  ;;  %2674 = vmatprep.subr.mxu1 %v560_v0  ;;  %2279 = vmatprep.mubr.f32.mxu0 %v5892_v1  ;;  %v3652_v16 = vmax.f32 %v3636_v37, 0.0  ;;  %v7275_v0 = vld [vmem:[#allocation31_spill] sm:$0xff]  ;;  %v7276_v60 = vld [vmem:[#allocation34_spill] sm:$0xff] }
 0x1f7   : > { %2440 = vmatprep.mubr.f32.mxu1 %v5614_v36  ;;  %2514 = vmatpush2.msra.mxu0 %v1133_v49  ;;  %v3664_v40 = vsel %vm3587_vm0, %v3653_v63, 0.0  ;;  %v1471_v36 = vadd.f32 %v7275_v0, %v7274_v5  ;;  %v1116_v2 = vld [vmem:[#allocation4 + $0x18e8] sm:$0xff]  ;;  %v542_v37 = vld [vmem:[#allocation4 + $0x6f8] sm:$0xff]  ;;  %v1479_v63 = vadd.f32 %v7278_v26, %v7277_v14  ;;  %v1634_v58 = vadd.f32 %v1633_v54, %v1473_v15  ;;  %v1115_v5 = vld [vmem:[#allocation4 + $0x18e0] sm:$0xff] }
 0x1f8   : > { %2675 = vmatpush2.msra.mxu1 %v559_v27  ;;  %2280 = vmatmul.mubr.f32.gmra.mxu0 %v5904_v34  ;;  %4144 = vst [vmem:[%s5739_s19 + $0xc0] sm:$0xff] %v3652_v16  ;;  %4145 = vst [vmem:[%s5739_s19 + $0xc8] sm:$0xff] %v3664_v40  ;;  %v1637_v49 = vpop.f32.mrf.mxu0  ;;  %v541_v0 = vld [vmem:[#allocation4 + $0x6f0] sm:$0xff]  ;;  %v5917_v40 = vld [vmem:[%s5085_s28 + $0x248] sm:$0xff] }
 0x1f9   : > { %2441 = vmatmul.mubr.f32.gmra.mxu1 %v7276_v60  ;;  %v5910_v27 = vpop.f32.mrf.mxu1  ;;  %2515 = vmatprep.subr.mxu0 %v1125_v29  ;;  %v1638_v51 = vadd.f32 %v1637_v49, %v1477_v25  ;;  %v1632_v60 = vadd.f32 %v1631_v22, %v1471_v36  ;;  %v7280_v29 = vld [vmem:[#allocation37_spill] sm:$0xff]  ;;  %v1106_v15 = vld [vmem:[#allocation4 + $0x1898] sm:$0xff]  ;;  %v3603_v22 = vrot.slane %v1634_v58, 1  ;;  %v1097_v58 = vld [vmem:[#allocation4 + $0x1850] sm:$0xff] }
 0x1fa   : > { %2676 = vmatprep.subr.mxu1 %v551_v44  ;;  %2516 = vmatpush2.msra.mxu0 %v1124_v30  ;;  %v1639_v3 = vpop.f32.mrf.mxu0  ;;  %v1107_v54 = vld [vmem:[#allocation4 + $0x18a0] sm:$0xff]  ;;  %v533_v44 = vld [vmem:[#allocation4 + $0x6b0] sm:$0xff]  ;;  %v532_v25 = vld [vmem:[#allocation4 + $0x6a8] sm:$0xff] }
 0x1fb   : > { %2677 = vmatpush2.msra.mxu1 %v550_v18  ;;  %v5914_v43 = vpop.f32.mrf.mxu1  ;;  %2517 = vmatprep.subr.mxu0 %v1116_v2  ;;  %v1640_v16 = vadd.f32 %v1639_v3, %v1479_v63  ;;  %v3566_v30 = vadd.f32 %v5722_v38, %v1638_v51  ;;  %v5923_v36 = vld [vmem:[%s5085_s28 + $0x240] sm:$0xff]  ;;  %v1098_v3 = vld [vmem:[#allocation4 + $0x1858] sm:$0xff]  ;;  %v524_v2 = vld [vmem:[#allocation4 + $0x668] sm:$0xff] }
 0x1fc   : > { %7279 = vst [vmem:[#allocation17_spill] sm:$0xff] %v5914_v43  ;;  %2678 = vmatprep.subr.mxu1 %v542_v37  ;;  %2285 = vmatprep.mubr.f32.mxu0 %v5917_v40  ;;  %v3565_v37 = vadd.f32 %v5722_v38, %v1632_v60  ;;  %v523_v51 = vld [vmem:[#allocation4 + $0x660] sm:$0xff]  ;;  %v1080_v43 = vld [vmem:[#allocation4 + $0x17c8] sm:$0xff] }
 0x1fd   : > { %2446 = vmatprep.mubr.f32.mxu1 %v7280_v29  ;;  %2518 = vmatpush2.msra.mxu0 %v1115_v5  ;;  %v3604_v18 = vrot.slane %v1640_v16, 1  ;;  %v5934_v16 = vld [vmem:[%s5085_s28 + $0x278] sm:$0xff]  ;;  %v1089_v29 = vld [vmem:[#allocation4 + $0x1810] sm:$0xff] }
 0x1fe   : > { %2679 = vmatpush2.msra.mxu1 %v541_v0  ;;  %2286 = vmatmul.mubr.f32.gmra.mxu0 %v5923_v36  ;;  %v1643_v49 = vpop.f32.mrf.mxu0 }
 0x1ff   : > { %2447 = vmatmul.mubr.f32.gmra.mxu1 %v5637_v7  ;;  %v5928_v14 = vpop.f32.mrf.mxu1  ;;  %2519 = vmatprep.subr.mxu0 %v1107_v54  ;;  %v3605_v26 = vsel %vm3587_vm0, %v3603_v22, %v3604_v18  ;;  %v3639_v63 = vadd.f32 %v3604_v18, %v3566_v30  ;;  %v515_v54 = vld [vmem:[#allocation4 + $0x620] sm:$0xff]  ;;  %v7284_v30 = vld [vmem:[#allocation42_spill] sm:$0xff] }
 0x200   : > { %2680 = vmatprep.subr.mxu1 %v533_v44  ;;  %2520 = vmatpush2.msra.mxu0 %v1106_v15  ;;  %v3638_v5 = vadd.f32 %v3605_v26, %v3565_v37  ;;  %v1645_v0 = vpop.f32.mrf.mxu0  ;;  %v7282_v15 = vld [vmem:[#allocation40_spill] sm:$0xff]  ;;  %v1489_v18 = vadd.f32 %v5658_v50, %v7284_v30  ;;  %v7285_v26 = vld [vmem:[#allocation38_spill] sm:$0xff]  ;;  %v7287_v50 = vld [vmem:[#allocation43_spill] sm:$0xff] }
 0x201   : > { %2681 = vmatpush2.msra.mxu1 %v532_v25  ;;  %v5931_v7 = vpop.f32.mrf.mxu1  ;;  %2521 = vmatprep.subr.mxu0 %v1098_v3  ;;  %v3655_v60 = vmax.f32 %v3639_v63, 0.0  ;;  %v7283_v25 = vld [vmem:[#allocation41_spill] sm:$0xff]  ;;  %v7286_v63 = vld [vmem:[#allocation39_spill] sm:$0xff] }
 0x202   : > { %7281 = vst [vmem:[#allocation14_spill] sm:$0xff] %v5931_v7  ;;  %2682 = vmatprep.subr.mxu1 %v524_v2  ;;  %2291 = vmatprep.mubr.f32.mxu0 %v5934_v16  ;;  %v3654_v44 = vmax.f32 %v3638_v5, 0.0  ;;  %v1485_v22 = vadd.f32 %v7283_v25, %v7282_v15  ;;  %v1088_v3 = vld [vmem:[#allocation4 + $0x1808] sm:$0xff]  ;;  %v514_v2 = vld [vmem:[#allocation4 + $0x618] sm:$0xff]  ;;  %v5946_v7 = vld [vmem:[%s5085_s28 + $0x270] sm:$0xff] }
 0x203   : > { %2452 = vmatprep.mubr.f32.mxu1 %v5650_v11  ;;  %2522 = vmatpush2.msra.mxu0 %v1097_v58  ;;  %v3665_v37 = vsel %vm3587_vm0, %v3655_v60, 0.0  ;;  %v1483_v11 = vadd.f32 %v7286_v63, %v7285_v26  ;;  %v4675_v5 = vld [vmem:[%s5085_s28 + $0x280] sm:$0xff]  ;;  %v506_v15 = vld [vmem:[#allocation4 + $0x5d8] sm:$0xff] }
 0x204   : > { %2683 = vmatpush2.msra.mxu1 %v523_v51  ;;  %2292 = vmatmul.mubr.f32.gmra.mxu0 %v5946_v7  ;;  %4150 = vst [vmem:[%s5739_s19 + $0xf0] sm:$0xff] %v3654_v44  ;;  %4151 = vst [vmem:[%s5739_s19 + $0xf8] sm:$0xff] %v3665_v37  ;;  %v1649_v58 = vpop.f32.mrf.mxu0  ;;  %v7288_v60 = vld [vmem:[#allocation44_spill] sm:$0xff]  ;;  %v1646_v30 = vadd.f32 %v1645_v0, %v1485_v22  ;;  %v497_v22 = vld [vmem:[#allocation4 + $0x590] sm:$0xff] }
 0x205   : > { %2453 = vmatmul.mubr.f32.gmra.mxu1 %v4675_v5  ;;  %v5952_v51 = vpop.f32.mrf.mxu1  ;;  %2523 = vmatprep.subr.mxu0 %v1089_v29  ;;  %v1491_v25 = vadd.f32 %v7288_v60, %v7287_v50  ;;  %v1650_v26 = vadd.f32 %v1649_v58, %v1489_v18  ;;  %v1079_v63 = vld [vmem:[#allocation4 + $0x17c0] sm:$0xff]  ;;  %v505_v5 = vld [vmem:[#allocation4 + $0x5d0] sm:$0xff]  ;;  %v1644_v57 = vadd.f32 %v1643_v49, %v1483_v11  ;;  %v5959_v29 = vld [vmem:[%s5085_s28 + $0x2a8] sm:$0xff] }
 0x206   : > { %2684 = vmatprep.subr.mxu1 %v515_v54  ;;  %2524 = vmatpush2.msra.mxu0 %v1088_v3  ;;  %v1651_v23 = vpop.f32.mrf.mxu0  ;;  %v4677_v54 = vld [vmem:[%s5085_s28 + $0x2b8] sm:$0xff]  ;;  %v1071_v0 = vld [vmem:[#allocation4 + $0x1780] sm:$0xff]  ;;  %v496_v49 = vld [vmem:[#allocation4 + $0x588] sm:$0xff]  ;;  %v3606_v3 = vrot.slane %v1646_v30, 1 }
 0x207   : > { %2685 = vmatpush2.msra.mxu1 %v514_v2  ;;  %v5956_v44 = vpop.f32.mrf.mxu1  ;;  %2525 = vmatprep.subr.mxu0 %v1080_v43  ;;  %v1652_v37 = vadd.f32 %v1651_v23, %v1491_v25  ;;  %v1070_v18 = vld [vmem:[#allocation4 + $0x1778] sm:$0xff]  ;;  %v3568_v2 = vadd.f32 %v5722_v38, %v1650_v26  ;;  %v5965_v11 = vld [vmem:[%s5085_s28 + $0x2a0] sm:$0xff]  ;;  %v4679_v23 = vld [vmem:[%s5085_s28 + $0x2b0] sm:$0xff]  ;;  %v3567_v50 = vadd.f32 %v5722_v38, %v1644_v57 }
 0x208   : > { %7289 = vst [vmem:[#allocation15_spill] sm:$0xff] %v5956_v44  ;;  %2686 = vmatprep.subr.mxu1 %v506_v15  ;;  %2297 = vmatprep.mubr.f32.mxu0 %v5959_v29  ;;  %v1062_v15 = vld [vmem:[#allocation4 + $0x1738] sm:$0xff]  ;;  %v488_v58 = vld [vmem:[#allocation4 + $0x548] sm:$0xff] }
 0x209   : > { %2458 = vmatprep.mubr.f32.mxu1 %v4677_v54  ;;  %2526 = vmatpush2.msra.mxu0 %v1079_v63  ;;  %v3607_v43 = vrot.slane %v1652_v37, 1  ;;  %v1061_v63 = vld [vmem:[#allocation4 + $0x1730] sm:$0xff]  ;;  %v5976_v44 = vld [vmem:[%s5085_s28 + $0x2d8] sm:$0xff] }
 0x20a   : > { %2687 = vmatpush2.msra.mxu1 %v505_v5  ;;  %2298 = vmatmul.mubr.f32.gmra.mxu0 %v5965_v11  ;;  %v1655_v60 = vpop.f32.mrf.mxu0  ;;  %v487_v5 = vld [vmem:[#allocation4 + $0x540] sm:$0xff] }
 0x20b   : > { %2459 = vmatmul.mubr.f32.gmra.mxu1 %v4679_v23  ;;  %v5970_v25 = vpop.f32.mrf.mxu1  ;;  %2527 = vmatprep.subr.mxu0 %v1071_v0  ;;  %v3608_v30 = vsel %vm3587_vm0, %v3606_v3, %v3607_v43  ;;  %v3641_v26 = vadd.f32 %v3607_v43, %v3568_v2  ;;  %v4681_v0 = vld [vmem:[%s5085_s28 + $0x2e8] sm:$0xff]  ;;  %v1497_v3 = vadd.f32 %v5674_v28, %v5672_v42  ;;  %v470_v42 = vld [vmem:[#allocation4 + $0x4b8] sm:$0xff] }
 0x20c   : > { %2688 = vmatprep.subr.mxu1 %v497_v22  ;;  %2528 = vmatpush2.msra.mxu0 %v1070_v18  ;;  %v3640_v37 = vadd.f32 %v3608_v30, %v3567_v50  ;;  %v1657_v54 = vpop.f32.mrf.mxu0  ;;  %v1053_v22 = vld [vmem:[#allocation4 + $0x16f0] sm:$0xff]  ;;  %v479_v18 = vld [vmem:[#allocation4 + $0x500] sm:$0xff]  ;;  %v1501_v2 = vadd.f32 %v5682_v13, %v5680_v62  ;;  %v1052_v43 = vld [vmem:[#allocation4 + $0x16e8] sm:$0xff] }
 0x20d   : > { %2689 = vmatpush2.msra.mxu1 %v496_v49  ;;  %v5973_v23 = vpop.f32.mrf.mxu1  ;;  %2529 = vmatprep.subr.mxu0 %v1062_v15  ;;  %v3657_v57 = vmax.f32 %v3641_v26, 0.0  ;;  %v478_v15 = vld [vmem:[#allocation4 + $0x4f8] sm:$0xff]  ;;  %v7291_v50 = vld [vmem:[#allocation45_spill] sm:$0xff]  ;;  %v7292_v30 = vld [vmem:[#allocation46_spill] sm:$0xff] }
 0x20e   : > { %7290 = vst [vmem:[#allocation18_spill] sm:$0xff] %v5973_v23  ;;  %2690 = vmatprep.subr.mxu1 %v488_v58  ;;  %2303 = vmatprep.mubr.f32.mxu0 %v5976_v44  ;;  %v3656_v49 = vmax.f32 %v3640_v37, 0.0  ;;  %v1495_v26 = vadd.f32 %v7292_v30, %v7291_v50  ;;  %v4683_v37 = vld [vmem:[%s5085_s28 + $0x2e0] sm:$0xff]  ;;  %v1044_v23 = vld [vmem:[#allocation4 + $0x16a8] sm:$0xff]  ;;  %v7293_v62 = vld [vmem:[#allocation47_spill] sm:$0xff] }
 0x20f   : > { %2464 = vmatprep.mubr.f32.mxu1 %v4681_v0  ;;  %2530 = vmatpush2.msra.mxu0 %v1061_v63  ;;  %v3666_v58 = vsel %vm3587_vm0, %v3657_v57, 0.0  ;;  %v5988_v0 = vld [vmem:[%s5085_s28 + $0x2d0] sm:$0xff]  ;;  %v1503_v13 = vadd.f32 %v7293_v62, %v5684_v56  ;;  %v1658_v57 = vadd.f32 %v1657_v54, %v1497_v3  ;;  %v4685_v3 = vld [vmem:[%s5085_s28 + $0x8] sm:$0xff] }
 0x210   : > { %2691 = vmatpush2.msra.mxu1 %v487_v5  ;;  %2304 = vmatmul.mubr.f32.gmra.mxu0 %v5988_v0  ;;  %4156 = vst [vmem:[%s5739_s19 + $0x120] sm:$0xff] %v3656_v49  ;;  %4157 = vst [vmem:[%s5739_s19 + $0x128] sm:$0xff] %v3666_v58  ;;  %v1661_v28 = vpop.f32.mrf.mxu0  ;;  %v1043_v5 = vld [vmem:[#allocation4 + $0x16a0] sm:$0xff]  ;;  %v469_v30 = vld [vmem:[#allocation4 + $0x4b0] sm:$0xff] }
 0x211   : > { %2465 = vmatmul.mubr.f32.gmra.mxu1 %v4683_v37  ;;  %v5994_v63 = vpop.f32.mrf.mxu1  ;;  %2531 = vmatprep.subr.mxu0 %v1053_v22  ;;  %v1662_v50 = vadd.f32 %v1661_v28, %v1501_v2  ;;  %v1656_v37 = vadd.f32 %v1655_v60, %v1495_v26  ;;  %v749_v56 = vld [vmem:[#allocation4 + $0xd70] sm:$0xff]  ;;  %v748_v2 = vld [vmem:[#allocation4 + $0xd68] sm:$0xff]  ;;  %v6007_v58 = vld [vmem:[%s5085_s28 + $0x20] sm:$0xff] }
 0x212   : > { %2692 = vmatprep.subr.mxu1 %v479_v18  ;;  %2532 = vmatpush2.msra.mxu0 %v1052_v43  ;;  %v1663_v12 = vpop.f32.mrf.mxu0  ;;  %v6001_v18 = vld [vmem:[%s5085_s28 + $0x28] sm:$0xff]  ;;  %v1037_v54 = vld [vmem:[#allocation4 + $0x1670] sm:$0xff]  ;;  %v3609_v43 = vrot.slane %v1658_v57, 1 }
 0x213   : > { %2693 = vmatpush2.msra.mxu1 %v478_v15  ;;  %v5998_v49 = vpop.f32.mrf.mxu1  ;;  %2533 = vmatprep.subr.mxu0 %v1044_v23  ;;  %v1664_v22 = vadd.f32 %v1663_v12, %v1503_v13  ;;  %v1036_v60 = vld [vmem:[#allocation4 + $0x1668] sm:$0xff]  ;;  %v3570_v15 = vadd.f32 %v5722_v38, %v1662_v50  ;;  %v4687_v12 = vld [vmem:[%s5085_s28] sm:$0xff]  ;;  %v3569_v28 = vadd.f32 %v5722_v38, %v1656_v37 }
 0x214   : > { %7294 = vst [vmem:[#allocation19_spill] sm:$0xff] %v5998_v49  ;;  %2694 = vmatprep.subr.mxu1 %v470_v42  ;;  %2534 = vmatpush2.msra.mxu0 %v1043_v5  ;;  %v740_v26 = vld [vmem:[#allocation4 + $0xd28] sm:$0xff]  ;;  %v7295_v50 = vld [vmem:[#allocation48_spill] sm:$0xff] }
 0x215   : > { %2535 = vmatprep.mubr.f32.mxu0 %v6001_v18  ;;  %2695 = vmatpush2.msra.mxu1 %v469_v30  ;;  %v3610_v23 = vrot.slane %v1664_v22, 1  ;;  %v1028_v42 = vld [vmem:[#allocation4 + $0x1628] sm:$0xff]  ;;  %v739_v22 = vld [vmem:[#allocation4 + $0xd20] sm:$0xff] }
 0x216   : > { %2696 = vmatprep.mubr.f32.mxu1 %v4685_v3  ;;  %2536 = vmatmul.mubr.f32.vlgmr.msra.gmra.mxu0 %v6007_v58  ;;  %v1893_v62 = vpop.f32.mrf.mxu0  ;;  %v1027_v3 = vld [vmem:[#allocation4 + $0x1620] sm:$0xff] }
 0x217   : > { %2697 = vmatmul.mubr.f32.vlgmr.msra.gmra.mxu1 %v4687_v12  ;;  %v2054_v13 = vpop.f32.mrf.mxu1  ;;  %2793 = vmatprep.subr.mxu0 %v749_v56  ;;  %v3611_v5 = vsel %vm3587_vm0, %v3609_v43, %v3610_v23  ;;  %v3643_v57 = vadd.f32 %v3610_v23, %v3570_v15  ;;  %v1894_v30 = vadd.f32 %v1893_v62, %v7295_v50  ;;  %v6021_v56 = vld [vmem:[%s5085_s28 + $0x58] sm:$0xff] }
 0x218   : > { %2954 = vmatprep.subr.mxu1 %v1037_v54  ;;  %2794 = vmatpush1.msra.mxu0 %v748_v2  ;;  %v3642_v12 = vadd.f32 %v3611_v5, %v3569_v28  ;;  %v6014_v49 = vpop.f32.mrf.mxu0  ;;  %v4689_v54 = vld [vmem:[%s5085_s28 + $0x38] sm:$0xff]  ;;  %v731_v2 = vld [vmem:[#allocation4 + $0xce0] sm:$0xff]  ;;  %v4691_v28 = vld [vmem:[%s5085_s28 + $0x30] sm:$0xff] }
 0x219   : > { %2955 = vmatpush1.msra.mxu1 %v1036_v60  ;;  %v6016_v32 = vpop.f32.mrf.mxu1  ;;  %2795 = vmatprep.subr.mxu0 %v740_v26  ;;  %v3659_v38 = vmax.f32 %v3643_v57, 0.0  ;;  %v6018_v37 = vadd.f32 %v2054_v13, %v1894_v30  ;;  %v1019_v60 = vld [vmem:[#allocation4 + $0x15e0] sm:$0xff]  ;;  %v730_v15 = vld [vmem:[#allocation4 + $0xcd8] sm:$0xff]  ;;  %v721_v30 = vld [vmem:[#allocation4 + $0xc90] sm:$0xff] }
 0x21a   : > { %2956 = vmatprep.subr.mxu1 %v1028_v42  ;;  %2541 = vmatprep.mubr.f32.mxu0 %v6021_v56  ;;  %v3658_v43 = vmax.f32 %v3642_v12, 0.0  ;;  %v1018_v23 = vld [vmem:[#allocation4 + $0x15d8] sm:$0xff]  ;;  %v6027_v42 = vld [vmem:[%s5085_s28 + $0x50] sm:$0xff] }
 0x21b   : > { %7296 = vst [vmem:[#allocation20_spill] sm:$0xff] %v6018_v37  ;;  %2702 = vmatprep.mubr.f32.mxu1 %v4689_v54  ;;  %2796 = vmatpush1.msra.mxu0 %v739_v22  ;;  %v3667_v26 = vsel %vm3587_vm0, %v3659_v38, 0.0  ;;  %v722_v62 = vld [vmem:[#allocation4 + $0xc98] sm:$0xff]  ;;  %v1009_v22 = vld [vmem:[#allocation4 + $0x1590] sm:$0xff]  ;;  %v6041_v54 = vld [vmem:[%s5085_s28 + $0x88] sm:$0xff] }
 0x21c   : > { %2957 = vmatpush1.msra.mxu1 %v1027_v3  ;;  %2542 = vmatmul.mubr.f32.gmra.mxu0 %v6027_v42  ;;  %v1010_v13 = vld [vmem:[#allocation4 + $0x1598] sm:$0xff]  ;;  %4162 = vst [vmem:[%s5739_s19 + $0x150] sm:$0xff] %v3658_v43  ;;  %4163 = vst [vmem:[%s5739_s19 + $0x158] sm:$0xff] %v3667_v26  ;;  %v1899_v5 = vpop.f32.mrf.mxu0  ;;  %v712_v43 = vld [vmem:[#allocation4 + $0xc48] sm:$0xff] }
 0x21d   : > { %2703 = vmatmul.mubr.f32.gmra.mxu1 %v4691_v28  ;;  %v2060_v57 = vpop.f32.mrf.mxu1  ;;  %2797 = vmatprep.subr.mxu0 %v731_v2  ;;  %v1900_v50 = vadd.f32 %v1899_v5, %v5711_v31  ;;  %v4693_v2 = vld [vmem:[%s5085_s28 + $0x68] sm:$0xff]  ;;  %v713_v31 = vld [vmem:[#allocation4 + $0xc50] sm:$0xff]  ;;  %v4695_v26 = vld [vmem:[%s5085_s28 + $0x60] sm:$0xff] }
 0x21e   : > { %2958 = vmatprep.subr.mxu1 %v1019_v60  ;;  %2798 = vmatpush1.msra.mxu0 %v730_v15  ;;  %v6034_v3 = vpop.f32.mrf.mxu0  ;;  %v1001_v60 = vld [vmem:[#allocation4 + $0x1550] sm:$0xff]  ;;  %v1000_v15 = vld [vmem:[#allocation4 + $0x1548] sm:$0xff] }
 0x21f   : > { %2959 = vmatpush1.msra.mxu1 %v1018_v23  ;;  %v6036_v12 = vpop.f32.mrf.mxu1  ;;  %2799 = vmatprep.subr.mxu0 %v722_v62  ;;  %v6038_v38 = vadd.f32 %v2060_v57, %v1900_v50  ;;  %v6046_v23 = vld [vmem:[%s5085_s28 + $0x80] sm:$0xff]  ;;  %v704_v28 = vld [vmem:[#allocation4 + $0xc08] sm:$0xff] }
 0x220   : > { %2960 = vmatprep.subr.mxu1 %v1010_v13  ;;  %2547 = vmatprep.mubr.f32.mxu0 %v6041_v54  ;;  %v992_v62 = vld [vmem:[#allocation4 + $0x1508] sm:$0xff]  ;;  %v703_v50 = vld [vmem:[#allocation4 + $0xc00] sm:$0xff] }
 0x221   : > { %2708 = vmatprep.mubr.f32.mxu1 %v4693_v2  ;;  %2800 = vmatpush1.msra.mxu0 %v721_v30  ;;  %v991_v30 = vld [vmem:[#allocation4 + $0x1500] sm:$0xff] }
 0x222   : > { %2961 = vmatpush1.msra.mxu1 %v1009_v22  ;;  %2548 = vmatmul.mubr.f32.gmra.mxu0 %v6046_v23  ;;  %v1905_v13 = vpop.f32.mrf.mxu0 }
 0x223   : > { %2709 = vmatmul.mubr.f32.gmra.mxu1 %v4695_v26  ;;  %v2066_v5 = vpop.f32.mrf.mxu1  ;;  %2801 = vmatprep.subr.mxu0 %v713_v31  ;;  %v1906_v57 = vadd.f32 %v1905_v13, %v5731_v19  ;;  %v4697_v31 = vld [vmem:[%s5085_s28 + $0x98] sm:$0xff]  ;;  %v695_v19 = vld [vmem:[#allocation4 + $0xbc0] sm:$0xff]  ;;  %v6063_v13 = vld [vmem:[%s5085_s28 + $0xb0] sm:$0xff] }
 0x224   : > { %2962 = vmatprep.subr.mxu1 %v1001_v60  ;;  %2802 = vmatpush1.msra.mxu0 %v712_v43  ;;  %v6051_v22 = vpop.f32.mrf.mxu0  ;;  %v983_v60 = vld [vmem:[#allocation4 + $0x14c0] sm:$0xff]  ;;  %v694_v43 = vld [vmem:[#allocation4 + $0xbb8] sm:$0xff] }
 0x225   : > { %2963 = vmatpush1.msra.mxu1 %v1000_v15  ;;  %7297 = vst [vmem:[#allocation21_spill] sm:$0xff] %v6051_v22  ;;  %v6053_v2 = vpop.f32.mrf.mxu1  ;;  %2803 = vmatprep.subr.mxu0 %v704_v28  ;;  %v6055_v26 = vadd.f32 %v2066_v5, %v1906_v57  ;;  %v982_v15 = vld [vmem:[#allocation4 + $0x14b8] sm:$0xff]  ;;  %v4699_v28 = vld [vmem:[%s5085_s28 + $0x90] sm:$0xff] }
 0x226   : > { %7298 = vst [vmem:[#allocation24_spill] sm:$0xff] %v6053_v2  ;;  %2964 = vmatprep.subr.mxu1 %v992_v62  ;;  %2553 = vmatprep.mubr.f32.mxu0 %v6058_v17  ;;  %v686_v62 = vld [vmem:[#allocation4 + $0xb78] sm:$0xff] }
 0x227   : > { %7299 = vst [vmem:[#allocation25_spill] sm:$0xff] %v6055_v26  ;;  %2714 = vmatprep.mubr.f32.mxu1 %v4697_v31  ;;  %2804 = vmatpush1.msra.mxu0 %v703_v50  ;;  %v974_v5 = vld [vmem:[#allocation4 + $0x1478] sm:$0xff]  ;;  %v685_v50 = vld [vmem:[#allocation4 + $0xb70] sm:$0xff] }
 0x228   : > { %2965 = vmatpush1.msra.mxu1 %v991_v30  ;;  %2554 = vmatmul.mubr.f32.gmra.mxu0 %v6063_v13  ;;  %v1911_v57 = vpop.f32.mrf.mxu0  ;;  %v973_v30 = vld [vmem:[#allocation4 + $0x1470] sm:$0xff] }
 0x229   : > { %2715 = vmatmul.mubr.f32.gmra.mxu1 %v4699_v28  ;;  %v2072_v26 = vpop.f32.mrf.mxu1  ;;  %2805 = vmatprep.subr.mxu0 %v695_v19  ;;  %v1912_v31 = vadd.f32 %v1911_v57, %v5754_v39  ;;  %v4701_v19 = vld [vmem:[%s5085_s28 + $0xc8] sm:$0xff]  ;;  %v677_v39 = vld [vmem:[#allocation4 + $0xb30] sm:$0xff]  ;;  %v6080_v57 = vld [vmem:[%s5085_s28 + $0xe0] sm:$0xff] }
 0x22a   : > { %2966 = vmatprep.subr.mxu1 %v983_v60  ;;  %2806 = vmatpush1.msra.mxu0 %v694_v43  ;;  %v6068_v2 = vpop.f32.mrf.mxu0  ;;  %v965_v60 = vld [vmem:[#allocation4 + $0x1430] sm:$0xff]  ;;  %v676_v43 = vld [vmem:[#allocation4 + $0xb28] sm:$0xff] }
 0x22b   : > { %2967 = vmatpush1.msra.mxu1 %v982_v15  ;;  %7300 = vst [vmem:[#allocation22_spill] sm:$0xff] %v6068_v2  ;;  %v6070_v22 = vpop.f32.mrf.mxu1  ;;  %2807 = vmatprep.subr.mxu0 %v686_v62  ;;  %v6072_v28 = vadd.f32 %v2072_v26, %v1912_v31  ;;  %v964_v15 = vld [vmem:[#allocation4 + $0x1428] sm:$0xff]  ;;  %v4703_v62 = vld [vmem:[%s5085_s28 + $0xc0] sm:$0xff]  ;;  %v6092_v2 = vld [vmem:[%s5085_s28 + $0x118] sm:$0xff] }
 0x22c   : > { %7301 = vst [vmem:[#allocation23_spill] sm:$0xff] %v6070_v22  ;;  %2968 = vmatprep.subr.mxu1 %v974_v5  ;;  %2559 = vmatprep.mubr.f32.mxu0 %v6075_v6  ;;  %v668_v26 = vld [vmem:[#allocation4 + $0xae8] sm:$0xff] }
 0x22d   : > { %7302 = vst [vmem:[#allocation26_spill] sm:$0xff] %v6072_v28  ;;  %2720 = vmatprep.mubr.f32.mxu1 %v4701_v19  ;;  %2808 = vmatpush1.msra.mxu0 %v685_v50  ;;  %v956_v5 = vld [vmem:[#allocation4 + $0x13e8] sm:$0xff]  ;;  %v667_v50 = vld [vmem:[#allocation4 + $0xae0] sm:$0xff] }
 0x22e   : > { %2969 = vmatpush1.msra.mxu1 %v973_v30  ;;  %2560 = vmatmul.mubr.f32.gmra.mxu0 %v6080_v57  ;;  %v1917_v31 = vpop.f32.mrf.mxu0  ;;  %v955_v30 = vld [vmem:[#allocation4 + $0x13e0] sm:$0xff] }
 0x22f   : > { %2721 = vmatmul.mubr.f32.gmra.mxu1 %v4703_v62  ;;  %v2078_v28 = vpop.f32.mrf.mxu1  ;;  %2809 = vmatprep.subr.mxu0 %v677_v39  ;;  %v1918_v19 = vadd.f32 %v1917_v31, %v5766_v47  ;;  %v4705_v39 = vld [vmem:[%s5085_s28 + $0xf8] sm:$0xff]  ;;  %v659_v47 = vld [vmem:[#allocation4 + $0xaa0] sm:$0xff]  ;;  %v6097_v31 = vld [vmem:[%s5085_s28 + $0x110] sm:$0xff] }
 0x230   : > { %2970 = vmatprep.subr.mxu1 %v965_v60  ;;  %2810 = vmatpush1.msra.mxu0 %v676_v43  ;;  %v6085_v22 = vpop.f32.mrf.mxu0  ;;  %v947_v60 = vld [vmem:[#allocation4 + $0x13a0] sm:$0xff]  ;;  %v658_v43 = vld [vmem:[#allocation4 + $0xa98] sm:$0xff] }
 0x231   : > { %2971 = vmatpush1.msra.mxu1 %v964_v15  ;;  %7303 = vst [vmem:[#allocation27_spill] sm:$0xff] %v6085_v22  ;;  %v6087_v37 = vpop.f32.mrf.mxu1  ;;  %2811 = vmatprep.subr.mxu0 %v668_v26  ;;  %v6089_v62 = vadd.f32 %v2078_v28, %v1918_v19  ;;  %v946_v15 = vld [vmem:[#allocation4 + $0x1398] sm:$0xff]  ;;  %v4707_v26 = vld [vmem:[%s5085_s28 + $0xf0] sm:$0xff] }
 0x232   : > { %7304 = vst [vmem:[#allocation28_spill] sm:$0xff] %v6087_v37  ;;  %2972 = vmatprep.subr.mxu1 %v956_v5  ;;  %2565 = vmatprep.mubr.f32.mxu0 %v6092_v2  ;;  %v650_v28 = vld [vmem:[#allocation4 + $0xa58] sm:$0xff] }
 0x233   : > { %7305 = vst [vmem:[#allocation29_spill] sm:$0xff] %v6089_v62  ;;  %2726 = vmatprep.mubr.f32.mxu1 %v4705_v39  ;;  %2812 = vmatpush1.msra.mxu0 %v667_v50  ;;  %v938_v5 = vld [vmem:[#allocation4 + $0x1358] sm:$0xff]  ;;  %v649_v50 = vld [vmem:[#allocation4 + $0xa50] sm:$0xff] }
 0x234   : > { %2973 = vmatpush1.msra.mxu1 %v955_v30  ;;  %2566 = vmatmul.mubr.f32.gmra.mxu0 %v6097_v31  ;;  %v1923_v19 = vpop.f32.mrf.mxu0  ;;  %v937_v30 = vld [vmem:[#allocation4 + $0x1350] sm:$0xff] }
 0x235   : > { %2727 = vmatmul.mubr.f32.gmra.mxu1 %v4707_v26  ;;  %v2084_v62 = vpop.f32.mrf.mxu1  ;;  %2813 = vmatprep.subr.mxu0 %v659_v47  ;;  %v1924_v39 = vadd.f32 %v1923_v19, %v5784_v41  ;;  %v641_v41 = vld [vmem:[#allocation4 + $0xa10] sm:$0xff] }
 0x236   : > { %2974 = vmatprep.subr.mxu1 %v947_v60  ;;  %2814 = vmatpush1.msra.mxu0 %v658_v43  ;;  %v6102_v37 = vpop.f32.mrf.mxu0  ;;  %v929_v47 = vld [vmem:[#allocation4 + $0x1310] sm:$0xff]  ;;  %v640_v60 = vld [vmem:[#allocation4 + $0xa08] sm:$0xff] }
 0x237   : > { %2975 = vmatpush1.msra.mxu1 %v946_v15  ;;  %v6104_v22 = vpop.f32.mrf.mxu1  ;;  %2815 = vmatprep.subr.mxu0 %v650_v28  ;;  %v6106_v26 = vadd.f32 %v2084_v62, %v1924_v39  ;;  %v928_v43 = vld [vmem:[#allocation4 + $0x1308] sm:$0xff]  ;;  %v6114_v15 = vld [vmem:[%s5085_s28 + $0x140] sm:$0xff] }
 0x238   : > { %7306 = vst [vmem:[#allocation32_spill] sm:$0xff] %v6104_v22  ;;  %2976 = vmatprep.subr.mxu1 %v938_v5  ;;  %2571 = vmatprep.mubr.f32.mxu0 %v6109_v4  ;;  %v632_v62 = vld [vmem:[#allocation4 + $0x9c8] sm:$0xff]  ;;  %v631_v39 = vld [vmem:[#allocation4 + $0x9c0] sm:$0xff]  ;;  %v6126_v22 = vld [vmem:[%s5085_s28 + $0x178] sm:$0xff] }
 0x239   : > { %7307 = vst [vmem:[#allocation33_spill] sm:$0xff] %v6106_v26  ;;  %2732 = vmatprep.mubr.f32.mxu1 %v5791_v53  ;;  %2816 = vmatpush1.msra.mxu0 %v649_v50  ;;  %v920_v28 = vld [vmem:[#allocation4 + $0x12c8] sm:$0xff]  ;;  %v919_v50 = vld [vmem:[#allocation4 + $0x12c0] sm:$0xff] }
 0x23a   : > { %2977 = vmatpush1.msra.mxu1 %v937_v30  ;;  %2572 = vmatmul.mubr.f32.gmra.mxu0 %v6114_v15  ;;  %v1929_v5 = vpop.f32.mrf.mxu0 }
 0x23b   : > { %2733 = vmatmul.mubr.f32.gmra.mxu1 %v5797_v48  ;;  %v2090_v19 = vpop.f32.mrf.mxu1  ;;  %2817 = vmatprep.subr.mxu0 %v641_v41  ;;  %v1930_v53 = vadd.f32 %v1929_v5, %v5802_v52  ;;  %v623_v52 = vld [vmem:[#allocation4 + $0x980] sm:$0xff] }
 0x23c   : > { %2978 = vmatprep.subr.mxu1 %v929_v47  ;;  %2818 = vmatpush1.msra.mxu0 %v640_v60  ;;  %v6119_v30 = vpop.f32.mrf.mxu0  ;;  %v911_v41 = vld [vmem:[#allocation4 + $0x1280] sm:$0xff]  ;;  %v622_v47 = vld [vmem:[#allocation4 + $0x978] sm:$0xff] }
 0x23d   : > { %2979 = vmatpush1.msra.mxu1 %v928_v43  ;;  %v6121_v26 = vpop.f32.mrf.mxu1  ;;  %2819 = vmatprep.subr.mxu0 %v632_v62  ;;  %v6123_v48 = vadd.f32 %v2090_v19, %v1930_v53  ;;  %v910_v60 = vld [vmem:[#allocation4 + $0x1278] sm:$0xff]  ;;  %v6131_v43 = vld [vmem:[%s5085_s28 + $0x170] sm:$0xff] }
 0x23e   : > { %7308 = vst [vmem:[#allocation30_spill] sm:$0xff] %v6121_v26  ;;  %2980 = vmatprep.subr.mxu1 %v920_v28  ;;  %2577 = vmatprep.mubr.f32.mxu0 %v6126_v22  ;;  %v614_v62 = vld [vmem:[#allocation4 + $0x938] sm:$0xff]  ;;  %v613_v53 = vld [vmem:[#allocation4 + $0x930] sm:$0xff]  ;;  %v6143_v26 = vld [vmem:[%s5085_s28 + $0x1a8] sm:$0xff] }
 0x23f   : > { %7309 = vst [vmem:[#allocation31_spill] sm:$0xff] %v6123_v48  ;;  %2738 = vmatprep.mubr.f32.mxu1 %v5808_v35  ;;  %2820 = vmatpush1.msra.mxu0 %v631_v39  ;;  %v902_v28 = vld [vmem:[#allocation4 + $0x1238] sm:$0xff]  ;;  %v901_v39 = vld [vmem:[#allocation4 + $0x1230] sm:$0xff] }
 0x240   : > { %2981 = vmatpush1.msra.mxu1 %v919_v50  ;;  %2578 = vmatmul.mubr.f32.gmra.mxu0 %v6131_v43  ;;  %v1935_v5 = vpop.f32.mrf.mxu0 }
 0x241   : > { %2739 = vmatmul.mubr.f32.gmra.mxu1 %v5820_v21  ;;  %v2096_v19 = vpop.f32.mrf.mxu1  ;;  %2821 = vmatprep.subr.mxu0 %v623_v52  ;;  %v1936_v35 = vadd.f32 %v1935_v5, %v5826_v8  ;;  %v893_v8 = vld [vmem:[#allocation4 + $0x11f0] sm:$0xff] }
 0x242   : > { %2982 = vmatprep.subr.mxu1 %v911_v41  ;;  %2822 = vmatpush1.msra.mxu0 %v622_v47  ;;  %v6136_v50 = vpop.f32.mrf.mxu0  ;;  %v1181_v52 = vld [vmem:[#allocation4 + $0x1af0] sm:$0xff]  ;;  %v892_v41 = vld [vmem:[#allocation4 + $0x11e8] sm:$0xff] }
 0x243   : > { %2983 = vmatpush1.msra.mxu1 %v910_v60  ;;  %v6138_v48 = vpop.f32.mrf.mxu1  ;;  %2823 = vmatprep.subr.mxu0 %v614_v62  ;;  %v6140_v21 = vadd.f32 %v2096_v19, %v1936_v35  ;;  %v1180_v47 = vld [vmem:[#allocation4 + $0x1ae8] sm:$0xff]  ;;  %v6148_v60 = vld [vmem:[%s5085_s28 + $0x1a0] sm:$0xff] }
 0x244   : > { %7310 = vst [vmem:[#allocation34_spill] sm:$0xff] %v6138_v48  ;;  %2984 = vmatprep.subr.mxu1 %v902_v28  ;;  %2583 = vmatprep.mubr.f32.mxu0 %v6143_v26  ;;  %v884_v62 = vld [vmem:[#allocation4 + $0x11a8] sm:$0xff]  ;;  %v883_v35 = vld [vmem:[#allocation4 + $0x11a0] sm:$0xff]  ;;  %v6160_v48 = vld [vmem:[%s5085_s28 + $0x1d8] sm:$0xff] }
 0x245   : > { %7311 = vst [vmem:[#allocation35_spill] sm:$0xff] %v6140_v21  ;;  %2744 = vmatprep.mubr.f32.mxu1 %v5833_v45  ;;  %2824 = vmatpush1.msra.mxu0 %v613_v53  ;;  %v1172_v28 = vld [vmem:[#allocation4 + $0x1aa8] sm:$0xff]  ;;  %v1171_v53 = vld [vmem:[#allocation4 + $0x1aa0] sm:$0xff] }
 0x246   : > { %2985 = vmatpush1.msra.mxu1 %v901_v39  ;;  %2584 = vmatmul.mubr.f32.gmra.mxu0 %v6148_v60  ;;  %v1941_v5 = vpop.f32.mrf.mxu0 }
 0x247   : > { %2745 = vmatmul.mubr.f32.gmra.mxu1 %v5839_v61  ;;  %v2102_v19 = vpop.f32.mrf.mxu1  ;;  %2825 = vmatprep.subr.mxu0 %v893_v8  ;;  %v1942_v45 = vadd.f32 %v1941_v5, %v5844_v33  ;;  %v875_v33 = vld [vmem:[#allocation4 + $0x1160] sm:$0xff] }
 0x248   : > { %2986 = vmatprep.subr.mxu1 %v1181_v52  ;;  %2826 = vmatpush2.msra.mxu0 %v892_v41  ;;  %v6153_v39 = vpop.f32.mrf.mxu0  ;;  %v1163_v8 = vld [vmem:[#allocation4 + $0x1a60] sm:$0xff]  ;;  %v874_v52 = vld [vmem:[#allocation4 + $0x1158] sm:$0xff] }
 0x249   : > { %2987 = vmatpush2.msra.mxu1 %v1180_v47  ;;  %v6155_v21 = vpop.f32.mrf.mxu1  ;;  %2827 = vmatprep.subr.mxu0 %v884_v62  ;;  %v6157_v61 = vadd.f32 %v2102_v19, %v1942_v45  ;;  %v1162_v41 = vld [vmem:[#allocation4 + $0x1a58] sm:$0xff]  ;;  %v6165_v47 = vld [vmem:[%s5085_s28 + $0x1d0] sm:$0xff] }
 0x24a   : > { %7312 = vst [vmem:[#allocation36_spill] sm:$0xff] %v6155_v21  ;;  %2988 = vmatprep.subr.mxu1 %v1172_v28  ;;  %2589 = vmatprep.mubr.f32.mxu0 %v6160_v48  ;;  %v866_v62 = vld [vmem:[#allocation4 + $0x1118] sm:$0xff]  ;;  %v865_v45 = vld [vmem:[#allocation4 + $0x1110] sm:$0xff]  ;;  %v6177_v21 = vld [vmem:[%s5085_s28 + $0x208] sm:$0xff] }
 0x24b   : > { %7313 = vst [vmem:[#allocation37_spill] sm:$0xff] %v6157_v61  ;;  %2750 = vmatprep.mubr.f32.mxu1 %v5850_v46  ;;  %2828 = vmatpush2.msra.mxu0 %v883_v35  ;;  %v1154_v28 = vld [vmem:[#allocation4 + $0x1a18] sm:$0xff]  ;;  %v1153_v35 = vld [vmem:[#allocation4 + $0x1a10] sm:$0xff] }
 0x24c   : > { %2989 = vmatpush2.msra.mxu1 %v1171_v53  ;;  %2590 = vmatmul.mubr.f32.gmra.mxu0 %v6165_v47  ;;  %v1947_v5 = vpop.f32.mrf.mxu0 }
 0x24d   : > { %2751 = vmatmul.mubr.f32.gmra.mxu1 %v5862_v24  ;;  %v2108_v19 = vpop.f32.mrf.mxu1  ;;  %2829 = vmatprep.subr.mxu0 %v875_v33  ;;  %v1948_v46 = vadd.f32 %v1947_v5, %v5868_v20  ;;  %v857_v20 = vld [vmem:[#allocation4 + $0x10d0] sm:$0xff] }
 0x24e   : > { %2990 = vmatprep.subr.mxu1 %v1163_v8  ;;  %2830 = vmatpush2.msra.mxu0 %v874_v52  ;;  %v6170_v53 = vpop.f32.mrf.mxu0  ;;  %v1145_v33 = vld [vmem:[#allocation4 + $0x19d0] sm:$0xff]  ;;  %v856_v8 = vld [vmem:[#allocation4 + $0x10c8] sm:$0xff] }
 0x24f   : > { %2991 = vmatpush2.msra.mxu1 %v1162_v41  ;;  %v6172_v61 = vpop.f32.mrf.mxu1  ;;  %2831 = vmatprep.subr.mxu0 %v866_v62  ;;  %v6174_v24 = vadd.f32 %v2108_v19, %v1948_v46  ;;  %v1144_v52 = vld [vmem:[#allocation4 + $0x19c8] sm:$0xff]  ;;  %v6182_v41 = vld [vmem:[%s5085_s28 + $0x200] sm:$0xff] }
 0x250   : > { %7314 = vst [vmem:[#allocation40_spill] sm:$0xff] %v6172_v61  ;;  %2992 = vmatprep.subr.mxu1 %v1154_v28  ;;  %2595 = vmatprep.mubr.f32.mxu0 %v6177_v21  ;;  %v848_v62 = vld [vmem:[#allocation4 + $0x1088] sm:$0xff]  ;;  %v847_v46 = vld [vmem:[#allocation4 + $0x1080] sm:$0xff]  ;;  %v6194_v61 = vld [vmem:[%s5085_s28 + $0x238] sm:$0xff] }
 0x251   : > { %7315 = vst [vmem:[#allocation41_spill] sm:$0xff] %v6174_v24  ;;  %2756 = vmatprep.mubr.f32.mxu1 %v5875_v59  ;;  %2832 = vmatpush2.msra.mxu0 %v865_v45  ;;  %v1136_v28 = vld [vmem:[#allocation4 + $0x1988] sm:$0xff]  ;;  %v1135_v45 = vld [vmem:[#allocation4 + $0x1980] sm:$0xff] }
 0x252   : > { %2993 = vmatpush2.msra.mxu1 %v1153_v35  ;;  %2596 = vmatmul.mubr.f32.gmra.mxu0 %v6182_v41  ;;  %v1953_v5 = vpop.f32.mrf.mxu0 }
 0x253   : > { %2757 = vmatmul.mubr.f32.gmra.mxu1 %v5881_v55  ;;  %v2114_v19 = vpop.f32.mrf.mxu1  ;;  %2833 = vmatprep.subr.mxu0 %v857_v20  ;;  %v1954_v59 = vadd.f32 %v1953_v5, %v5886_v10  ;;  %v839_v10 = vld [vmem:[#allocation4 + $0x1040] sm:$0xff] }
 0x254   : > { %2994 = vmatprep.subr.mxu1 %v1145_v33  ;;  %2834 = vmatpush2.msra.mxu0 %v856_v8  ;;  %v6187_v35 = vpop.f32.mrf.mxu0  ;;  %v1127_v20 = vld [vmem:[#allocation4 + $0x1940] sm:$0xff]  ;;  %v838_v33 = vld [vmem:[#allocation4 + $0x1038] sm:$0xff] }
 0x255   : > { %2995 = vmatpush2.msra.mxu1 %v1144_v52  ;;  %7316 = vst [vmem:[#allocation42_spill] sm:$0xff] %v6187_v35  ;;  %v6189_v24 = vpop.f32.mrf.mxu1  ;;  %2835 = vmatprep.subr.mxu0 %v848_v62  ;;  %v6191_v55 = vadd.f32 %v2114_v19, %v1954_v59  ;;  %v1126_v8 = vld [vmem:[#allocation4 + $0x1938] sm:$0xff]  ;;  %v6199_v52 = vld [vmem:[%s5085_s28 + $0x230] sm:$0xff]  ;;  %v6417_v35 = vld [vmem:[%s5085_s28 + $0x1c8] sm:$0xff] }
 0x256   : > { %7317 = vst [vmem:[#allocation38_spill] sm:$0xff] %v6189_v24  ;;  %2996 = vmatprep.subr.mxu1 %v1136_v28  ;;  %2601 = vmatprep.mubr.f32.mxu0 %v6194_v61  ;;  %v830_v62 = vld [vmem:[#allocation4 + $0xff8] sm:$0xff]  ;;  %v829_v59 = vld [vmem:[#allocation4 + $0xff0] sm:$0xff]  ;;  %v6211_v24 = vld [vmem:[%s5085_s28 + $0x268] sm:$0xff] }
 0x257   : > { %7318 = vst [vmem:[#allocation39_spill] sm:$0xff] %v6191_v55  ;;  %2762 = vmatprep.mubr.f32.mxu1 %v5892_v1  ;;  %2836 = vmatpush2.msra.mxu0 %v847_v46  ;;  %v1118_v28 = vld [vmem:[#allocation4 + $0x18f8] sm:$0xff]  ;;  %v1117_v46 = vld [vmem:[#allocation4 + $0x18f0] sm:$0xff] }
 0x258   : > { %2997 = vmatpush2.msra.mxu1 %v1135_v45  ;;  %2602 = vmatmul.mubr.f32.gmra.mxu0 %v6199_v52  ;;  %v1959_v5 = vpop.f32.mrf.mxu0 }
 0x259   : > { %2763 = vmatmul.mubr.f32.gmra.mxu1 %v5904_v34  ;;  %v2120_v19 = vpop.f32.mrf.mxu1  ;;  %2837 = vmatprep.subr.mxu0 %v839_v10  ;;  %v1960_v1 = vadd.f32 %v1959_v5, %v5910_v27  ;;  %v821_v27 = vld [vmem:[#allocation4 + $0xfb0] sm:$0xff] }
 0x25a   : > { %2998 = vmatprep.subr.mxu1 %v1127_v20  ;;  %2838 = vmatpush2.msra.mxu0 %v838_v33  ;;  %v6204_v45 = vpop.f32.mrf.mxu0  ;;  %v1109_v10 = vld [vmem:[#allocation4 + $0x18b0] sm:$0xff]  ;;  %v820_v20 = vld [vmem:[#allocation4 + $0xfa8] sm:$0xff] }
 0x25b   : > { %2999 = vmatpush2.msra.mxu1 %v1126_v8  ;;  %7319 = vst [vmem:[#allocation43_spill] sm:$0xff] %v6204_v45  ;;  %v6206_v55 = vpop.f32.mrf.mxu1  ;;  %2839 = vmatprep.subr.mxu0 %v830_v62  ;;  %v6208_v34 = vadd.f32 %v2120_v19, %v1960_v1  ;;  %v1108_v33 = vld [vmem:[#allocation4 + $0x18a8] sm:$0xff]  ;;  %v6216_v8 = vld [vmem:[%s5085_s28 + $0x260] sm:$0xff] }
 0x25c   : > { %7320 = vst [vmem:[#allocation44_spill] sm:$0xff] %v6206_v55  ;;  %3000 = vmatprep.subr.mxu1 %v1118_v28  ;;  %2607 = vmatprep.mubr.f32.mxu0 %v6211_v24  ;;  %v812_v62 = vld [vmem:[#allocation4 + $0xf68] sm:$0xff]  ;;  %v811_v1 = vld [vmem:[#allocation4 + $0xf60] sm:$0xff]  ;;  %v6228_v55 = vld [vmem:[%s5085_s28 + $0x298] sm:$0xff] }
 0x25d   : > { %7321 = vst [vmem:[#allocation45_spill] sm:$0xff] %v6208_v34  ;;  %2768 = vmatprep.mubr.f32.mxu1 %v5917_v40  ;;  %2840 = vmatpush2.msra.mxu0 %v829_v59  ;;  %v1100_v28 = vld [vmem:[#allocation4 + $0x1868] sm:$0xff]  ;;  %v1099_v59 = vld [vmem:[#allocation4 + $0x1860] sm:$0xff] }
 0x25e   : > { %3001 = vmatpush2.msra.mxu1 %v1117_v46  ;;  %2608 = vmatmul.mubr.f32.gmra.mxu0 %v6216_v8  ;;  %v1965_v5 = vpop.f32.mrf.mxu0  ;;  %v6422_v45 = vld [vmem:[%s5085_s28 + $0x1c0] sm:$0xff] }
 0x25f   : > { %2769 = vmatmul.mubr.f32.gmra.mxu1 %v5923_v36  ;;  %v2126_v19 = vpop.f32.mrf.mxu1  ;;  %2841 = vmatprep.subr.mxu0 %v821_v27  ;;  %v1966_v40 = vadd.f32 %v1965_v5, %v5928_v14  ;;  %v803_v14 = vld [vmem:[#allocation4 + $0xf20] sm:$0xff]  ;;  %7346 = vst [vmem:[#allocation74_spill] sm:$0xff] %v6422_v45 }
 0x260   : > { %3002 = vmatprep.subr.mxu1 %v1109_v10  ;;  %2842 = vmatpush2.msra.mxu0 %v820_v20  ;;  %v6221_v46 = vpop.f32.mrf.mxu0  ;;  %v1091_v27 = vld [vmem:[#allocation4 + $0x1820] sm:$0xff]  ;;  %v802_v10 = vld [vmem:[#allocation4 + $0xf18] sm:$0xff] }
 0x261   : > { %3003 = vmatpush2.msra.mxu1 %v1108_v33  ;;  %7322 = vst [vmem:[#allocation46_spill] sm:$0xff] %v6221_v46  ;;  %v6223_v34 = vpop.f32.mrf.mxu1  ;;  %2843 = vmatprep.subr.mxu0 %v812_v62  ;;  %v6225_v36 = vadd.f32 %v2126_v19, %v1966_v40  ;;  %v1090_v20 = vld [vmem:[#allocation4 + $0x1818] sm:$0xff]  ;;  %v6233_v33 = vld [vmem:[%s5085_s28 + $0x290] sm:$0xff]  ;;  %v6394_v46 = vld [vmem:[%s5085_s28 + $0x160] sm:$0xff] }
 0x262   : > { %7323 = vst [vmem:[#allocation47_spill] sm:$0xff] %v6223_v34  ;;  %3004 = vmatprep.subr.mxu1 %v1100_v28  ;;  %2613 = vmatprep.mubr.f32.mxu0 %v6228_v55  ;;  %v794_v62 = vld [vmem:[#allocation4 + $0xed8] sm:$0xff]  ;;  %v793_v40 = vld [vmem:[#allocation4 + $0xed0] sm:$0xff]  ;;  %v6245_v34 = vld [vmem:[%s5085_s28 + $0x2c8] sm:$0xff] }
 0x263   : > { %7324 = vst [vmem:[#allocation48_spill] sm:$0xff] %v6225_v36  ;;  %2774 = vmatprep.mubr.f32.mxu1 %v5934_v16  ;;  %2844 = vmatpush2.msra.mxu0 %v811_v1  ;;  %v1082_v28 = vld [vmem:[#allocation4 + $0x17d8] sm:$0xff]  ;;  %v1081_v1 = vld [vmem:[#allocation4 + $0x17d0] sm:$0xff] }
 0x264   : > { %3005 = vmatpush2.msra.mxu1 %v1099_v59  ;;  %2614 = vmatmul.mubr.f32.gmra.mxu0 %v6233_v33  ;;  %v1971_v5 = vpop.f32.mrf.mxu0 }
 0x265   : > { %2775 = vmatmul.mubr.f32.gmra.mxu1 %v5946_v7  ;;  %v2132_v19 = vpop.f32.mrf.mxu1  ;;  %2845 = vmatprep.subr.mxu0 %v803_v14  ;;  %v1972_v16 = vadd.f32 %v1971_v5, %v5952_v51  ;;  %v785_v51 = vld [vmem:[#allocation4 + $0xe90] sm:$0xff] }
 0x266   : > { %3006 = vmatprep.subr.mxu1 %v1091_v27  ;;  %2846 = vmatpush2.msra.mxu0 %v802_v10  ;;  %v6238_v59 = vpop.f32.mrf.mxu0  ;;  %v1073_v14 = vld [vmem:[#allocation4 + $0x1790] sm:$0xff]  ;;  %v784_v27 = vld [vmem:[#allocation4 + $0xe88] sm:$0xff] }
 0x267   : > { %3007 = vmatpush2.msra.mxu1 %v1090_v20  ;;  %7325 = vst [vmem:[#allocation53_spill] sm:$0xff] %v6238_v59  ;;  %v6240_v36 = vpop.f32.mrf.mxu1  ;;  %2847 = vmatprep.subr.mxu0 %v794_v62  ;;  %v6242_v7 = vadd.f32 %v2132_v19, %v1972_v16  ;;  %v1072_v10 = vld [vmem:[#allocation4 + $0x1788] sm:$0xff]  ;;  %v6250_v20 = vld [vmem:[%s5085_s28 + $0x2c0] sm:$0xff]  ;;  %v6408_v59 = vld [vmem:[%s5085_s28 + $0x190] sm:$0xff] }
 0x268   : > { %7326 = vst [vmem:[#allocation54_spill] sm:$0xff] %v6240_v36  ;;  %3008 = vmatprep.subr.mxu1 %v1082_v28  ;;  %2619 = vmatprep.mubr.f32.mxu0 %v6245_v34  ;;  %v776_v62 = vld [vmem:[#allocation4 + $0xe48] sm:$0xff]  ;;  %v775_v16 = vld [vmem:[#allocation4 + $0xe40] sm:$0xff]  ;;  %v6262_v36 = vld [vmem:[%s5085_s28 + $0x2f8] sm:$0xff] }
 0x269   : > { %7327 = vst [vmem:[#allocation55_spill] sm:$0xff] %v6242_v7  ;;  %2780 = vmatprep.mubr.f32.mxu1 %v5959_v29  ;;  %2848 = vmatpush2.msra.mxu0 %v793_v40  ;;  %v1064_v28 = vld [vmem:[#allocation4 + $0x1748] sm:$0xff]  ;;  %v1063_v40 = vld [vmem:[#allocation4 + $0x1740] sm:$0xff] }
 0x26a   : > { %3009 = vmatpush2.msra.mxu1 %v1081_v1  ;;  %2620 = vmatmul.mubr.f32.gmra.mxu0 %v6250_v20  ;;  %v1977_v5 = vpop.f32.mrf.mxu0 }
 0x26b   : > { %2781 = vmatmul.mubr.f32.gmra.mxu1 %v5965_v11  ;;  %v2138_v19 = vpop.f32.mrf.mxu1  ;;  %2849 = vmatprep.subr.mxu0 %v785_v51  ;;  %v1978_v29 = vadd.f32 %v1977_v5, %v5970_v25  ;;  %v767_v25 = vld [vmem:[#allocation4 + $0xe00] sm:$0xff] }
 0x26c   : > { %3010 = vmatprep.subr.mxu1 %v1073_v14  ;;  %2850 = vmatpush2.msra.mxu0 %v784_v27  ;;  %v6255_v1 = vpop.f32.mrf.mxu0  ;;  %v1055_v51 = vld [vmem:[#allocation4 + $0x1700] sm:$0xff]  ;;  %v766_v14 = vld [vmem:[#allocation4 + $0xdf8] sm:$0xff] }
 0x26d   : > { %3011 = vmatpush2.msra.mxu1 %v1072_v10  ;;  %7328 = vst [vmem:[#allocation56_spill] sm:$0xff] %v6255_v1  ;;  %v6257_v7 = vpop.f32.mrf.mxu1  ;;  %2851 = vmatprep.subr.mxu0 %v776_v62  ;;  %v6259_v11 = vadd.f32 %v2138_v19, %v1978_v29  ;;  %v1054_v27 = vld [vmem:[#allocation4 + $0x16f8] sm:$0xff]  ;;  %v6267_v10 = vld [vmem:[%s5085_s28 + $0x2f0] sm:$0xff] }
 0x26e   : > { %7329 = vst [vmem:[#allocation57_spill] sm:$0xff] %v6257_v7  ;;  %3012 = vmatprep.subr.mxu1 %v1064_v28  ;;  %2625 = vmatprep.mubr.f32.mxu0 %v6262_v36  ;;  %v758_v62 = vld [vmem:[#allocation4 + $0xdb8] sm:$0xff] }
 0x26f   : > { %7330 = vst [vmem:[#allocation58_spill] sm:$0xff] %v6259_v11  ;;  %2786 = vmatprep.mubr.f32.mxu1 %v5976_v44  ;;  %2852 = vmatpush2.msra.mxu0 %v775_v16  ;;  %v1046_v28 = vld [vmem:[#allocation4 + $0x16b8] sm:$0xff]  ;;  %v757_v44 = vld [vmem:[#allocation4 + $0xdb0] sm:$0xff] }
 0x270   : > { %3013 = vmatpush2.msra.mxu1 %v1063_v40  ;;  %2626 = vmatmul.mubr.f32.gmra.mxu0 %v6267_v10  ;;  %v1983_v5 = vpop.f32.mrf.mxu0  ;;  %v1045_v16 = vld [vmem:[#allocation4 + $0x16b0] sm:$0xff]  ;;  %v6279_v7 = vld [vmem:[%s5085_s28 + $0x18] sm:$0xff] }
 0x271   : > { %2787 = vmatmul.mubr.f32.gmra.mxu1 %v5988_v0  ;;  %v2144_v19 = vpop.f32.mrf.mxu1  ;;  %2853 = vmatprep.subr.mxu0 %v767_v25  ;;  %v1984_v29 = vadd.f32 %v1983_v5, %v5994_v63  ;;  %v606_v25 = vld [vmem:[#allocation4 + $0x8f8] sm:$0xff] }
 0x272   : > { %3014 = vmatprep.subr.mxu1 %v1055_v51  ;;  %2854 = vmatpush2.msra.mxu0 %v766_v14  ;;  %v6272_v40 = vpop.f32.mrf.mxu0  ;;  %v462_v63 = vld [vmem:[#allocation4 + $0x478] sm:$0xff]  ;;  %v6284_v51 = vld [vmem:[%s5085_s28 + $0x10] sm:$0xff] }
 0x273   : > { %3015 = vmatpush2.msra.mxu1 %v1054_v27  ;;  %7331 = vst [vmem:[#allocation59_spill] sm:$0xff] %v6272_v40  ;;  %v6274_v11 = vpop.f32.mrf.mxu1  ;;  %2855 = vmatprep.subr.mxu0 %v758_v62  ;;  %v6276_v0 = vadd.f32 %v2144_v19, %v1984_v29  ;;  %v6293_v62 = vld [vmem:[%s5085_s28 + $0x48] sm:$0xff]  ;;  %v6302_v19 = vld [vmem:[%s5085_s28 + $0x40] sm:$0xff]  ;;  %v6371_v1 = vld [vmem:[%s5085_s28 + $0x138] sm:$0xff] }
 0x274   : > { %7332 = vst [vmem:[#allocation60_spill] sm:$0xff] %v6274_v11  ;;  %3016 = vmatprep.subr.mxu1 %v1046_v28  ;;  %2856 = vmatpush2.msra.mxu0 %v757_v44  ;;  %v6307_v44 = vld [vmem:[%s5085_s28 + $0x78] sm:$0xff]  ;;  %v588_v29 = vld [vmem:[#allocation4 + $0x868] sm:$0xff]  ;;  %v6362_v11 = vld [vmem:[%s5085_s28 + $0x100] sm:$0xff] }
 0x275   : > { %7333 = vst [vmem:[#allocation61_spill] sm:$0xff] %v6276_v0  ;;  %2857 = vmatprep.mubr.f32.mxu0 %v6279_v7  ;;  %3017 = vmatpush2.msra.mxu1 %v1045_v16  ;;  %v6348_v0 = vld [vmem:[%s5085_s28 + $0xd0] sm:$0xff] }
 0x276   : > { %3018 = vmatprep.mubr.f32.mxu1 %v6001_v18  ;;  %2858 = vmatmul.mubr.f32.vlgmr.msra.gmra.mxu0 %v6284_v51  ;;  %v6288_v14 = vpop.f32.mrf.mxu0  ;;  %v597_v18 = vld [vmem:[#allocation4 + $0x8b0] sm:$0xff] }
 0x277   : > { %3019 = vmatmul.mubr.f32.vlgmr.msra.gmra.mxu1 %v6007_v58  ;;  %v6290_v27 = vpop.f32.mrf.mxu1  ;;  %4515 = vmatprep.subr.mxu1 %v606_v25  ;;  %v453_v58 = vld [vmem:[#allocation4 + $0x430] sm:$0xff] }
 0x278   : > { %4275 = vmatprep.subr.mxu0 %v606_v25  ;;  %4531 = vmatpush3.msra.mxu1 %v462_v63  ;;  %v6296_v28 = vpop.f32.mrf.mxu0  ;;  %v444_v25 = vld [vmem:[#allocation4 + $0x3e8] sm:$0xff]  ;;  %v6376_v40 = vld [vmem:[%s5085_s28 + $0x130] sm:$0xff] }
 0x279   : > { %2863 = vmatprep.mubr.f32.mxu0 %v6293_v62  ;;  %7334 = vst [vmem:[#allocation62_spill] sm:$0xff] %v6296_v28  ;;  %v6298_v5 = vpop.f32.mrf.mxu1  ;;  %3024 = vmatprep.mubr.f32.mxu1 %v6021_v56  ;;  %v6330_v28 = vld [vmem:[%s5085_s28 + $0xa0] sm:$0xff] }
 0x27a   : > { %7335 = vst [vmem:[#allocation63_spill] sm:$0xff] %v6298_v5  ;;  %4276 = vmatpush3.msra.mxu0 %v462_v63  ;;  %4516 = vmatprep.subr.mxu1 %v597_v18  ;;  %v6316_v63 = vld [vmem:[%s5085_s28 + $0x70] sm:$0xff]  ;;  %v6325_v5 = vld [vmem:[%s5085_s28 + $0xa8] sm:$0xff] }
 0x27b   : > { %2864 = vmatmul.mubr.f32.gmra.mxu0 %v6302_v19  ;;  %3025 = vmatmul.mubr.f32.gmra.mxu1 %v6027_v42 }
 0x27c   : > { %4277 = vmatprep.subr.mxu0 %v597_v18  ;;  %4532 = vmatpush3.msra.mxu1 %v453_v58  ;;  %v6310_v16 = vpop.f32.mrf.mxu0 }
 0x27d   : > { %2869 = vmatprep.mubr.f32.mxu0 %v6307_v44  ;;  %v6312_v56 = vpop.f32.mrf.mxu1  ;;  %3030 = vmatprep.mubr.f32.mxu1 %v6041_v54  ;;  %v579_v54 = vld [vmem:[#allocation4 + $0x820] sm:$0xff] }
 0x27e   : > { %4278 = vmatpush3.msra.mxu0 %v453_v58  ;;  %v6320_v42 = vpop.f32.mrf.mxu0  ;;  %4517 = vmatprep.subr.mxu1 %v588_v29  ;;  %v435_v58 = vld [vmem:[#allocation4 + $0x3a0] sm:$0xff] }
 0x27f   : > { %2870 = vmatmul.mubr.f32.gmra.mxu0 %v6316_v63  ;;  %3031 = vmatmul.mubr.f32.gmra.mxu1 %v6046_v23  ;;  %7336 = vst [vmem:[#allocation64_spill] sm:$0xff] %v6320_v42  ;;  %v6322_v18 = vpop.f32.mrf.mxu1 }
 0x280   : > { %7337 = vst [vmem:[#allocation65_spill] sm:$0xff] %v6322_v18  ;;  %4279 = vmatprep.subr.mxu0 %v588_v29  ;;  %4533 = vmatpush3.msra.mxu1 %v444_v25  ;;  %v6339_v18 = vld [vmem:[%s5085_s28 + $0xd8] sm:$0xff] }
 0x281   : > { %2875 = vmatprep.mubr.f32.mxu0 %v6325_v5  ;;  %3036 = vmatprep.mubr.f32.mxu1 %v6058_v17  ;;  %v570_v17 = vld [vmem:[#allocation4 + $0x7d8] sm:$0xff] }
 0x282   : > { %4280 = vmatpush3.msra.mxu0 %v444_v25  ;;  %v6334_v23 = vpop.f32.mrf.mxu0  ;;  %4518 = vmatprep.subr.mxu1 %v579_v54 }
 0x283   : > { %2876 = vmatmul.mubr.f32.gmra.mxu0 %v6330_v28  ;;  %3037 = vmatmul.mubr.f32.gmra.mxu1 %v6063_v13  ;;  %v6336_v29 = vpop.f32.mrf.mxu1  ;;  %v426_v13 = vld [vmem:[#allocation4 + $0x358] sm:$0xff] }
 0x284   : > { %4281 = vmatprep.subr.mxu0 %v579_v54  ;;  %4534 = vmatpush3.msra.mxu1 %v435_v58  ;;  %v6342_v25 = vpop.f32.mrf.mxu0  ;;  %v6353_v54 = vld [vmem:[%s5085_s28 + $0x108] sm:$0xff] }
 0x285   : > { %2881 = vmatprep.mubr.f32.mxu0 %v6339_v18  ;;  %7338 = vst [vmem:[#allocation66_spill] sm:$0xff] %v6342_v25  ;;  %v6344_v42 = vpop.f32.mrf.mxu1  ;;  %3042 = vmatprep.mubr.f32.mxu1 %v6075_v6 }
 0x286   : > { %7339 = vst [vmem:[#allocation67_spill] sm:$0xff] %v6344_v42  ;;  %4282 = vmatpush3.msra.mxu0 %v435_v58  ;;  %4519 = vmatprep.subr.mxu1 %v570_v17  ;;  %v561_v42 = vld [vmem:[#allocation4 + $0x790] sm:$0xff] }
 0x287   : > { %2882 = vmatmul.mubr.f32.gmra.mxu0 %v6348_v0  ;;  %3043 = vmatmul.mubr.f32.gmra.mxu1 %v6080_v57  ;;  %v417_v58 = vld [vmem:[#allocation4 + $0x310] sm:$0xff] }
 0x288   : > { %4283 = vmatprep.subr.mxu0 %v570_v17  ;;  %4535 = vmatpush3.msra.mxu1 %v426_v13  ;;  %v6356_v25 = vpop.f32.mrf.mxu0 }
 0x289   : > { %2887 = vmatprep.mubr.f32.mxu0 %v6353_v54  ;;  %v6358_v6 = vpop.f32.mrf.mxu1  ;;  %3048 = vmatprep.mubr.f32.mxu1 %v6092_v2  ;;  %v552_v2 = vld [vmem:[#allocation4 + $0x748] sm:$0xff] }
 0x28a   : > { %4284 = vmatpush3.msra.mxu0 %v426_v13  ;;  %v6366_v57 = vpop.f32.mrf.mxu0  ;;  %4520 = vmatprep.subr.mxu1 %v561_v42  ;;  %v408_v13 = vld [vmem:[#allocation4 + $0x2c8] sm:$0xff] }
 0x28b   : > { %2888 = vmatmul.mubr.f32.gmra.mxu0 %v6362_v11  ;;  %3049 = vmatmul.mubr.f32.gmra.mxu1 %v6097_v31  ;;  %7340 = vst [vmem:[#allocation68_spill] sm:$0xff] %v6366_v57  ;;  %v6368_v17 = vpop.f32.mrf.mxu1 }
 0x28c   : > { %7341 = vst [vmem:[#allocation69_spill] sm:$0xff] %v6368_v17  ;;  %4285 = vmatprep.subr.mxu0 %v561_v42  ;;  %4536 = vmatpush3.msra.mxu1 %v417_v58  ;;  %v6385_v17 = vld [vmem:[%s5085_s28 + $0x168] sm:$0xff] }
 0x28d   : > { %2893 = vmatprep.mubr.f32.mxu0 %v6371_v1  ;;  %3054 = vmatprep.mubr.f32.mxu1 %v6109_v4  ;;  %v543_v4 = vld [vmem:[#allocation4 + $0x700] sm:$0xff] }
 0x28e   : > { %4286 = vmatpush3.msra.mxu0 %v417_v58  ;;  %v6380_v31 = vpop.f32.mrf.mxu0  ;;  %4521 = vmatprep.subr.mxu1 %v552_v2 }
 0x28f   : > { %2894 = vmatmul.mubr.f32.gmra.mxu0 %v6376_v40  ;;  %3055 = vmatmul.mubr.f32.gmra.mxu1 %v6114_v15  ;;  %v6382_v42 = vpop.f32.mrf.mxu1  ;;  %v399_v15 = vld [vmem:[#allocation4 + $0x280] sm:$0xff] }
 0x290   : > { %4287 = vmatprep.subr.mxu0 %v552_v2  ;;  %4537 = vmatpush3.msra.mxu1 %v408_v13  ;;  %v6388_v58 = vpop.f32.mrf.mxu0  ;;  %v6399_v2 = vld [vmem:[%s5085_s28 + $0x198] sm:$0xff] }
 0x291   : > { %2899 = vmatprep.mubr.f32.mxu0 %v6385_v17  ;;  %7342 = vst [vmem:[#allocation70_spill] sm:$0xff] %v6388_v58  ;;  %v6390_v57 = vpop.f32.mrf.mxu1  ;;  %3060 = vmatprep.mubr.f32.mxu1 %v6126_v22 }
 0x292   : > { %7343 = vst [vmem:[#allocation71_spill] sm:$0xff] %v6390_v57  ;;  %4288 = vmatpush3.msra.mxu0 %v408_v13  ;;  %4522 = vmatprep.subr.mxu1 %v543_v4  ;;  %v534_v57 = vld [vmem:[#allocation4 + $0x6b8] sm:$0xff] }
 0x293   : > { %2900 = vmatmul.mubr.f32.gmra.mxu0 %v6394_v46  ;;  %3061 = vmatmul.mubr.f32.gmra.mxu1 %v6131_v43  ;;  %v390_v13 = vld [vmem:[#allocation4 + $0x238] sm:$0xff] }
 0x294   : > { %4289 = vmatprep.subr.mxu0 %v543_v4  ;;  %4538 = vmatpush3.msra.mxu1 %v399_v15  ;;  %v6402_v58 = vpop.f32.mrf.mxu0 }
 0x295   : > { %2905 = vmatprep.mubr.f32.mxu0 %v6399_v2  ;;  %v6404_v22 = vpop.f32.mrf.mxu1  ;;  %3066 = vmatprep.mubr.f32.mxu1 %v6143_v26  ;;  %v525_v26 = vld [vmem:[#allocation4 + $0x670] sm:$0xff] }
 0x296   : > { %4290 = vmatpush3.msra.mxu0 %v399_v15  ;;  %v6412_v43 = vpop.f32.mrf.mxu0  ;;  %4523 = vmatprep.subr.mxu1 %v534_v57  ;;  %v381_v15 = vld [vmem:[#allocation4 + $0x1f0] sm:$0xff] }
 0x297   : > { %2906 = vmatmul.mubr.f32.gmra.mxu0 %v6408_v59  ;;  %3067 = vmatmul.mubr.f32.gmra.mxu1 %v6148_v60  ;;  %7344 = vst [vmem:[#allocation72_spill] sm:$0xff] %v6412_v43  ;;  %v6414_v4 = vpop.f32.mrf.mxu1 }
 0x298   : > { %7345 = vst [vmem:[#allocation73_spill] sm:$0xff] %v6414_v4  ;;  %4291 = vmatprep.subr.mxu0 %v534_v57  ;;  %4539 = vmatpush3.msra.mxu1 %v390_v13  ;;  %v6431_v4 = vld [vmem:[%s5085_s28 + $0x1f8] sm:$0xff] }
 0x299   : > { %2911 = vmatprep.mubr.f32.mxu0 %v6417_v35  ;;  %3072 = vmatprep.mubr.f32.mxu1 %v6160_v48  ;;  %7347 = vst [vmem:[#allocation75_spill] sm:$0xff] %v6431_v4  ;;  %v516_v48 = vld [vmem:[#allocation4 + $0x628] sm:$0xff] }
 0x29a   : > { %4292 = vmatpush3.msra.mxu0 %v390_v13  ;;  %v6426_v60 = vpop.f32.mrf.mxu0  ;;  %4524 = vmatprep.subr.mxu1 %v525_v26 }
 0x29b   : > { %2912 = vmatmul.mubr.f32.gmra.mxu0 %v6422_v45  ;;  %3073 = vmatmul.mubr.f32.gmra.mxu1 %v6165_v47  ;;  %v6428_v57 = vpop.f32.mrf.mxu1  ;;  %v372_v47 = vld [vmem:[#allocation4 + $0x1a8] sm:$0xff]  ;;  %v6440_v45 = vld [vmem:[%s5085_s28 + $0x1f0] sm:$0xff] }
 0x29c   : > { %4293 = vmatprep.subr.mxu0 %v525_v26  ;;  %4540 = vmatpush3.msra.mxu1 %v381_v15  ;;  %v6434_v13 = vpop.f32.mrf.mxu0  ;;  %7350 = vst [vmem:[#allocation78_spill] sm:$0xff] %v6440_v45  ;;  %v6445_v26 = vld [vmem:[%s5085_s28 + $0x228] sm:$0xff] }
 0x29d   : > { %2917 = vmatprep.mubr.f32.mxu0 %v6431_v4  ;;  %7348 = vst [vmem:[#allocation76_spill] sm:$0xff] %v6434_v13  ;;  %v6436_v43 = vpop.f32.mrf.mxu1  ;;  %3078 = vmatprep.mubr.f32.mxu1 %v6177_v21  ;;  %7351 = vst [vmem:[#allocation79_spill] sm:$0xff] %v6445_v26  ;;  %v7405_v4 = vld [vmem:[#allocation23_spill] sm:$0xff] }
 0x29e   : > { %7349 = vst [vmem:[#allocation77_spill] sm:$0xff] %v6436_v43  ;;  %4294 = vmatpush3.msra.mxu0 %v381_v15  ;;  %4525 = vmatprep.subr.mxu1 %v516_v48  ;;  %v507_v43 = vld [vmem:[#allocation4 + $0x5e0] sm:$0xff] }
 0x29f   : > { %2918 = vmatmul.mubr.f32.gmra.mxu0 %v6440_v45  ;;  %3079 = vmatmul.mubr.f32.gmra.mxu1 %v6182_v41  ;;  %v363_v15 = vld [vmem:[#allocation4 + $0x160] sm:$0xff] }
 0x2a0   : > { %4295 = vmatprep.subr.mxu0 %v516_v48  ;;  %4541 = vmatpush3.msra.mxu1 %v372_v47  ;;  %v6448_v13 = vpop.f32.mrf.mxu0  ;;  %v6454_v45 = vld [vmem:[%s5085_s28 + $0x220] sm:$0xff] }
 0x2a1   : > { %2923 = vmatprep.mubr.f32.mxu0 %v6445_v26  ;;  %v6450_v21 = vpop.f32.mrf.mxu1  ;;  %3084 = vmatprep.mubr.f32.mxu1 %v6194_v61  ;;  %7352 = vst [vmem:[#allocation80_spill] sm:$0xff] %v6454_v45  ;;  %v6463_v26 = vld [vmem:[%s5085_s28 + $0x258] sm:$0xff] }
 0x2a2   : > { %4296 = vmatpush3.msra.mxu0 %v372_v47  ;;  %v6458_v41 = vpop.f32.mrf.mxu0  ;;  %4526 = vmatprep.subr.mxu1 %v507_v43  ;;  %7355 = vst [vmem:[#allocation83_spill] sm:$0xff] %v6463_v26  ;;  %v498_v61 = vld [vmem:[#allocation4 + $0x598] sm:$0xff] }
 0x2a3   : > { %2924 = vmatmul.mubr.f32.gmra.mxu0 %v6454_v45  ;;  %3085 = vmatmul.mubr.f32.gmra.mxu1 %v6199_v52  ;;  %7353 = vst [vmem:[#allocation81_spill] sm:$0xff] %v6458_v41  ;;  %v6460_v48 = vpop.f32.mrf.mxu1  ;;  %v354_v47 = vld [vmem:[#allocation4 + $0x118] sm:$0xff]  ;;  %v6468_v45 = vld [vmem:[%s5085_s28 + $0x250] sm:$0xff] }
 0x2a4   : > { %7354 = vst [vmem:[#allocation82_spill] sm:$0xff] %v6460_v48  ;;  %4297 = vmatprep.subr.mxu0 %v507_v43  ;;  %4542 = vmatpush3.msra.mxu1 %v363_v15  ;;  %7356 = vst [vmem:[#allocation84_spill] sm:$0xff] %v6468_v45  ;;  %v6477_v48 = vld [vmem:[%s5085_s28 + $0x288] sm:$0xff] }
 0x2a5   : > { %2929 = vmatprep.mubr.f32.mxu0 %v6463_v26  ;;  %3090 = vmatprep.mubr.f32.mxu1 %v6211_v24  ;;  %7357 = vst [vmem:[#allocation85_spill] sm:$0xff] %v6477_v48  ;;  %v489_v24 = vld [vmem:[#allocation4 + $0x550] sm:$0xff] }
 0x2a6   : > { %4298 = vmatpush3.msra.mxu0 %v363_v15  ;;  %v6472_v52 = vpop.f32.mrf.mxu0  ;;  %4527 = vmatprep.subr.mxu1 %v498_v61  ;;  %v1173_v26 = vld [vmem:[#allocation4 + $0x1ab0] sm:$0xff] }
 0x2a7   : > { %2930 = vmatmul.mubr.f32.gmra.mxu0 %v6468_v45  ;;  %3091 = vmatmul.mubr.f32.gmra.mxu1 %v6216_v8  ;;  %v6474_v43 = vpop.f32.mrf.mxu1  ;;  %v345_v8 = vld [vmem:[#allocation4 + $0xd0] sm:$0xff]  ;;  %v6486_v45 = vld [vmem:[%s5085_s28 + $0x280] sm:$0xff] }
 0x2a8   : > { %4299 = vmatprep.subr.mxu0 %v498_v61  ;;  %4543 = vmatpush3.msra.mxu1 %v354_v47  ;;  %v6480_v15 = vpop.f32.mrf.mxu0  ;;  %7360 = vst [vmem:[#allocation88_spill] sm:$0xff] %v6486_v45  ;;  %v6491_v61 = vld [vmem:[%s5085_s28 + $0x2b8] sm:$0xff] }
 0x2a9   : > { %2935 = vmatprep.mubr.f32.mxu0 %v6477_v48  ;;  %7358 = vst [vmem:[#allocation86_spill] sm:$0xff] %v6480_v15  ;;  %v6482_v41 = vpop.f32.mrf.mxu1  ;;  %3096 = vmatprep.mubr.f32.mxu1 %v6228_v55  ;;  %7361 = vst [vmem:[#allocation89_spill] sm:$0xff] %v6491_v61  ;;  %v885_v48 = vld [vmem:[#allocation4 + $0x11b0] sm:$0xff] }
 0x2aa   : > { %7359 = vst [vmem:[#allocation87_spill] sm:$0xff] %v6482_v41  ;;  %4300 = vmatpush3.msra.mxu0 %v354_v47  ;;  %4528 = vmatprep.subr.mxu1 %v489_v24  ;;  %v480_v41 = vld [vmem:[#allocation4 + $0x508] sm:$0xff] }
 0x2ab   : > { %2936 = vmatmul.mubr.f32.gmra.mxu0 %v6486_v45  ;;  %3097 = vmatmul.mubr.f32.gmra.mxu1 %v6233_v33  ;;  %v336_v47 = vld [vmem:[#allocation4 + $0x88] sm:$0xff]  ;;  %v6500_v45 = vld [vmem:[%s5085_s28 + $0x2b0] sm:$0xff] }
 0x2ac   : > { %4301 = vmatprep.subr.mxu0 %v489_v24  ;;  %4544 = vmatpush3.msra.mxu1 %v345_v8  ;;  %v6494_v15 = vpop.f32.mrf.mxu0  ;;  %7364 = vst [vmem:[#allocation92_spill] sm:$0xff] %v6500_v45 }
 0x2ad   : > { %2941 = vmatprep.mubr.f32.mxu0 %v6491_v61  ;;  %7362 = vst [vmem:[#allocation90_spill] sm:$0xff] %v6494_v15  ;;  %v6496_v55 = vpop.f32.mrf.mxu1  ;;  %3102 = vmatprep.mubr.f32.mxu1 %v6245_v34  ;;  %v6509_v61 = vld [vmem:[%s5085_s28 + $0x2e8] sm:$0xff]  ;;  %v471_v34 = vld [vmem:[#allocation4 + $0x4c0] sm:$0xff] }
 0x2ae   : > { %7363 = vst [vmem:[#allocation91_spill] sm:$0xff] %v6496_v55  ;;  %4302 = vmatpush3.msra.mxu0 %v345_v8  ;;  %v6504_v33 = vpop.f32.mrf.mxu0  ;;  %4529 = vmatprep.subr.mxu1 %v480_v41  ;;  %7367 = vst [vmem:[#allocation95_spill] sm:$0xff] %v6509_v61  ;;  %v327_v8 = vld [vmem:[#allocation4 + $0x40] sm:$0xff]  ;;  %v4782_v55 = vld [vmem:[%s5085_s28 + $0x270] sm:$0xff] }
 0x2af   : > { %2942 = vmatmul.mubr.f32.gmra.mxu0 %v6500_v45  ;;  %3103 = vmatmul.mubr.f32.gmra.mxu1 %v6250_v20  ;;  %7365 = vst [vmem:[#allocation93_spill] sm:$0xff] %v6504_v33  ;;  %v6506_v24 = vpop.f32.mrf.mxu1  ;;  %v6514_v45 = vld [vmem:[%s5085_s28 + $0x2e0] sm:$0xff]  ;;  %v912_v15 = vld [vmem:[#allocation4 + $0x1288] sm:$0xff] }
 0x2b0   : > { %7366 = vst [vmem:[#allocation94_spill] sm:$0xff] %v6506_v24  ;;  %4303 = vmatprep.subr.mxu0 %v480_v41  ;;  %4545 = vmatpush3.msra.mxu1 %v336_v47  ;;  %7368 = vst [vmem:[#allocation96_spill] sm:$0xff] %v6514_v45  ;;  %v894_v24 = vld [vmem:[#allocation4 + $0x11f8] sm:$0xff] }
 0x2b1   : > { %2947 = vmatprep.mubr.f32.mxu0 %v6509_v61  ;;  %3108 = vmatprep.mubr.f32.mxu1 %v6262_v36  ;;  %v750_v36 = vld [vmem:[#allocation4 + $0xd78] sm:$0xff]  ;;  %v4760_v61 = vld [vmem:[%s5085_s28 + $0x188] sm:$0xff] }
 0x2b2   : > { %4304 = vmatpush3.msra.mxu0 %v336_v47  ;;  %v6518_v20 = vpop.f32.mrf.mxu0  ;;  %4530 = vmatprep.subr.mxu1 %v471_v34 }
 0x2b3   : > { %2948 = vmatmul.mubr.f32.gmra.mxu0 %v6514_v45  ;;  %3109 = vmatmul.mubr.f32.gmra.mxu1 %v6267_v10  ;;  %7369 = vst [vmem:[#allocation97_spill] sm:$0xff] %v6518_v20  ;;  %v6520_v41 = vpop.f32.mrf.mxu1  ;;  %v4761_v45 = vld [vmem:[%s5085_s28 + $0x8] sm:$0xff]  ;;  %v1182_v10 = vld [vmem:[#allocation4 + $0x1af8] sm:$0xff]  ;;  %v4762_v20 = vld [vmem:[%s5085_s28 + $0x180] sm:$0xff] }
 0x2b4   : > { %7370 = vst [vmem:[#allocation98_spill] sm:$0xff] %v6520_v41  ;;  %4305 = vmatprep.subr.mxu0 %v471_v34  ;;  %4546 = vmatpush3.msra.mxu1 %v327_v8  ;;  %v6522_v47 = vpop.f32.mrf.mxu0  ;;  %v1038_v34 = vld [vmem:[#allocation4 + $0x1678] sm:$0xff]  ;;  %v4763_v41 = vld [vmem:[%s5085_s28] sm:$0xff] }
 0x2b5   : > { %4306 = vmatpush3.msra.mxu0 %v327_v8  ;;  %7371 = vst [vmem:[#allocation99_spill] sm:$0xff] %v6522_v47  ;;  %v6524_v33 = vpop.f32.mrf.mxu1  ;;  %3219 = vmatprep.mubr.f32.mxu1 %v4760_v61  ;;  %v741_v8 = vld [vmem:[#allocation4 + $0xd30] sm:$0xff]  ;;  %v876_v47 = vld [vmem:[#allocation4 + $0x1168] sm:$0xff] }
 0x2b6   : > { %7372 = vst [vmem:[#allocation100_spill] sm:$0xff] %v6524_v33  ;;  %3179 = vmatprep.mubr.f32.mxu0 %v4761_v45  ;;  %4355 = vmatprep.subr.mxu1 %v894_v24  ;;  %v4764_v45 = vld [vmem:[%s5085_s28 + $0x1b8] sm:$0xff]  ;;  %v1029_v24 = vld [vmem:[#allocation4 + $0x1630] sm:$0xff] }
 0x2b7   : > { %3220 = vmatmul.mubr.f32.vlgmr.msra.gmra.mxu1 %v4762_v20  ;;  %3180 = vmatmul.mubr.f32.vlgmr.msra.gmra.mxu0 %v4763_v41  ;;  %v732_v20 = vld [vmem:[#allocation4 + $0xce8] sm:$0xff] }
 0x2b8   : > { %4356 = vmatpush3.msra.mxu1 %v750_v36  ;;  %4435 = vmatprep.subr.mxu0 %v1182_v10  ;;  %v6530_v33 = vpop.f32.mrf.mxu0  ;;  %v4765_v10 = vld [vmem:[%s5085_s28 + $0x38] sm:$0xff] }
 0x2b9   : > { %4357 = vmatprep.subr.mxu1 %v885_v48  ;;  %7373 = vst [vmem:[#allocation101_spill] sm:$0xff] %v6530_v33  ;;  %v6532_v61 = vpop.f32.mrf.mxu1  ;;  %4436 = vmatpush3.msra.mxu0 %v1038_v34  ;;  %v4766_v48 = vld [vmem:[%s5085_s28 + $0x1b0] sm:$0xff]  ;;  %v1164_v33 = vld [vmem:[#allocation4 + $0x1a68] sm:$0xff] }
 0x2ba   : > { %7374 = vst [vmem:[#allocation102_spill] sm:$0xff] %v6532_v61  ;;  %3224 = vmatprep.mubr.f32.mxu1 %v4764_v45  ;;  %4358 = vmatpush3.msra.mxu1 %v741_v8  ;;  %v6535_v41 = vpop.f32.mrf.mxu0  ;;  %v867_v61 = vld [vmem:[#allocation4 + $0x1120] sm:$0xff]  ;;  %v1020_v34 = vld [vmem:[#allocation4 + $0x15e8] sm:$0xff]  ;;  %v4767_v45 = vld [vmem:[%s5085_s28 + $0x30] sm:$0xff] }
 0x2bb   : > { %4437 = vmatprep.subr.mxu0 %v1173_v26  ;;  %7375 = vst [vmem:[#allocation103_spill] sm:$0xff] %v6535_v41  ;;  %v6537_v36 = vpop.f32.mrf.mxu1  ;;  %3184 = vmatprep.mubr.f32.mxu0 %v4765_v10  ;;  %v723_v8 = vld [vmem:[#allocation4 + $0xca0] sm:$0xff]  ;;  %v858_v41 = vld [vmem:[#allocation4 + $0x10d8] sm:$0xff] }
 0x2bc   : > { %7376 = vst [vmem:[#allocation104_spill] sm:$0xff] %v6537_v36  ;;  %3225 = vmatmul.mubr.f32.gmra.mxu1 %v4766_v48  ;;  %4359 = vmatprep.subr.mxu1 %v876_v47  ;;  %v1155_v26 = vld [vmem:[#allocation4 + $0x1a20] sm:$0xff]  ;;  %v4768_v48 = vld [vmem:[%s5085_s28 + $0x1e8] sm:$0xff] }
 0x2bd   : > { %4438 = vmatpush3.msra.mxu0 %v1029_v24  ;;  %4360 = vmatpush3.msra.mxu1 %v732_v20  ;;  %v1011_v47 = vld [vmem:[#allocation4 + $0x15a0] sm:$0xff]  ;;  %v714_v24 = vld [vmem:[#allocation4 + $0xc58] sm:$0xff] }
 0x2be   : > { %3185 = vmatmul.mubr.f32.gmra.mxu0 %v4767_v45  ;;  %4439 = vmatprep.subr.mxu0 %v1164_v33  ;;  %v6542_v36 = vpop.f32.mrf.mxu0  ;;  %v4769_v33 = vld [vmem:[%s5085_s28 + $0x68] sm:$0xff] }
 0x2bf   : > { %4361 = vmatprep.subr.mxu1 %v867_v61  ;;  %7377 = vst [vmem:[#allocation105_spill] sm:$0xff] %v6542_v36  ;;  %v6544_v10 = vpop.f32.mrf.mxu1  ;;  %4440 = vmatpush3.msra.mxu0 %v1020_v34  ;;  %v4770_v61 = vld [vmem:[%s5085_s28 + $0x1e0] sm:$0xff]  ;;  %v1146_v36 = vld [vmem:[#allocation4 + $0x19d8] sm:$0xff] }
 0x2c0   : > { %7378 = vst [vmem:[#allocation106_spill] sm:$0xff] %v6544_v10  ;;  %3229 = vmatprep.mubr.f32.mxu1 %v4768_v48  ;;  %4362 = vmatpush3.msra.mxu1 %v723_v8  ;;  %v6547_v20 = vpop.f32.mrf.mxu0  ;;  %v849_v10 = vld [vmem:[#allocation4 + $0x1090] sm:$0xff]  ;;  %v1002_v34 = vld [vmem:[#allocation4 + $0x1558] sm:$0xff]  ;;  %v4771_v48 = vld [vmem:[%s5085_s28 + $0x60] sm:$0xff] }
 0x2c1   : > { %4441 = vmatprep.subr.mxu0 %v1155_v26  ;;  %7379 = vst [vmem:[#allocation107_spill] sm:$0xff] %v6547_v20  ;;  %v6549_v45 = vpop.f32.mrf.mxu1  ;;  %3189 = vmatprep.mubr.f32.mxu0 %v4769_v33  ;;  %v705_v8 = vld [vmem:[#allocation4 + $0xc10] sm:$0xff]  ;;  %v840_v20 = vld [vmem:[#allocation4 + $0x1048] sm:$0xff] }
 0x2c2   : > { %7380 = vst [vmem:[#allocation108_spill] sm:$0xff] %v6549_v45  ;;  %3230 = vmatmul.mubr.f32.gmra.mxu1 %v4770_v61  ;;  %4363 = vmatprep.subr.mxu1 %v858_v41  ;;  %v1137_v26 = vld [vmem:[#allocation4 + $0x1990] sm:$0xff]  ;;  %v4772_v61 = vld [vmem:[%s5085_s28 + $0x218] sm:$0xff] }
 0x2c3   : > { %4442 = vmatpush3.msra.mxu0 %v1011_v47  ;;  %4364 = vmatpush3.msra.mxu1 %v714_v24  ;;  %v993_v41 = vld [vmem:[#allocation4 + $0x1510] sm:$0xff]  ;;  %v696_v47 = vld [vmem:[#allocation4 + $0xbc8] sm:$0xff] }
 0x2c4   : > { %3190 = vmatmul.mubr.f32.gmra.mxu0 %v4771_v48  ;;  %4443 = vmatprep.subr.mxu0 %v1146_v36  ;;  %v6554_v45 = vpop.f32.mrf.mxu0  ;;  %v4773_v36 = vld [vmem:[%s5085_s28 + $0x98] sm:$0xff] }
 0x2c5   : > { %4365 = vmatprep.subr.mxu1 %v849_v10  ;;  %7381 = vst [vmem:[#allocation109_spill] sm:$0xff] %v6554_v45  ;;  %v6556_v33 = vpop.f32.mrf.mxu1  ;;  %4444 = vmatpush3.msra.mxu0 %v1002_v34  ;;  %v4774_v10 = vld [vmem:[%s5085_s28 + $0x210] sm:$0xff]  ;;  %v1128_v45 = vld [vmem:[#allocation4 + $0x1948] sm:$0xff] }
 0x2c6   : > { %7382 = vst [vmem:[#allocation110_spill] sm:$0xff] %v6556_v33  ;;  %3234 = vmatprep.mubr.f32.mxu1 %v4772_v61  ;;  %4366 = vmatpush3.msra.mxu1 %v705_v8  ;;  %v6559_v24 = vpop.f32.mrf.mxu0  ;;  %v831_v33 = vld [vmem:[#allocation4 + $0x1000] sm:$0xff]  ;;  %v984_v34 = vld [vmem:[#allocation4 + $0x14c8] sm:$0xff]  ;;  %v4775_v61 = vld [vmem:[%s5085_s28 + $0x90] sm:$0xff] }
 0x2c7   : > { %4445 = vmatprep.subr.mxu0 %v1137_v26  ;;  %7383 = vst [vmem:[#allocation111_spill] sm:$0xff] %v6559_v24  ;;  %v6561_v48 = vpop.f32.mrf.mxu1  ;;  %3194 = vmatprep.mubr.f32.mxu0 %v4773_v36  ;;  %v687_v8 = vld [vmem:[#allocation4 + $0xb80] sm:$0xff]  ;;  %v822_v24 = vld [vmem:[#allocation4 + $0xfb8] sm:$0xff] }
 0x2c8   : > { %7384 = vst [vmem:[#allocation112_spill] sm:$0xff] %v6561_v48  ;;  %3235 = vmatmul.mubr.f32.gmra.mxu1 %v4774_v10  ;;  %4367 = vmatprep.subr.mxu1 %v840_v20  ;;  %v1119_v26 = vld [vmem:[#allocation4 + $0x1900] sm:$0xff]  ;;  %v4776_v10 = vld [vmem:[%s5085_s28 + $0x248] sm:$0xff] }
 0x2c9   : > { %4446 = vmatpush3.msra.mxu0 %v993_v41  ;;  %4368 = vmatpush3.msra.mxu1 %v696_v47  ;;  %v975_v20 = vld [vmem:[#allocation4 + $0x1480] sm:$0xff]  ;;  %v678_v41 = vld [vmem:[#allocation4 + $0xb38] sm:$0xff] }
 0x2ca   : > { %3195 = vmatmul.mubr.f32.gmra.mxu0 %v4775_v61  ;;  %4447 = vmatprep.subr.mxu0 %v1128_v45  ;;  %v6566_v48 = vpop.f32.mrf.mxu0  ;;  %v4777_v45 = vld [vmem:[%s5085_s28 + $0xc8] sm:$0xff] }
 0x2cb   : > { %4369 = vmatprep.subr.mxu1 %v831_v33  ;;  %7385 = vst [vmem:[#allocation113_spill] sm:$0xff] %v6566_v48  ;;  %v6568_v36 = vpop.f32.mrf.mxu1  ;;  %4448 = vmatpush3.msra.mxu0 %v984_v34  ;;  %v4778_v33 = vld [vmem:[%s5085_s28 + $0x240] sm:$0xff]  ;;  %v1110_v48 = vld [vmem:[#allocation4 + $0x18b8] sm:$0xff] }
 0x2cc   : > { %7386 = vst [vmem:[#allocation114_spill] sm:$0xff] %v6568_v36  ;;  %3239 = vmatprep.mubr.f32.mxu1 %v4776_v10  ;;  %4370 = vmatpush3.msra.mxu1 %v687_v8  ;;  %v6571_v47 = vpop.f32.mrf.mxu0  ;;  %v813_v36 = vld [vmem:[#allocation4 + $0xf70] sm:$0xff]  ;;  %v966_v34 = vld [vmem:[#allocation4 + $0x1438] sm:$0xff]  ;;  %v4779_v10 = vld [vmem:[%s5085_s28 + $0xc0] sm:$0xff] }
 0x2cd   : > { %4449 = vmatprep.subr.mxu0 %v1119_v26  ;;  %7387 = vst [vmem:[#allocation115_spill] sm:$0xff] %v6571_v47  ;;  %v6573_v61 = vpop.f32.mrf.mxu1  ;;  %3199 = vmatprep.mubr.f32.mxu0 %v4777_v45  ;;  %v669_v8 = vld [vmem:[#allocation4 + $0xaf0] sm:$0xff] }
 0x2ce   : > { %7388 = vst [vmem:[#allocation116_spill] sm:$0xff] %v6573_v61  ;;  %3240 = vmatmul.mubr.f32.gmra.mxu1 %v4778_v33  ;;  %4371 = vmatprep.subr.mxu1 %v822_v24  ;;  %v1101_v26 = vld [vmem:[#allocation4 + $0x1870] sm:$0xff]  ;;  %v1902_v33 = vadd.f32 %v6034_v3, %v5720_v9  ;;  %v4780_v24 = vld [vmem:[%s5085_s28 + $0x278] sm:$0xff]  ;;  %v1092_v9 = vld [vmem:[#allocation4 + $0x1828] sm:$0xff] }
 0x2cf   : > { %4450 = vmatpush3.msra.mxu0 %v975_v20  ;;  %4372 = vmatpush3.msra.mxu1 %v678_v41  ;;  %v804_v20 = vld [vmem:[#allocation4 + $0xf28] sm:$0xff]  ;;  %v957_v61 = vld [vmem:[#allocation4 + $0x13f0] sm:$0xff]  ;;  %v795_v3 = vld [vmem:[#allocation4 + $0xee0] sm:$0xff] }
 0x2d0   : > { %3200 = vmatmul.mubr.f32.gmra.mxu0 %v4779_v10  ;;  %4451 = vmatprep.subr.mxu0 %v1110_v48  ;;  %v6578_v47 = vpop.f32.mrf.mxu0  ;;  %v660_v41 = vld [vmem:[#allocation4 + $0xaa8] sm:$0xff] }
 0x2d1   : > { %4373 = vmatprep.subr.mxu1 %v813_v36  ;;  %7389 = vst [vmem:[#allocation117_spill] sm:$0xff] %v6578_v47  ;;  %v6580_v45 = vpop.f32.mrf.mxu1  ;;  %4452 = vmatpush3.msra.mxu0 %v966_v34  ;;  %v7393_v10 = vld [vmem:[#allocation49_spill] sm:$0xff] }
 0x2d2   : > { %7390 = vst [vmem:[#allocation118_spill] sm:$0xff] %v6580_v45  ;;  %3244 = vmatprep.mubr.f32.mxu1 %v4780_v24  ;;  %4374 = vmatpush3.msra.mxu1 %v669_v8  ;;  %v6585_v48 = vpop.f32.mrf.mxu0  ;;  %v1896_v47 = vadd.f32 %v6014_v49, %v7393_v10  ;;  %v4781_v45 = vld [vmem:[%s5085_s28 + $0xf8] sm:$0xff]  ;;  %v948_v34 = vld [vmem:[#allocation4 + $0x13a8] sm:$0xff]  ;;  %v2063_v8 = vadd.f32 %v6036_v12, %v1902_v33  ;;  %v651_v24 = vld [vmem:[#allocation4 + $0xa60] sm:$0xff] }
 0x2d3   : > { %4453 = vmatprep.subr.mxu0 %v1101_v26  ;;  %7391 = vst [vmem:[#allocation119_spill] sm:$0xff] %v6585_v48  ;;  %v6587_v36 = vpop.f32.mrf.mxu1  ;;  %3204 = vmatprep.mubr.f32.mxu0 %v4781_v45  ;;  %v4783_v26 = vld [vmem:[%s5085_s28 + $0xf0] sm:$0xff]  ;;  %v939_v10 = vld [vmem:[#allocation4 + $0x1360] sm:$0xff]  ;;  %v642_v12 = vld [vmem:[#allocation4 + $0xa18] sm:$0xff]  ;;  %v2383_v48 = vadd.f32 %v6312_v56, %v6310_v16 }
 0x2d4   : > { %7392 = vst [vmem:[#allocation120_spill] sm:$0xff] %v6587_v36  ;;  %3245 = vmatmul.mubr.f32.gmra.mxu1 %v4782_v55  ;;  %4375 = vmatprep.subr.mxu1 %v804_v20  ;;  %v1083_v36 = vld [vmem:[#allocation4 + $0x17e0] sm:$0xff]  ;;  %v2057_v55 = vadd.f32 %v6016_v32, %v1896_v47  ;;  %v4784_v20 = vld [vmem:[%s5085_s28 + $0x2a8] sm:$0xff]  ;;  %v1074_v47 = vld [vmem:[#allocation4 + $0x1798] sm:$0xff] }
 0x2d5   : > { %4454 = vmatpush3.msra.mxu0 %v957_v61  ;;  %4376 = vmatpush3.msra.mxu1 %v660_v41  ;;  %v786_v61 = vld [vmem:[#allocation4 + $0xe98] sm:$0xff]  ;;  %v4786_v32 = vld [vmem:[%s5085_s28 + $0x2a0] sm:$0xff]  ;;  %v768_v56 = vld [vmem:[#allocation4 + $0xe08] sm:$0xff] }
 0x2d6   : > { %3205 = vmatmul.mubr.f32.gmra.mxu0 %v4783_v26  ;;  %4455 = vmatprep.subr.mxu0 %v1092_v9  ;;  %v2537_v49 = vpop.f32.mrf.mxu0  ;;  %v3706_v9 = vrot.slane %v2063_v8, 1  ;;  %v4785_v26 = vld [vmem:[%s5085_s28 + $0x128] sm:$0xff]  ;;  %v4787_v8 = vld [vmem:[%s5085_s28 + $0x120] sm:$0xff]  ;;  %v4788_v16 = vld [vmem:[%s5085_s28 + $0x2d8] sm:$0xff] }
 0x2d7   : > { %4377 = vmatprep.subr.mxu1 %v795_v3  ;;  %v6595_v45 = vpop.f32.mrf.mxu1  ;;  %4456 = vmatpush3.msra.mxu0 %v948_v34  ;;  %v2377_v3 = vadd.f32 %v6290_v27, %v6288_v14  ;;  %v777_v34 = vld [vmem:[#allocation4 + $0xe50] sm:$0xff] }
 0x2d8   : > { %7394 = vst [vmem:[#allocation49_spill] sm:$0xff] %v6595_v45  ;;  %3249 = vmatprep.mubr.f32.mxu1 %v4784_v20  ;;  %4378 = vmatpush3.msra.mxu1 %v651_v24  ;;  %v6599_v33 = vpop.f32.mrf.mxu0  ;;  %v930_v24 = vld [vmem:[#allocation4 + $0x1318] sm:$0xff]  ;;  %v3705_v20 = vrot.slane %v2057_v55, 1  ;;  %v633_v14 = vld [vmem:[#allocation4 + $0x9d0] sm:$0xff] }
 0x2d9   : > { %4457 = vmatprep.subr.mxu0 %v1083_v36  ;;  %7395 = vst [vmem:[#allocation121_spill] sm:$0xff] %v6599_v33  ;;  %v6601_v41 = vpop.f32.mrf.mxu1  ;;  %3209 = vmatprep.mubr.f32.mxu0 %v4785_v26  ;;  %v6607_v36 = vld [vmem:[#allocation6 + $0x1] ss:$0 sm:$0xff]  ;;  %v1065_v27 = vld [vmem:[#allocation4 + $0x1750] sm:$0xff]  ;;  %v2538_v26 = vadd.f32 %v2537_v49, %v2377_v3 }
 0x2da   : > { %7396 = vst [vmem:[#allocation122_spill] sm:$0xff] %v6601_v41  ;;  %3250 = vmatmul.mubr.f32.gmra.mxu1 %v4786_v32  ;;  %4379 = vmatprep.subr.mxu1 %v786_v61  ;;  %v3674_v32 = vadd.f32 %v6607_v36, %v6038_v38  ;;  %v3707_v55 = vsel %vm3587_vm0, %v3705_v20, %v3706_v9  ;;  %v7398_v33 = vld [vmem:[#allocation51_spill] sm:$0xff]  ;;  %v7399_v41 = vld [vmem:[#allocation22_spill] sm:$0xff]  ;;  %v7400_v3 = vld [vmem:[#allocation20_spill] sm:$0xff] }
 0x2db   : > { %4458 = vmatpush3.msra.mxu0 %v939_v10  ;;  %4380 = vmatpush3.msra.mxu1 %v642_v12  ;;  %v1914_v45 = vadd.f32 %v7399_v41, %v7398_v33  ;;  %v921_v49 = vld [vmem:[#allocation4 + $0x12d0] sm:$0xff]  ;;  %v3673_v38 = vadd.f32 %v6607_v36, %v7400_v3  ;;  %v3778_v3 = vrot.slane %v2538_v26, 2 }
 0x2dc   : > { %3210 = vmatmul.mubr.f32.gmra.mxu0 %v4787_v8  ;;  %4459 = vmatprep.subr.mxu0 %v1074_v47  ;;  %v2543_v61 = vpop.f32.mrf.mxu0  ;;  %v624_v47 = vld [vmem:[#allocation4 + $0x988] sm:$0xff]  ;;  %v3746_v33 = vadd.f32 %v3706_v9, %v3674_v32  ;;  %v4791_v9 = vld [vmem:[%s5085_s28 + $0x150] sm:$0xff]  ;;  %v1047_v32 = vld [vmem:[#allocation4 + $0x16c0] sm:$0xff] }
 0x2dd   : > { %4381 = vmatprep.subr.mxu1 %v777_v34  ;;  %v6614_v10 = vpop.f32.mrf.mxu1  ;;  %4460 = vmatpush3.msra.mxu0 %v930_v24  ;;  %v2544_v12 = vadd.f32 %v2543_v61, %v2383_v48  ;;  %v7403_v41 = vld [vmem:[#allocation50_spill] sm:$0xff]  ;;  %v7404_v24 = vld [vmem:[#allocation21_spill] sm:$0xff] }
 0x2de   : > { %7397 = vst [vmem:[#allocation123_spill] sm:$0xff] %v6614_v10  ;;  %3254 = vmatprep.mubr.f32.mxu1 %v4788_v16  ;;  %4382 = vmatpush3.msra.mxu1 %v633_v14  ;;  %v6622_v34 = vpop.f32.mrf.mxu0  ;;  %v1908_v8 = vadd.f32 %v7404_v24, %v7403_v41  ;;  %v4789_v16 = vld [vmem:[%s5085_s28 + $0x158] sm:$0xff]  ;;  %v4790_v10 = vld [vmem:[%s5085_s28 + $0x2d0] sm:$0xff]  ;;  %v1056_v48 = vld [vmem:[#allocation4 + $0x1708] sm:$0xff] }
 0x2df   : > { %4461 = vmatprep.subr.mxu0 %v1065_v27  ;;  %7401 = vst [vmem:[#allocation51_spill] sm:$0xff] %v6622_v34  ;;  %v6624_v20 = vpop.f32.mrf.mxu1  ;;  %3214 = vmatprep.mubr.f32.mxu0 %v4789_v16  ;;  %v759_v61 = vld [vmem:[#allocation4 + $0xdc0] sm:$0xff]  ;;  %v3779_v14 = vrot.slane %v2544_v12, 2  ;;  %v3745_v27 = vadd.f32 %v3707_v55, %v3673_v38 }
 0x2e0   : > { %7402 = vst [vmem:[#allocation22_spill] sm:$0xff] %v6624_v20  ;;  %3255 = vmatmul.mubr.f32.gmra.mxu1 %v4790_v10  ;;  %4383 = vmatprep.subr.mxu1 %v768_v56  ;;  %v615_v34 = vld [vmem:[#allocation4 + $0x940] sm:$0xff]  ;;  %v2075_v20 = vadd.f32 %v7405_v4, %v1914_v45 }
 0x2e1   : > { %4462 = vmatpush3.msra.mxu0 %v921_v49  ;;  %4384 = vmatpush3.msra.mxu1 %v624_v47  ;;  %v3780_v41 = vsel %vm3777_vm1, %v3778_v3, %v3779_v14  ;;  %v3819_v24 = vadd.f32 %v3779_v14, %v3746_v33  ;;  %v903_v10 = vld [vmem:[#allocation4 + $0x1240] sm:$0xff]  ;;  %v2389_v33 = vadd.f32 %v6336_v29, %v6334_v23  ;;  %v4794_v23 = vld [vmem:[%s5085_s28 + $0x58] sm:$0xff] }
 0x2e2   : > { %3215 = vmatmul.mubr.f32.gmra.mxu0 %v4791_v9  ;;  %4463 = vmatprep.subr.mxu0 %v1056_v48  ;;  %v3818_v16 = vadd.f32 %v3780_v41, %v3745_v27  ;;  %v2549_v26 = vpop.f32.mrf.mxu0  ;;  %v7406_v56 = vld [vmem:[#allocation24_spill] sm:$0xff]  ;;  %v3709_v47 = vrot.slane %v2075_v20, 1  ;;  %v7408_v14 = vld [vmem:[#allocation9_spill] sm:$0xff] }
 0x2e3   : > { %4385 = vmatprep.subr.mxu1 %v759_v61  ;;  %v6633_v55 = vpop.f32.mrf.mxu1  ;;  %v2069_v49 = vadd.f32 %v7406_v56, %v1908_v8  ;;  %4464 = vmatpush3.msra.mxu0 %v912_v15  ;;  %v3835_v4 = vmax.f32 %v3819_v24, 0.0  ;;  %v2395_v8 = vadd.f32 %v6358_v6, %v6356_v25  ;;  %v4793_v48 = vld [vmem:[%s5085_s28 + $0x20] sm:$0xff]  ;;  %v2550_v20 = vadd.f32 %v2549_v26, %v2389_v33  ;;  %v7407_v61 = vld [vmem:[#allocation26_spill] sm:$0xff] }
 0x2e4   : > { %4386 = vmatpush3.msra.mxu1 %v615_v34  ;;  %3324 = vmatprep.mubr.f32.mxu1 %v6279_v7  ;;  %v3834_v45 = vmax.f32 %v3818_v16, 0.0  ;;  %v6637_v12 = vpop.f32.mrf.mxu0  ;;  %v4792_v34 = vld [vmem:[%s5085_s28 + $0x28] sm:$0xff]  ;;  %v3676_v3 = vadd.f32 %v6607_v36, %v7407_v61  ;;  %v1926_v27 = vadd.f32 %v6102_v37, %v7408_v14  ;;  %v7411_v16 = vld [vmem:[#allocation27_spill] sm:$0xff] }
 0x2e5   : > { %4465 = vmatprep.subr.mxu0 %v1047_v32  ;;  %v6639_v38 = vpop.f32.mrf.mxu1  ;;  %3325 = vmatmul.mubr.f32.vlgmr.msra.gmra.mxu1 %v6284_v51  ;;  %v3850_v15 = vsel %vm3777_vm1, %v3835_v4, 0.0  ;;  %v3708_v7 = vrot.slane %v2069_v49, 1  ;;  %v7409_v6 = vld [vmem:[#allocation25_spill] sm:$0xff]  ;;  %v4795_v56 = vld [vmem:[%s5085_s28 + $0x50] sm:$0xff]  ;;  %v3781_v37 = vrot.slane %v2550_v20, 2 }
 0x2e6   : > { %4466 = vmatpush3.msra.mxu0 %v903_v10  ;;  %3469 = vmatprep.mubr.f32.mxu0 %v4792_v34  ;;  %4122 = vst [vmem:[%s5739_s19 + $0x10] sm:$0xff] %v3834_v45  ;;  %4123 = vst [vmem:[%s5739_s19 + $0x18] sm:$0xff] %v3850_v15  ;;  %v3675_v9 = vadd.f32 %v6607_v36, %v7409_v6  ;;  %v3748_v24 = vadd.f32 %v3709_v47, %v3676_v3  ;;  %v7410_v10 = vld [vmem:[#allocation52_spill] sm:$0xff]  ;;  %v4796_v4 = vld [vmem:[%s5085_s28 + $0x88] sm:$0xff] }
 0x2e7   : > { %3329 = vmatprep.mubr.f32.mxu1 %v6293_v62  ;;  %3470 = vmatmul.mubr.f32.vlgmr.msra.gmra.mxu0 %v4793_v48  ;;  %v3710_v62 = vsel %vm3587_vm0, %v3708_v7, %v3709_v47  ;;  %v1920_v26 = vadd.f32 %v7411_v16, %v7410_v10  ;;  %v7412_v45 = vld [vmem:[#allocation32_spill] sm:$0xff]  ;;  %v4799_v6 = vld [vmem:[%s5085_s28 + $0xb0] sm:$0xff] }
 0x2e8   : > { %3474 = vmatprep.mubr.f32.mxu0 %v4794_v23  ;;  %v2555_v51 = vpop.f32.mrf.mxu0  ;;  %v2087_v33 = vadd.f32 %v7412_v45, %v1926_v27  ;;  %v4797_v20 = vld [vmem:[%s5085_s28 + $0x80] sm:$0xff]  ;;  %v7415_v16 = vld [vmem:[#allocation11_spill] sm:$0xff] }
 0x2e9   : > { %v6653_v29 = vpop.f32.mrf.mxu1  ;;  %3330 = vmatmul.mubr.f32.gmra.mxu1 %v6302_v19  ;;  %v2556_v25 = vadd.f32 %v2555_v51, %v2395_v8  ;;  %v3747_v19 = vadd.f32 %v3710_v62, %v3675_v9  ;;  %v7413_v8 = vld [vmem:[#allocation28_spill] sm:$0xff]  ;;  %v2401_v62 = vadd.f32 %v6382_v42, %v6380_v31 }
 0x2ea   : > { %3334 = vmatprep.mubr.f32.mxu1 %v6307_v44  ;;  %v6664_v32 = vpop.f32.mrf.mxu0  ;;  %v2081_v48 = vadd.f32 %v7413_v8, %v1920_v26  ;;  %v4798_v51 = vld [vmem:[%s5085_s28 + $0xb8] sm:$0xff]  ;;  %v1938_v26 = vadd.f32 %v6136_v50, %v7415_v16  ;;  %v7421_v16 = vld [vmem:[#allocation13_spill] sm:$0xff] }
 0x2eb   : > { %v6666_v41 = vpop.f32.mrf.mxu1  ;;  %3475 = vmatmul.mubr.f32.gmra.mxu0 %v4795_v56  ;;  %v3782_v49 = vrot.slane %v2556_v25, 2  ;;  %v2407_v25 = vadd.f32 %v6404_v22, %v6402_v58  ;;  %v7416_v22 = vld [vmem:[#allocation29_spill] sm:$0xff] }
 0x2ec   : > { %3479 = vmatprep.mubr.f32.mxu0 %v4796_v4  ;;  %v3711_v27 = vrot.slane %v2081_v48, 1  ;;  %v3677_v56 = vadd.f32 %v6607_v36, %v7416_v22  ;;  %v7417_v4 = vld [vmem:[#allocation10_spill] sm:$0xff] }
 0x2ed   : > { %3335 = vmatmul.mubr.f32.gmra.mxu1 %v6316_v63  ;;  %v3783_v44 = vsel %vm3777_vm1, %v3781_v37, %v3782_v49  ;;  %v3821_v15 = vadd.f32 %v3782_v49, %v3748_v24  ;;  %v4800_v24 = vld [vmem:[%s5085_s28 + $0xe8] sm:$0xff]  ;;  %v1932_v45 = vadd.f32 %v6119_v30, %v7417_v4  ;;  %v7423_v4 = vld [vmem:[#allocation12_spill] sm:$0xff] }
 0x2ee   : > { %3339 = vmatprep.mubr.f32.mxu1 %v6325_v5  ;;  %v3820_v47 = vadd.f32 %v3783_v44, %v3747_v19  ;;  %v2561_v34 = vpop.f32.mrf.mxu0  ;;  %v3712_v5 = vrot.slane %v2087_v33, 1  ;;  %v4801_v33 = vld [vmem:[%s5085_s28 + $0xe0] sm:$0xff] }
 0x2ef   : > { %v6676_v7 = vpop.f32.mrf.mxu1  ;;  %3480 = vmatmul.mubr.f32.gmra.mxu0 %v4797_v20  ;;  %v3837_v23 = vmax.f32 %v3821_v15, 0.0  ;;  %v2562_v9 = vadd.f32 %v2561_v34, %v2401_v62  ;;  %v4802_v15 = vld [vmem:[%s5085_s28 + $0x118] sm:$0xff]  ;;  %v4804_v62 = vld [vmem:[%s5085_s28 + $0x148] sm:$0xff] }
 0x2f0   : > { %3484 = vmatprep.mubr.f32.mxu0 %v4798_v51  ;;  %v3836_v63 = vmax.f32 %v3820_v47, 0.0  ;;  %v6681_v61 = vpop.f32.mrf.mxu0  ;;  %v7418_v47 = vld [vmem:[#allocation34_spill] sm:$0xff] }
 0x2f1   : > { %v6683_v3 = vpop.f32.mrf.mxu1  ;;  %3340 = vmatmul.mubr.f32.gmra.mxu1 %v6330_v28  ;;  %v3851_v14 = vsel %vm3777_vm1, %v3837_v23, 0.0  ;;  %v7414_v28 = vld [vmem:[#allocation33_spill] sm:$0xff]  ;;  %v3784_v50 = vrot.slane %v2562_v9, 2  ;;  %v2099_v34 = vadd.f32 %v7418_v47, %v1938_v26  ;;  %v7419_v23 = vld [vmem:[#allocation30_spill] sm:$0xff]  ;;  %v1950_v26 = vadd.f32 %v6170_v53, %v7421_v16 }
 0x2f2   : > { %3344 = vmatprep.mubr.f32.mxu1 %v6339_v18  ;;  %4128 = vst [vmem:[%s5739_s19 + $0x40] sm:$0xff] %v3836_v63  ;;  %4129 = vst [vmem:[%s5739_s19 + $0x48] sm:$0xff] %v3851_v14  ;;  %v3678_v42 = vadd.f32 %v6607_v36, %v7414_v28  ;;  %v3713_v18 = vsel %vm3587_vm0, %v3711_v27, %v3712_v5  ;;  %v2093_v51 = vadd.f32 %v7419_v23, %v1932_v45  ;;  %v4803_v63 = vld [vmem:[%s5085_s28 + $0x110] sm:$0xff]  ;;  %v7431_v16 = vld [vmem:[#allocation17_spill] sm:$0xff] }
 0x2f3   : > { %3485 = vmatmul.mubr.f32.gmra.mxu0 %v4799_v6  ;;  %v1944_v45 = vadd.f32 %v6153_v39, %v7423_v4 }
 0x2f4   : > { %3489 = vmatprep.mubr.f32.mxu0 %v4800_v24  ;;  %v2567_v10 = vpop.f32.mrf.mxu0  ;;  %v3750_v19 = vadd.f32 %v3712_v5, %v3678_v42  ;;  %v3714_v9 = vrot.slane %v2093_v51, 1  ;;  %v2419_v24 = vadd.f32 %v6450_v21, %v6448_v13  ;;  %v4806_v42 = vld [vmem:[%s5085_s28 + $0x178] sm:$0xff] }
 0x2f5   : > { %v6696_v31 = vpop.f32.mrf.mxu1  ;;  %3345 = vmatmul.mubr.f32.gmra.mxu1 %v6348_v0  ;;  %v2568_v58 = vadd.f32 %v2567_v10, %v2407_v25  ;;  %v3749_v0 = vadd.f32 %v3713_v18, %v3677_v56  ;;  %v2413_v25 = vadd.f32 %v6428_v57, %v6426_v60  ;;  %v4805_v10 = vld [vmem:[%s5085_s28 + $0x140] sm:$0xff]  ;;  %v7422_v21 = vld [vmem:[#allocation31_spill] sm:$0xff] }
 0x2f6   : > { %3349 = vmatprep.mubr.f32.mxu1 %v6353_v54  ;;  %v6707_v37 = vpop.f32.mrf.mxu0  ;;  %v4810_v51 = vld [vmem:[%s5085_s28 + $0x1d8] sm:$0xff] }
 0x2f7   : > { %v6709_v49 = vpop.f32.mrf.mxu1  ;;  %3490 = vmatmul.mubr.f32.gmra.mxu0 %v4801_v33  ;;  %v3785_v44 = vrot.slane %v2568_v58, 2  ;;  %v3679_v58 = vadd.f32 %v6607_v36, %v7422_v21  ;;  %v4807_v33 = vld [vmem:[%s5085_s28 + $0x170] sm:$0xff] }
 0x2f8   : > { %3494 = vmatprep.mubr.f32.mxu0 %v4802_v15  ;;  %v7433_v21 = vld [vmem:[#allocation78_spill] sm:$0xff] }
 0x2f9   : > { %3350 = vmatmul.mubr.f32.gmra.mxu1 %v6362_v11  ;;  %v3786_v54 = vsel %vm3777_vm1, %v3784_v50, %v3785_v44  ;;  %v3823_v8 = vadd.f32 %v3785_v44, %v3750_v19  ;;  %v4808_v44 = vld [vmem:[%s5085_s28 + $0x1a8] sm:$0xff] }
 0x2fa   : > { %3354 = vmatprep.mubr.f32.mxu1 %v6371_v1  ;;  %v3822_v48 = vadd.f32 %v3786_v54, %v3749_v0  ;;  %v2573_v30 = vpop.f32.mrf.mxu0  ;;  %v3715_v1 = vrot.slane %v2099_v34, 1  ;;  %v7424_v0 = vld [vmem:[#allocation40_spill] sm:$0xff] }
 0x2fb   : > { %v6719_v20 = vpop.f32.mrf.mxu1  ;;  %3495 = vmatmul.mubr.f32.gmra.mxu0 %v4803_v63  ;;  %v3839_v5 = vmax.f32 %v3823_v8, 0.0  ;;  %v2574_v28 = vadd.f32 %v2573_v30, %v2413_v25  ;;  %v2111_v15 = vadd.f32 %v7424_v0, %v1950_v26  ;;  %v7425_v8 = vld [vmem:[#allocation36_spill] sm:$0xff]  ;;  %v7427_v25 = vld [vmem:[#allocation75_spill] sm:$0xff] }
 0x2fc   : > { %3499 = vmatprep.mubr.f32.mxu0 %v4804_v62  ;;  %v3838_v11 = vmax.f32 %v3822_v48, 0.0  ;;  %v6724_v14 = vpop.f32.mrf.mxu0  ;;  %v2105_v48 = vadd.f32 %v7425_v8, %v1944_v45  ;;  %v4809_v30 = vld [vmem:[%s5085_s28 + $0x1a0] sm:$0xff]  ;;  %v2425_v62 = vadd.f32 %v6474_v43, %v6472_v52  ;;  %v7432_v26 = vld [vmem:[#allocation43_spill] sm:$0xff] }
 0x2fd   : > { %v6726_v27 = vpop.f32.mrf.mxu1  ;;  %3355 = vmatmul.mubr.f32.gmra.mxu1 %v6376_v40  ;;  %v3852_v6 = vsel %vm3777_vm1, %v3839_v5, 0.0  ;;  %v7420_v40 = vld [vmem:[#allocation35_spill] sm:$0xff]  ;;  %v3787_v53 = vrot.slane %v2574_v28, 2  ;;  %v7430_v43 = vld [vmem:[#allocation41_spill] sm:$0xff]  ;;  %v7438_v8 = vld [vmem:[#allocation44_spill] sm:$0xff] }
 0x2fe   : > { %3359 = vmatprep.mubr.f32.mxu1 %v6385_v17  ;;  %4134 = vst [vmem:[%s5739_s19 + $0x70] sm:$0xff] %v3838_v11  ;;  %4135 = vst [vmem:[%s5739_s19 + $0x78] sm:$0xff] %v3852_v6  ;;  %v3680_v57 = vadd.f32 %v6607_v36, %v7420_v40  ;;  %v3716_v17 = vsel %vm3587_vm0, %v3714_v9, %v3715_v1  ;;  %v7426_v11 = vld [vmem:[#allocation74_spill] sm:$0xff]  ;;  %v3717_v6 = vrot.slane %v2105_v48, 1  ;;  %v7435_v45 = vld [vmem:[#allocation79_spill] sm:$0xff] }
 0x2ff   : > { %3500 = vmatmul.mubr.f32.gmra.mxu0 %v4805_v10  ;;  %v7428_v9 = vld [vmem:[#allocation90_spill] sm:$0xff] }
 0x300   : > { %3504 = vmatprep.mubr.f32.mxu0 %v4806_v42  ;;  %v2579_v18 = vpop.f32.mrf.mxu0  ;;  %v3752_v19 = vadd.f32 %v3715_v1, %v3680_v57  ;;  %v4811_v28 = vld [vmem:[%s5085_s28 + $0x1d0] sm:$0xff]  ;;  %v3682_v57 = vadd.f32 %v6607_v36, %v7430_v43 }
 0x301   : > { %v6739_v60 = vpop.f32.mrf.mxu1  ;;  %3360 = vmatmul.mubr.f32.gmra.mxu1 %v6394_v46  ;;  %v2580_v13 = vadd.f32 %v2579_v18, %v2419_v24  ;;  %v3751_v46 = vadd.f32 %v3716_v17, %v3679_v58  ;;  %v7429_v24 = vld [vmem:[#allocation91_spill] sm:$0xff]  ;;  %v4812_v18 = vld [vmem:[%s5085_s28 + $0x208] sm:$0xff] }
 0x302   : > { %3364 = vmatprep.mubr.f32.mxu1 %v6399_v2  ;;  %v6750_v22 = vpop.f32.mrf.mxu0  ;;  %v2431_v10 = vadd.f32 %v7429_v24, %v7428_v9  ;;  %v4816_v24 = vld [vmem:[%s5085_s28 + $0x268] sm:$0xff] }
 0x303   : > { %v6752_v56 = vpop.f32.mrf.mxu1  ;;  %3505 = vmatmul.mubr.f32.gmra.mxu0 %v4807_v33  ;;  %v3788_v50 = vrot.slane %v2580_v13, 2  ;;  %v1962_v13 = vadd.f32 %v7432_v26, %v7431_v16  ;;  %v7443_v43 = vld [vmem:[#allocation98_spill] sm:$0xff]  ;;  %v7445_v26 = vld [vmem:[#allocation85_spill] sm:$0xff] }
 0x304   : > { %3509 = vmatprep.mubr.f32.mxu0 %v4808_v44  ;;  %v7437_v44 = vld [vmem:[#allocation42_spill] sm:$0xff] }
 0x305   : > { %3365 = vmatmul.mubr.f32.gmra.mxu1 %v6408_v59  ;;  %v3789_v2 = vsel %vm3777_vm1, %v3787_v53, %v3788_v50  ;;  %v3825_v47 = vadd.f32 %v3788_v50, %v3752_v19  ;;  %v7434_v19 = vld [vmem:[#allocation37_spill] sm:$0xff]  ;;  %v2123_v48 = vadd.f32 %v7438_v8, %v1962_v13  ;;  %v7451_v8 = vld [vmem:[#allocation88_spill] sm:$0xff] }
 0x306   : > { %3369 = vmatprep.mubr.f32.mxu1 %v6417_v35  ;;  %v3824_v34 = vadd.f32 %v3789_v2, %v3751_v46  ;;  %v2585_v39 = vpop.f32.mrf.mxu0  ;;  %v3718_v35 = vrot.slane %v2111_v15, 1  ;;  %v3681_v4 = vadd.f32 %v6607_v36, %v7434_v19  ;;  %v7436_v46 = vld [vmem:[#allocation16_spill] sm:$0xff] }
 0x307   : > { %v6762_v54 = vpop.f32.mrf.mxu1  ;;  %3510 = vmatmul.mubr.f32.gmra.mxu0 %v4809_v30  ;;  %v3841_v23 = vmax.f32 %v3825_v47, 0.0  ;;  %v2586_v42 = vadd.f32 %v2585_v39, %v2425_v62  ;;  %v1956_v0 = vadd.f32 %v7437_v44, %v7436_v46  ;;  %v4813_v15 = vld [vmem:[%s5085_s28 + $0x200] sm:$0xff]  ;;  %v4814_v39 = vld [vmem:[%s5085_s28 + $0x238] sm:$0xff] }
 0x308   : > { %3514 = vmatprep.mubr.f32.mxu0 %v4810_v51  ;;  %v3840_v59 = vmax.f32 %v3824_v34, 0.0  ;;  %v6767_v63 = vpop.f32.mrf.mxu0  ;;  %v3719_v17 = vsel %vm3587_vm0, %v3717_v6, %v3718_v35  ;;  %v3754_v50 = vadd.f32 %v3718_v35, %v3682_v57  ;;  %v7439_v30 = vld [vmem:[#allocation80_spill] sm:$0xff]  ;;  %v4815_v6 = vld [vmem:[%s5085_s28 + $0x230] sm:$0xff] }
 0x309   : > { %v6769_v5 = vpop.f32.mrf.mxu1  ;;  %3370 = vmatmul.mubr.f32.gmra.mxu1 %v7426_v11  ;;  %v3853_v1 = vsel %vm3777_vm1, %v3841_v23, 0.0  ;;  %v3790_v2 = vrot.slane %v2586_v42, 2  ;;  %v3753_v34 = vadd.f32 %v3719_v17, %v3681_v4  ;;  %v7444_v17 = vld [vmem:[#allocation84_spill] sm:$0xff] }
 0x30a   : > { %3374 = vmatprep.mubr.f32.mxu1 %v7427_v25  ;;  %4140 = vst [vmem:[%s5739_s19 + $0xa0] sm:$0xff] %v3840_v59  ;;  %4141 = vst [vmem:[%s5739_s19 + $0xa8] sm:$0xff] %v3853_v1  ;;  %v7440_v59 = vld [vmem:[#allocation83_spill] sm:$0xff]  ;;  %v7441_v1 = vld [vmem:[#allocation38_spill] sm:$0xff] }
 0x30b   : > { %3515 = vmatmul.mubr.f32.gmra.mxu0 %v4811_v28  ;;  %v2117_v25 = vadd.f32 %v7441_v1, %v1956_v0  ;;  %v4817_v4 = vld [vmem:[%s5085_s28 + $0x260] sm:$0xff]  ;;  %v7454_v1 = vld [vmem:[#allocation14_spill] sm:$0xff] }
 0x30c   : > { %3519 = vmatprep.mubr.f32.mxu0 %v4812_v18  ;;  %v2591_v40 = vpop.f32.mrf.mxu0  ;;  %v3721_v18 = vrot.slane %v2123_v48, 1  ;;  %v7448_v0 = vld [vmem:[#allocation45_spill] sm:$0xff] }
 0x30d   : > { %v6782_v52 = vpop.f32.mrf.mxu1  ;;  %3375 = vmatmul.mubr.f32.gmra.mxu1 %v7433_v21  ;;  %v2592_v58 = vadd.f32 %v2591_v40, %v2431_v10  ;;  %v7442_v40 = vld [vmem:[#allocation97_spill] sm:$0xff]  ;;  %v3720_v13 = vrot.slane %v2117_v25, 1  ;;  %v7455_v25 = vld [vmem:[#allocation46_spill] sm:$0xff] }
 0x30e   : > { %3379 = vmatprep.mubr.f32.mxu1 %v7435_v45  ;;  %v6793_v33 = vpop.f32.mrf.mxu0  ;;  %v2437_v57 = vadd.f32 %v7443_v43, %v7442_v40  ;;  %v7446_v21 = vld [vmem:[#allocation101_spill] sm:$0xff] }
 0x30f   : > { %v6795_v53 = vpop.f32.mrf.mxu1  ;;  %3520 = vmatmul.mubr.f32.gmra.mxu0 %v4813_v15  ;;  %v3791_v47 = vrot.slane %v2592_v58, 2  ;;  %v7447_v58 = vld [vmem:[#allocation102_spill] sm:$0xff]  ;;  %v3684_v15 = vadd.f32 %v6607_v36, %v7448_v0  ;;  %v4822_v0 = vld [vmem:[%s5085_s28 + $0x2f8] sm:$0xff] }
 0x310   : > { %3524 = vmatprep.mubr.f32.mxu0 %v4814_v39  ;;  %v2443_v19 = vadd.f32 %v7447_v58, %v7446_v21  ;;  %v4820_v43 = vld [vmem:[%s5085_s28 + $0x2c8] sm:$0xff] }
 0x311   : > { %3380 = vmatmul.mubr.f32.gmra.mxu1 %v7439_v30  ;;  %v3792_v23 = vsel %vm3777_vm1, %v3790_v2, %v3791_v47  ;;  %v3827_v51 = vadd.f32 %v3791_v47, %v3754_v50  ;;  %v4818_v50 = vld [vmem:[%s5085_s28 + $0x298] sm:$0xff]  ;;  %v3722_v2 = vsel %vm3587_vm0, %v3720_v13, %v3721_v18 }
 0x312   : > { %3384 = vmatprep.mubr.f32.mxu1 %v7440_v59  ;;  %v3826_v35 = vadd.f32 %v3792_v23, %v3753_v34  ;;  %v2597_v62 = vpop.f32.mrf.mxu0  ;;  %v7449_v47 = vld [vmem:[#allocation15_spill] sm:$0xff]  ;;  %v7450_v34 = vld [vmem:[#allocation53_spill] sm:$0xff] }
 0x313   : > { %v6805_v11 = vpop.f32.mrf.mxu1  ;;  %3525 = vmatmul.mubr.f32.gmra.mxu0 %v4815_v6  ;;  %v3843_v9 = vmax.f32 %v3827_v51, 0.0  ;;  %v2598_v45 = vadd.f32 %v2597_v62, %v2437_v57  ;;  %v1974_v39 = vadd.f32 %v7450_v34, %v7449_v47  ;;  %v7452_v30 = vld [vmem:[#allocation39_spill] sm:$0xff]  ;;  %v7453_v51 = vld [vmem:[#allocation89_spill] sm:$0xff]  ;;  %v3756_v62 = vadd.f32 %v3721_v18, %v3684_v15  ;;  %v7456_v57 = vld [vmem:[#allocation54_spill] sm:$0xff] }
 0x314   : > { %3529 = vmatprep.mubr.f32.mxu0 %v4816_v24  ;;  %v3842_v10 = vmax.f32 %v3826_v35, 0.0  ;;  %v6810_v28 = vpop.f32.mrf.mxu0  ;;  %v3683_v23 = vadd.f32 %v6607_v36, %v7452_v30  ;;  %v1968_v6 = vadd.f32 %v7455_v25, %v7454_v1  ;;  %v7458_v18 = vld [vmem:[#allocation95_spill] sm:$0xff]  ;;  %v7462_v30 = vld [vmem:[#allocation96_spill] sm:$0xff]  ;;  %v7464_v1 = vld [vmem:[#allocation110_spill] sm:$0xff] }
 0x315   : > { %v6812_v42 = vpop.f32.mrf.mxu1  ;;  %3385 = vmatmul.mubr.f32.gmra.mxu1 %v7444_v17  ;;  %v3854_v16 = vsel %vm3777_vm1, %v3843_v9, 0.0  ;;  %v4819_v9 = vld [vmem:[%s5085_s28 + $0x290] sm:$0xff]  ;;  %v3793_v24 = vrot.slane %v2598_v45, 2  ;;  %v2135_v17 = vadd.f32 %v7456_v57, %v1974_v39  ;;  %v7460_v39 = vld [vmem:[#allocation105_spill] sm:$0xff] }
 0x316   : > { %3389 = vmatprep.mubr.f32.mxu1 %v7445_v26  ;;  %4146 = vst [vmem:[%s5739_s19 + $0xd0] sm:$0xff] %v3842_v10  ;;  %4147 = vst [vmem:[%s5739_s19 + $0xd8] sm:$0xff] %v3854_v16  ;;  %v3755_v40 = vadd.f32 %v3722_v2, %v3683_v23  ;;  %v7457_v16 = vld [vmem:[#allocation92_spill] sm:$0xff] }
 0x317   : > { %3530 = vmatmul.mubr.f32.gmra.mxu0 %v4817_v4  ;;  %v7459_v4 = vld [vmem:[#allocation47_spill] sm:$0xff]  ;;  %v3724_v34 = vrot.slane %v2135_v17, 1 }
 0x318   : > { %3534 = vmatprep.mubr.f32.mxu0 %v4818_v50  ;;  %v2603_v46 = vpop.f32.mrf.mxu0  ;;  %v2129_v45 = vadd.f32 %v7459_v4, %v1968_v6  ;;  %v4821_v50 = vld [vmem:[%s5085_s28 + $0x2c0] sm:$0xff]  ;;  %v4823_v6 = vld [vmem:[%s5085_s28 + $0x2f0] sm:$0xff] }
 0x319   : > { %v6825_v44 = vpop.f32.mrf.mxu1  ;;  %3390 = vmatmul.mubr.f32.gmra.mxu1 %v7451_v8  ;;  %v2604_v48 = vadd.f32 %v2603_v46, %v2443_v19  ;;  %v7461_v8 = vld [vmem:[#allocation106_spill] sm:$0xff]  ;;  %v7466_v17 = vld [vmem:[#allocation19_spill] sm:$0xff] }
 0x31a   : > { %3394 = vmatprep.mubr.f32.mxu1 %v7453_v51  ;;  %v6836_v59 = vpop.f32.mrf.mxu0  ;;  %v3723_v51 = vrot.slane %v2129_v45, 1 }
 0x31b   : > { %v6838_v35 = vpop.f32.mrf.mxu1  ;;  %3535 = vmatmul.mubr.f32.gmra.mxu0 %v4819_v9  ;;  %v3794_v10 = vrot.slane %v2604_v48, 2  ;;  %v2449_v48 = vadd.f32 %v7461_v8, %v7460_v39 }
 0x31c   : > { %3539 = vmatprep.mubr.f32.mxu0 %v4820_v43  ;;  %v3725_v57 = vsel %vm3587_vm0, %v3723_v51, %v3724_v34 }
 0x31d   : > { %3395 = vmatmul.mubr.f32.gmra.mxu1 %v7457_v16  ;;  %v3795_v26 = vsel %vm3777_vm1, %v3793_v24, %v3794_v10  ;;  %v3829_v13 = vadd.f32 %v3794_v10, %v3756_v62  ;;  %v7463_v62 = vld [vmem:[#allocation109_spill] sm:$0xff]  ;;  %v7467_v16 = vld [vmem:[#allocation59_spill] sm:$0xff] }
 0x31e   : > { %3399 = vmatprep.mubr.f32.mxu1 %v7458_v18  ;;  %v3828_v21 = vadd.f32 %v3795_v26, %v3755_v40  ;;  %v2609_v58 = vpop.f32.mrf.mxu0  ;;  %v2455_v25 = vadd.f32 %v7464_v1, %v7463_v62  ;;  %v7465_v40 = vld [vmem:[#allocation55_spill] sm:$0xff]  ;;  %v1986_v26 = vadd.f32 %v7467_v16, %v7466_v17  ;;  %v7468_v18 = vld [vmem:[#allocation48_spill] sm:$0xff]  ;;  %v7476_v16 = vld [vmem:[#allocation114_spill] sm:$0xff] }
 0x31f   : > { %v6848_v19 = vpop.f32.mrf.mxu1  ;;  %3540 = vmatmul.mubr.f32.gmra.mxu0 %v4821_v50  ;;  %v3845_v46 = vmax.f32 %v3829_v13, 0.0  ;;  %v2610_v9 = vadd.f32 %v2609_v58, %v2449_v48  ;;  %v3686_v43 = vadd.f32 %v6607_v36, %v7465_v40  ;;  %v7469_v50 = vld [vmem:[#allocation18_spill] sm:$0xff]  ;;  %v7471_v48 = vld [vmem:[#allocation60_spill] sm:$0xff] }
 0x320   : > { %3544 = vmatprep.mubr.f32.mxu0 %v4822_v0  ;;  %v3844_v15 = vmax.f32 %v3828_v21, 0.0  ;;  %v6853_v2 = vpop.f32.mrf.mxu0  ;;  %v3685_v21 = vadd.f32 %v6607_v36, %v7468_v18 }
 0x321   : > { %v6855_v47 = vpop.f32.mrf.mxu1  ;;  %3400 = vmatmul.mubr.f32.gmra.mxu1 %v7462_v30  ;;  %v3855_v23 = vsel %vm3777_vm1, %v3845_v46, 0.0  ;;  %v3758_v58 = vadd.f32 %v3724_v34, %v3686_v43  ;;  %v7470_v46 = vld [vmem:[#allocation56_spill] sm:$0xff]  ;;  %v2147_v30 = vadd.f32 %v7471_v48, %v1986_v26 }
 0x322   : > { %4152 = vst [vmem:[%s5739_s19 + $0x100] sm:$0xff] %v3844_v15  ;;  %4153 = vst [vmem:[%s5739_s19 + $0x108] sm:$0xff] %v3855_v23  ;;  %v1980_v0 = vadd.f32 %v7470_v46, %v7469_v50  ;;  %v3796_v15 = vrot.slane %v2610_v9, 2  ;;  %v3757_v8 = vadd.f32 %v3725_v57, %v3685_v21  ;;  %v7475_v57 = vld [vmem:[#allocation113_spill] sm:$0xff] }
 0x323   : > { %3545 = vmatmul.mubr.f32.gmra.mxu0 %v4823_v6  ;;  %v7472_v6 = vld [vmem:[#allocation57_spill] sm:$0xff]  ;;  %v3727_v17 = vrot.slane %v2147_v30, 1 }
 0x324   : > { %v2615_v24 = vpop.f32.mrf.mxu0  ;;  %v7477_v21 = vld [vmem:[#allocation117_spill] sm:$0xff] }
 0x325   : > { %v6866_v10 = vpop.f32.mrf.mxu1  ;;  %v2616_v13 = vadd.f32 %v2615_v24, %v2455_v25  ;;  %v2141_v24 = vadd.f32 %v7472_v6, %v1980_v0 }
 0x326   : > { %v6875_v4 = vpop.f32.mrf.mxu0 }
 0x327   : > { %v6877_v45 = vpop.f32.mrf.mxu1  ;;  %v3797_v39 = vrot.slane %v2616_v13, 2  ;;  %v2461_v13 = vadd.f32 %v7476_v16, %v7475_v57  ;;  %v3726_v18 = vrot.slane %v2141_v24, 1 }
 0x329   : > { %v3798_v23 = vsel %vm3777_vm1, %v3796_v15, %v3797_v39  ;;  %v3831_v51 = vadd.f32 %v3797_v39, %v3758_v58  ;;  %v7478_v58 = vld [vmem:[#allocation118_spill] sm:$0xff]  ;;  %v7480_v39 = vld [vmem:[#allocation61_spill] sm:$0xff]  ;;  %v3728_v48 = vsel %vm3587_vm0, %v3726_v18, %v3727_v17 }
 0x32a   : > { %v3830_v62 = vadd.f32 %v3798_v23, %v3757_v8  ;;  %v2621_v1 = vpop.f32.mrf.mxu0  ;;  %v2467_v50 = vadd.f32 %v7478_v58, %v7477_v21  ;;  %v3688_v8 = vadd.f32 %v6607_v36, %v7480_v39  ;;  %v7481_v23 = vld [vmem:[#allocation58_spill] sm:$0xff]  ;;  %v7484_v58 = vld [vmem:[#allocation49_spill] sm:$0xff] }
 0x32b   : > { %v6883_v25 = vpop.f32.mrf.mxu1  ;;  %v3847_v34 = vmax.f32 %v3831_v51, 0.0  ;;  %v2622_v46 = vadd.f32 %v2621_v1, %v2461_v13  ;;  %v3687_v51 = vadd.f32 %v6607_v36, %v7481_v23  ;;  %v7485_v36 = vld [vmem:[#allocation64_spill] sm:$0xff] }
 0x32c   : > { %v3846_v40 = vmax.f32 %v3830_v62, 0.0  ;;  %v6886_v43 = vpop.f32.mrf.mxu0  ;;  %v3760_v24 = vadd.f32 %v3727_v17, %v3688_v8 }
 0x32d   : > { %7473 = vst [vmem:[#allocation20_spill] sm:$0xff] %v6886_v43  ;;  %v6888_v9 = vpop.f32.mrf.mxu1  ;;  %v3856_v26 = vsel %vm3777_vm1, %v3847_v34, 0.0  ;;  %v3799_v34 = vrot.slane %v2622_v46, 2  ;;  %v3759_v1 = vadd.f32 %v3728_v48, %v3687_v51  ;;  %v7487_v48 = vld [vmem:[#allocation122_spill] sm:$0xff] }
 0x32e   : > { %7474 = vst [vmem:[#allocation50_spill] sm:$0xff] %v6888_v9  ;;  %4158 = vst [vmem:[%s5739_s19 + $0x130] sm:$0xff] %v3846_v40  ;;  %v7488_v51 = vld [vmem:[#allocation62_spill] sm:$0xff]  ;;  %v7497_v9 = vld [vmem:[#allocation67_spill] sm:$0xff] }
 0x32f   : > { %4159 = vst [vmem:[%s5739_s19 + $0x138] sm:$0xff] %v3856_v26 }
 0x330   : > { %v2627_v0 = vpop.f32.mrf.mxu0 }
 0x331   : > { %v6897_v15 = vpop.f32.mrf.mxu1  ;;  %v2628_v30 = vadd.f32 %v2627_v0, %v2467_v50  ;;  %v7486_v0 = vld [vmem:[#allocation65_spill] sm:$0xff] }
 0x332   : > { %7479 = vst [vmem:[#allocation21_spill] sm:$0xff] %v6897_v15  ;;  %v6904_v62 = vpop.f32.mrf.mxu0  ;;  %v2385_v39 = vadd.f32 %v7486_v0, %v7485_v36 }
 0x333   : > { %7482 = vst [vmem:[#allocation23_spill] sm:$0xff] %v6904_v62  ;;  %v6906_v6 = vpop.f32.mrf.mxu1  ;;  %v3800_v40 = vrot.slane %v2628_v30, 2 }
 0x334   : > { %7483 = vst [vmem:[#allocation24_spill] sm:$0xff] %v6906_v6 }
 0x335   : > { %v3801_v57 = vsel %vm3777_vm1, %v3799_v34, %v3800_v40  ;;  %v3833_v16 = vadd.f32 %v3800_v40, %v3760_v24  ;;  %v7489_v24 = vld [vmem:[#allocation63_spill] sm:$0xff] }
 0x336   : > { %v3832_v13 = vadd.f32 %v3801_v57, %v3759_v1  ;;  %v2859_v26 = vpop.f32.mrf.mxu0  ;;  %v2379_v34 = vadd.f32 %v7489_v24, %v7488_v51  ;;  %v7490_v40 = vld [vmem:[#allocation51_spill] sm:$0xff] }
 0x337   : > { %v3020_v18 = vpop.f32.mrf.mxu1  ;;  %v3849_v21 = vmax.f32 %v3833_v16, 0.0  ;;  %v2860_v50 = vadd.f32 %v2859_v26, %v7484_v58  ;;  %v2546_v1 = vadd.f32 %v7490_v40, %v2385_v39  ;;  %v7491_v58 = vld [vmem:[#allocation123_spill] sm:$0xff]  ;;  %v7495_v40 = vld [vmem:[#allocation69_spill] sm:$0xff] }
 0x338   : > { %v3848_v23 = vmax.f32 %v3832_v13, 0.0  ;;  %v2861_v6 = vpop.f32.mrf.mxu0  ;;  %v7492_v13 = vld [vmem:[#allocation121_spill] sm:$0xff] }
 0x339   : > { %v3022_v17 = vpop.f32.mrf.mxu1  ;;  %v3857_v46 = vsel %vm3777_vm1, %v3849_v21, 0.0  ;;  %v3021_v8 = vadd.f32 %v3020_v18, %v2860_v50  ;;  %v2862_v30 = vadd.f32 %v2861_v6, %v7487_v48  ;;  %v2540_v0 = vadd.f32 %v7492_v13, %v2379_v34  ;;  %v6921_v21 = vld [vmem:[#allocation6 + $0x2] ss:$0 sm:$0xff]  ;;  %v7493_v6 = vld [vmem:[#allocation22_spill] sm:$0xff] }
 0x33a   : > { %4164 = vst [vmem:[%s5739_s19 + $0x160] sm:$0xff] %v3848_v23  ;;  %4165 = vst [vmem:[%s5739_s19 + $0x168] sm:$0xff] %v3857_v46  ;;  %v3864_v48 = vadd.f32 %v6921_v21, %v2546_v1 }
 0x33b   : > { %v2865_v57 = vpop.f32.mrf.mxu0  ;;  %v3026_v16 = vpop.f32.mrf.mxu1  ;;  %v3023_v26 = vadd.f32 %v3022_v17, %v2862_v30  ;;  %v3895_v23 = vrot.slane %v3021_v8, 1  ;;  %v7494_v30 = vld [vmem:[#allocation68_spill] sm:$0xff]  ;;  %v3863_v34 = vadd.f32 %v6921_v21, %v2540_v0 }
 0x33c   : > { %v2866_v36 = vadd.f32 %v2865_v57, %v7491_v58  ;;  %v2397_v57 = vadd.f32 %v7495_v40, %v7494_v30 }
 0x33d   : > { %v2867_v43 = vpop.f32.mrf.mxu0  ;;  %v3028_v15 = vpop.f32.mrf.mxu1  ;;  %v3967_v58 = vrot.slane %v3023_v26, 2 }
 0x33e   : > { %v3027_v18 = vadd.f32 %v3026_v16, %v2866_v36  ;;  %v2868_v50 = vadd.f32 %v2867_v43, %v7493_v6  ;;  %v7496_v6 = vld [vmem:[#allocation66_spill] sm:$0xff] }
 0x33f   : > { %v2871_v51 = vpop.f32.mrf.mxu0  ;;  %v3032_v39 = vpop.f32.mrf.mxu1  ;;  %v2391_v8 = vadd.f32 %v7497_v9, %v7496_v6 }
 0x340   : > { %v3896_v46 = vrot.slane %v3027_v18, 1  ;;  %v3029_v24 = vadd.f32 %v3028_v15, %v2868_v50  ;;  %v2872_v17 = vadd.f32 %v2871_v51, %v6633_v55  ;;  %v2558_v15 = vadd.f32 %v6664_v32, %v2397_v57 }
 0x341   : > { %v2873_v13 = vpop.f32.mrf.mxu0  ;;  %v3034_v62 = vpop.f32.mrf.mxu1 }
 0x342   : > { %v3897_v16 = vsel %vm3587_vm0, %v3895_v23, %v3896_v46  ;;  %v3936_v43 = vadd.f32 %v3896_v46, %v3864_v48  ;;  %v3968_v36 = vrot.slane %v3029_v24, 2  ;;  %v3033_v1 = vadd.f32 %v3032_v39, %v2872_v17 }
 0x343   : > { %v3935_v18 = vadd.f32 %v3897_v16, %v3863_v34  ;;  %v2874_v55 = vadd.f32 %v2873_v13, %v6639_v38  ;;  %v2877_v50 = vpop.f32.mrf.mxu0  ;;  %v3038_v51 = vpop.f32.mrf.mxu1  ;;  %v2552_v48 = vadd.f32 %v6637_v12, %v2391_v8  ;;  %v3866_v38 = vadd.f32 %v6921_v21, %v2558_v15  ;;  %v7499_v16 = vld [vmem:[#allocation73_spill] sm:$0xff] }
 0x344   : > { %v3969_v0 = vsel %vm3777_vm1, %v3967_v58, %v3968_v36  ;;  %v6935_v26 = vadd.f32 %v3968_v36, %v3936_v43  ;;  %v2878_v30 = vadd.f32 %v2877_v50, %v6653_v29  ;;  %v3898_v57 = vrot.slane %v3033_v1, 1  ;;  %v7498_v29 = vld [vmem:[#allocation72_spill] sm:$0xff]  ;;  %v7501_v50 = vld [vmem:[#allocation71_spill] sm:$0xff] }
 0x345   : > { %v6939_v23 = vadd.f32 %v3969_v0, %v3935_v18  ;;  %v3035_v39 = vadd.f32 %v3034_v62, %v2874_v55  ;;  %v2879_v46 = vpop.f32.mrf.mxu0  ;;  %v3040_v9 = vpop.f32.mrf.mxu1  ;;  %v2409_v12 = vadd.f32 %v7499_v16, %v7498_v29  ;;  %v3865_v43 = vadd.f32 %v6921_v21, %v2552_v48  ;;  %v7500_v55 = vld [vmem:[#allocation70_spill] sm:$0xff] }
 0x346   : > { %v3039_v24 = vadd.f32 %v3038_v51, %v2878_v30  ;;  %v2880_v32 = vadd.f32 %v2879_v46, %v6666_v41  ;;  %v2403_v1 = vadd.f32 %v7501_v50, %v7500_v55  ;;  %v7504_v50 = vld [vmem:[#allocation76_spill] sm:$0xff] }
 0x347   : > { %v2883_v17 = vpop.f32.mrf.mxu0  ;;  %v3044_v40 = vpop.f32.mrf.mxu1  ;;  %v3970_v62 = vrot.slane %v3035_v39, 2  ;;  %v2570_v51 = vadd.f32 %v6707_v37, %v2409_v12 }
 0x348   : > { %v3899_v34 = vrot.slane %v3039_v24, 1  ;;  %v3041_v58 = vadd.f32 %v3040_v9, %v2880_v32  ;;  %v2884_v13 = vadd.f32 %v2883_v17, %v6676_v7  ;;  %v2564_v24 = vadd.f32 %v6681_v61, %v2403_v1  ;;  %v7505_v1 = vld [vmem:[#allocation77_spill] sm:$0xff] }
 0x349   : > { %v2885_v36 = vpop.f32.mrf.mxu0  ;;  %v3046_v6 = vpop.f32.mrf.mxu1 }
 0x34a   : > { %v3900_v8 = vsel %vm3587_vm0, %v3898_v57, %v3899_v34  ;;  %v3938_v41 = vadd.f32 %v3899_v34, %v3866_v38  ;;  %v3971_v18 = vrot.slane %v3041_v58, 2  ;;  %v3045_v15 = vadd.f32 %v3044_v40, %v2884_v13 }
 0x34b   : > { %v3937_v0 = vadd.f32 %v3900_v8, %v3865_v43  ;;  %v2886_v7 = vadd.f32 %v2885_v36, %v6683_v3  ;;  %v2889_v30 = vpop.f32.mrf.mxu0  ;;  %v3050_v46 = vpop.f32.mrf.mxu1  ;;  %v3868_v3 = vadd.f32 %v6921_v21, %v2570_v51  ;;  %v7503_v43 = vld [vmem:[#allocation82_spill] sm:$0xff] }
 0x34c   : > { %v3972_v48 = vsel %vm3777_vm1, %v3970_v62, %v3971_v18  ;;  %v6953_v39 = vadd.f32 %v3971_v18, %v3938_v41  ;;  %v2890_v9 = vadd.f32 %v2889_v30, %v6696_v31  ;;  %v3901_v13 = vrot.slane %v3045_v15, 1  ;;  %v7502_v31 = vld [vmem:[#allocation81_spill] sm:$0xff] }
 0x34d   : > { %v6957_v32 = vadd.f32 %v3972_v48, %v3937_v0  ;;  %v3047_v38 = vadd.f32 %v3046_v6, %v2886_v7  ;;  %v2891_v17 = vpop.f32.mrf.mxu0  ;;  %v3052_v40 = vpop.f32.mrf.mxu1  ;;  %v2421_v61 = vadd.f32 %v7503_v43, %v7502_v31  ;;  %v3867_v62 = vadd.f32 %v6921_v21, %v2564_v24 }
 0x34e   : > { %v3051_v57 = vadd.f32 %v3050_v46, %v2890_v9  ;;  %v2892_v37 = vadd.f32 %v2891_v17, %v6709_v49  ;;  %v2415_v15 = vadd.f32 %v7505_v1, %v7504_v50 }
 0x34f   : > { %v2895_v34 = vpop.f32.mrf.mxu0  ;;  %v3056_v58 = vpop.f32.mrf.mxu1  ;;  %v3973_v36 = vrot.slane %v3047_v38, 2  ;;  %v2582_v51 = vadd.f32 %v6750_v22, %v2421_v61 }
 0x350   : > { %v3902_v29 = vrot.slane %v3051_v57, 1  ;;  %v3053_v16 = vadd.f32 %v3052_v40, %v2892_v37  ;;  %v2896_v12 = vadd.f32 %v2895_v34, %v6719_v20  ;;  %v2576_v24 = vadd.f32 %v6724_v14, %v2415_v15 }
 0x351   : > { %v2897_v6 = vpop.f32.mrf.mxu0  ;;  %v3058_v8 = vpop.f32.mrf.mxu1 }
 0x352   : > { %v3903_v41 = vsel %vm3587_vm0, %v3901_v13, %v3902_v29  ;;  %v3940_v49 = vadd.f32 %v3902_v29, %v3868_v3  ;;  %v3974_v18 = vrot.slane %v3053_v16, 2  ;;  %v3057_v55 = vadd.f32 %v3056_v58, %v2896_v12  ;;  %v7507_v12 = vld [vmem:[#allocation94_spill] sm:$0xff] }
 0x353   : > { %v3939_v0 = vadd.f32 %v3903_v41, %v3867_v62  ;;  %v2898_v20 = vadd.f32 %v2897_v6, %v6726_v27  ;;  %v2901_v7 = vpop.f32.mrf.mxu0  ;;  %v3062_v30 = vpop.f32.mrf.mxu1  ;;  %v3870_v27 = vadd.f32 %v6921_v21, %v2582_v51  ;;  %v3869_v31 = vadd.f32 %v6921_v21, %v2576_v24  ;;  %v7508_v41 = vld [vmem:[#allocation86_spill] sm:$0xff] }
 0x354   : > { %v3975_v46 = vsel %vm3777_vm1, %v3973_v36, %v3974_v18  ;;  %v6971_v48 = vadd.f32 %v3974_v18, %v3940_v49  ;;  %v2902_v9 = vadd.f32 %v2901_v7, %v6739_v60  ;;  %v3904_v58 = vrot.slane %v3057_v55, 1  ;;  %v7506_v60 = vld [vmem:[#allocation93_spill] sm:$0xff]  ;;  %v7509_v49 = vld [vmem:[#allocation87_spill] sm:$0xff] }
 0x355   : > { %v6975_v38 = vadd.f32 %v3975_v46, %v3939_v0  ;;  %v3059_v17 = vadd.f32 %v3058_v8, %v2898_v20  ;;  %v2903_v40 = vpop.f32.mrf.mxu0  ;;  %v3064_v57 = vpop.f32.mrf.mxu1  ;;  %v2433_v14 = vadd.f32 %v7507_v12, %v7506_v60  ;;  %v2427_v18 = vadd.f32 %v7509_v49, %v7508_v41 }
 0x356   : > { %v3063_v37 = vadd.f32 %v3062_v30, %v2902_v9  ;;  %v2904_v22 = vadd.f32 %v2903_v40, %v6752_v56 }
 0x357   : > { %v2907_v3 = vpop.f32.mrf.mxu0  ;;  %v3068_v34 = vpop.f32.mrf.mxu1  ;;  %v3976_v43 = vrot.slane %v3059_v17, 2  ;;  %v2594_v55 = vadd.f32 %v6793_v33, %v2433_v14  ;;  %v2588_v7 = vadd.f32 %v6767_v63, %v2427_v18 }
 0x358   : > { %v3905_v13 = vrot.slane %v3063_v37, 1  ;;  %v3065_v29 = vadd.f32 %v3064_v57, %v2904_v22  ;;  %v2908_v16 = vadd.f32 %v2907_v3, %v6762_v54 }
 0x359   : > { %v2909_v61 = vpop.f32.mrf.mxu0  ;;  %v3070_v62 = vpop.f32.mrf.mxu1 }
 0x35a   : > { %v3906_v36 = vsel %vm3587_vm0, %v3904_v58, %v3905_v13  ;;  %v3942_v56 = vadd.f32 %v3905_v13, %v3870_v27  ;;  %v3977_v6 = vrot.slane %v3065_v29, 2  ;;  %v3069_v8 = vadd.f32 %v3068_v34, %v2908_v16  ;;  %v7511_v34 = vld [vmem:[#allocation104_spill] sm:$0xff] }
 0x35b   : > { %v3941_v50 = vadd.f32 %v3906_v36, %v3869_v31  ;;  %v2910_v54 = vadd.f32 %v2909_v61, %v6769_v5  ;;  %v2913_v1 = vpop.f32.mrf.mxu0  ;;  %v3074_v15 = vpop.f32.mrf.mxu1  ;;  %v3872_v5 = vadd.f32 %v6921_v21, %v2594_v55  ;;  %v3871_v58 = vadd.f32 %v6921_v21, %v2588_v7  ;;  %v7512_v31 = vld [vmem:[#allocation99_spill] sm:$0xff] }
 0x35c   : > { %v3978_v51 = vsel %vm3777_vm1, %v3976_v43, %v3977_v6  ;;  %v6989_v0 = vadd.f32 %v3977_v6, %v3942_v56  ;;  %v2914_v20 = vadd.f32 %v2913_v1, %v6782_v52  ;;  %v3907_v37 = vrot.slane %v3069_v8, 1  ;;  %v7510_v52 = vld [vmem:[#allocation103_spill] sm:$0xff]  ;;  %v7513_v43 = vld [vmem:[#allocation100_spill] sm:$0xff] }
 0x35d   : > { %v6993_v30 = vadd.f32 %v3978_v51, %v3941_v50  ;;  %v3071_v46 = vadd.f32 %v3070_v62, %v2910_v54  ;;  %v2915_v9 = vpop.f32.mrf.mxu0  ;;  %v3076_v24 = vpop.f32.mrf.mxu1  ;;  %v2445_v63 = vadd.f32 %v7511_v34, %v7510_v52  ;;  %v2439_v61 = vadd.f32 %v7513_v43, %v7512_v31  ;;  %v7517_v52 = vld [vmem:[#allocation108_spill] sm:$0xff] }
 0x35e   : > { %v3075_v17 = vadd.f32 %v3074_v15, %v2914_v20  ;;  %v2916_v33 = vadd.f32 %v2915_v9, %v6795_v53 }
 0x35f   : > { %v2919_v40 = vpop.f32.mrf.mxu0  ;;  %v3080_v57 = vpop.f32.mrf.mxu1  ;;  %v3979_v13 = vrot.slane %v3071_v46, 2  ;;  %v2606_v62 = vadd.f32 %v6836_v59, %v2445_v63  ;;  %v2600_v18 = vadd.f32 %v6810_v28, %v2439_v61 }
 0x360   : > { %v3908_v22 = vrot.slane %v3075_v17, 1  ;;  %v3077_v27 = vadd.f32 %v3076_v24, %v2916_v33  ;;  %v2920_v3 = vadd.f32 %v2919_v40, %v6805_v11  ;;  %v7515_v17 = vld [vmem:[#allocation112_spill] sm:$0xff] }
 0x361   : > { %v2921_v29 = vpop.f32.mrf.mxu0  ;;  %v3082_v16 = vpop.f32.mrf.mxu1  ;;  %v3873_v33 = vadd.f32 %v6921_v21, %v2600_v18  ;;  %v7519_v18 = vld [vmem:[#allocation120_spill] sm:$0xff] }
 0x362   : > { %v3909_v60 = vsel %vm3587_vm0, %v3907_v37, %v3908_v22  ;;  %v3944_v53 = vadd.f32 %v3908_v22, %v3872_v5  ;;  %v3980_v12 = vrot.slane %v3077_v27, 2  ;;  %v3081_v14 = vadd.f32 %v3080_v57, %v2920_v3  ;;  %v7516_v3 = vld [vmem:[#allocation107_spill] sm:$0xff] }
 0x363   : > { %v3943_v36 = vadd.f32 %v3909_v60, %v3871_v58  ;;  %v2922_v11 = vadd.f32 %v2921_v29, %v6812_v42  ;;  %v2925_v56 = vpop.f32.mrf.mxu0  ;;  %v3086_v6 = vpop.f32.mrf.mxu1  ;;  %v3874_v42 = vadd.f32 %v6921_v21, %v2606_v62  ;;  %v2451_v34 = vadd.f32 %v7517_v52, %v7516_v3 }
 0x364   : > { %v3981_v8 = vsel %vm3777_vm1, %v3979_v13, %v3980_v12  ;;  %v7007_v41 = vadd.f32 %v3980_v12, %v3944_v53  ;;  %v2926_v49 = vadd.f32 %v2925_v56, %v6825_v44  ;;  %v3910_v7 = vrot.slane %v3081_v14, 1  ;;  %v7514_v44 = vld [vmem:[#allocation111_spill] sm:$0xff] }
 0x365   : > { %v7011_v55 = vadd.f32 %v3981_v8, %v3943_v36  ;;  %v3083_v50 = vadd.f32 %v3082_v16, %v2922_v11  ;;  %v2927_v54 = vpop.f32.mrf.mxu0  ;;  %v3088_v1 = vpop.f32.mrf.mxu1  ;;  %v2457_v28 = vadd.f32 %v7515_v17, %v7514_v44  ;;  %v2612_v12 = vadd.f32 %v6853_v2, %v2451_v34 }
 0x366   : > { %v3087_v15 = vadd.f32 %v3086_v6, %v2926_v49  ;;  %v2928_v59 = vadd.f32 %v2927_v54, %v6838_v35 }
 0x367   : > { %v2931_v51 = vpop.f32.mrf.mxu0  ;;  %v3092_v20 = vpop.f32.mrf.mxu1  ;;  %v3982_v5 = vrot.slane %v3083_v50, 2  ;;  %v2618_v63 = vadd.f32 %v6875_v4, %v2457_v28  ;;  %v3875_v50 = vadd.f32 %v6921_v21, %v2612_v12  ;;  %v7523_v28 = vld [vmem:[#allocation23_spill] sm:$0xff] }
 0x368   : > { %v3911_v46 = vrot.slane %v3087_v15, 1  ;;  %v3089_v9 = vadd.f32 %v3088_v1, %v2928_v59  ;;  %v2932_v24 = vadd.f32 %v2931_v51, %v6848_v19 }
 0x369   : > { %v2933_v40 = vpop.f32.mrf.mxu0  ;;  %v3094_v57 = vpop.f32.mrf.mxu1 }
 0x36a   : > { %v3912_v37 = vsel %vm3587_vm0, %v3910_v7, %v3911_v46  ;;  %v3946_v35 = vadd.f32 %v3911_v46, %v3874_v42  ;;  %v3983_v22 = vrot.slane %v3089_v9, 2  ;;  %v3093_v27 = vadd.f32 %v3092_v20, %v2932_v24  ;;  %v7520_v20 = vld [vmem:[#allocation115_spill] sm:$0xff]  ;;  %v7521_v7 = vld [vmem:[#allocation116_spill] sm:$0xff]  ;;  %v7522_v24 = vld [vmem:[#allocation50_spill] sm:$0xff] }
 0x36b   : > { %v3945_v58 = vadd.f32 %v3912_v37, %v3873_v33  ;;  %v2934_v19 = vadd.f32 %v2933_v40, %v6855_v47  ;;  %v2937_v13 = vpop.f32.mrf.mxu0  ;;  %v3098_v29 = vpop.f32.mrf.mxu1  ;;  %v3876_v47 = vadd.f32 %v6921_v21, %v2618_v63  ;;  %v2463_v46 = vadd.f32 %v7521_v7, %v7520_v20 }
 0x36c   : > { %v3984_v16 = vsel %vm3777_vm1, %v3982_v5, %v3983_v22  ;;  %v7025_v60 = vadd.f32 %v3983_v22, %v3946_v35  ;;  %v2938_v53 = vadd.f32 %v2937_v13, %v6866_v10  ;;  %v3913_v56 = vrot.slane %v3093_v27, 1  ;;  %v7518_v10 = vld [vmem:[#allocation119_spill] sm:$0xff]  ;;  %v7525_v35 = vld [vmem:[#allocation20_spill] sm:$0xff] }
 0x36d   : > { %v7029_v14 = vadd.f32 %v3984_v16, %v3945_v58  ;;  %v3095_v31 = vadd.f32 %v3094_v57, %v2934_v19  ;;  %v2939_v43 = vpop.f32.mrf.mxu0  ;;  %v3100_v61 = vpop.f32.mrf.mxu1  ;;  %v2469_v2 = vadd.f32 %v7519_v18, %v7518_v10  ;;  %v7524_v57 = vld [vmem:[#allocation21_spill] sm:$0xff]  ;;  %v2624_v22 = vadd.f32 %v7525_v35, %v2463_v46  ;;  %v7526_v58 = vld [vmem:[#allocation24_spill] sm:$0xff] }
 0x36e   : > { %v3099_v62 = vadd.f32 %v3098_v29, %v2938_v53  ;;  %v2940_v4 = vadd.f32 %v2939_v43, %v6877_v45 }
 0x36f   : > { %v2943_v36 = vpop.f32.mrf.mxu0  ;;  %v3104_v11 = vpop.f32.mrf.mxu1  ;;  %v3985_v54 = vrot.slane %v3095_v31, 2  ;;  %v2630_v33 = vadd.f32 %v7523_v28, %v2469_v2  ;;  %v3877_v43 = vadd.f32 %v6921_v21, %v2624_v22 }
 0x370   : > { %v3914_v6 = vrot.slane %v3099_v62, 1  ;;  %v3101_v8 = vadd.f32 %v3100_v61, %v2940_v4  ;;  %v2944_v49 = vadd.f32 %v2943_v36, %v6883_v25 }
 0x371   : > { %v2945_v1 = vpop.f32.mrf.mxu0  ;;  %v3106_v15 = vpop.f32.mrf.mxu1  ;;  %v3878_v29 = vadd.f32 %v6921_v21, %v2630_v33 }
 0x372   : > { %v3915_v59 = vsel %vm3587_vm0, %v3913_v56, %v3914_v6  ;;  %v3948_v45 = vadd.f32 %v3914_v6, %v3876_v47  ;;  %v3986_v42 = vrot.slane %v3101_v8, 2  ;;  %v3105_v51 = vadd.f32 %v3104_v11, %v2944_v49 }
 0x373   : > { %v3947_v9 = vadd.f32 %v3915_v59, %v3875_v50  ;;  %v2946_v44 = vadd.f32 %v2945_v1, %v7522_v24  ;;  %v2949_v25 = vpop.f32.mrf.mxu0  ;;  %v3110_v17 = vpop.f32.mrf.mxu1 }
 0x374   : > { %v3987_v5 = vsel %vm3777_vm1, %v3985_v54, %v3986_v42  ;;  %v7043_v40 = vadd.f32 %v3986_v42, %v3948_v45  ;;  %v2950_v37 = vadd.f32 %v2949_v25, %v7524_v57  ;;  %v3916_v16 = vrot.slane %v3105_v51, 1 }
 0x375   : > { %v7047_v27 = vadd.f32 %v3987_v5, %v3947_v9  ;;  %v3107_v3 = vadd.f32 %v3106_v15, %v2946_v44  ;;  %v2951_v52 = vpop.f32.mrf.mxu0  ;;  %v3112_v34 = vpop.f32.mrf.mxu1 }
 0x376   : > { %v3111_v63 = vadd.f32 %v3110_v17, %v2950_v37  ;;  %v2952_v19 = vadd.f32 %v2951_v52, %v7526_v58 }
 0x377   : > { %v4331_v13 = vpop.f32.mrf.mxu1  ;;  %v4307_v31 = vpop.f32.mrf.mxu0  ;;  %v3988_v61 = vrot.slane %v3107_v3, 2 }
 0x378   : > { %v3917_v53 = vrot.slane %v3111_v63, 1  ;;  %v3113_v12 = vadd.f32 %v3112_v34, %v2952_v19 }
 0x379   : > { %v4332_v62 = vpop.f32.mrf.mxu1  ;;  %v4308_v56 = vpop.f32.mrf.mxu0 }
 0x37a   : > { %v3918_v4 = vsel %vm3587_vm0, %v3916_v16, %v3917_v53  ;;  %v3950_v47 = vadd.f32 %v3917_v53, %v3878_v29  ;;  %v3989_v36 = vrot.slane %v3113_v12, 2  ;;  %v7053_v11 = vadd.f32 %v4332_v62, %v4331_v13 }
 0x37b   : > { %v3949_v6 = vadd.f32 %v3918_v4, %v3877_v43 }
 0x37c   : > { %v3990_v8 = vsel %vm3777_vm1, %v3988_v61, %v3989_v36  ;;  %v7056_v49 = vadd.f32 %v3989_v36, %v3950_v47  ;;  %v4334_v10 = vpop.f32.mrf.mxu1  ;;  %v4309_v61 = vadd.f32 %v4308_v56, %v4307_v31 }
 0x37d   : > { %v7058_v18 = vadd.f32 %v3990_v8, %v3949_v6 }
 0x37e   : > { %v4310_v2 = vpop.f32.mrf.mxu0  ;;  %v4335_v50 = vpop.f32.mrf.mxu1 }
 0x37f   : > { %v7060_v21 = vadd.f32 %v4335_v50, %v4334_v10 }
 0x380   : > { %v4311_v54 = vpop.f32.mrf.mxu0 }
 0x381   : > { %v4312_v10 = vadd.f32 %v4311_v54, %v4310_v2 }
 0x382   : > { %v4337_v1 = vpop.f32.mrf.mxu1 }
 0x384   : > { %v4313_v15 = vpop.f32.mrf.mxu0  ;;  %v4338_v59 = vpop.f32.mrf.mxu1 }
 0x385   : > { %v7062_v45 = vadd.f32 %v4338_v59, %v4337_v1 }
 0x386   : > { %v4314_v42 = vpop.f32.mrf.mxu0 }
 0x388   : > { %v4340_v51 = vpop.f32.mrf.mxu1 }
 0x38a   : > { %v4316_v20 = vpop.f32.mrf.mxu0  ;;  %v4341_v7 = vpop.f32.mrf.mxu1 }
 0x38b   : > { %v7064_v46 = vadd.f32 %v4341_v7, %v4340_v51 }
 0x38c   : > { %v4317_v9 = vpop.f32.mrf.mxu0 }
 0x38e   : > { %v4343_v24 = vpop.f32.mrf.mxu1 }
 0x390   : > { %v7066_v44 = vpop.f32.mrf.mxu0  ;;  %v4344_v25 = vpop.f32.mrf.mxu1 }
 0x391   : > { %v7068_v17 = vadd.f32 %v4344_v25, %v4343_v24 }
 0x392   : > { %v4320_v28 = vpop.f32.mrf.mxu0 }
 0x394   : > { %v4346_v33 = vpop.f32.mrf.mxu1 }
 0x396   : > { %v7070_v5 = vpop.f32.mrf.mxu0  ;;  %v4347_v57 = vpop.f32.mrf.mxu1 }
 0x397   : > { %v7072_v37 = vadd.f32 %v4347_v57, %v4346_v33 }
 0x398   : > { %v7074_v35 = vpop.f32.mrf.mxu0 }
 0x39a   : > { %v4349_v22 = vpop.f32.mrf.mxu1 }
 0x39c   : > { %v7076_v3 = vpop.f32.mrf.mxu0  ;;  %v4350_v52 = vpop.f32.mrf.mxu1 }
 0x39d   : > { %v7078_v34 = vadd.f32 %v4350_v52, %v4349_v22  ;;  %v4315_v22 = vadd.f32 %v4314_v42, %v4313_v15 }
 0x39e   : > { %v7080_v63 = vpop.f32.mrf.mxu0 }
 0x3a0   : > { %v4352_v58 = vpop.f32.mrf.mxu1 }
 0x3a2   : > { %v7082_v19 = vpop.f32.mrf.mxu0  ;;  %v4353_v13 = vpop.f32.mrf.mxu1 }
 0x3a3   : > { %v7084_v29 = vadd.f32 %v4353_v13, %v4352_v58 }
 0x3a4   : > { %v7086_v16 = vpop.f32.mrf.mxu0 }
 0x3a5   : > { %v4387_v53 = vpop.f32.mrf.mxu1 }
 0x3a7   : > { %v4467_v12 = vpop.f32.mrf.mxu0  ;;  %v4388_v43 = vpop.f32.mrf.mxu1 }
 0x3a8   : > { %v4389_v62 = vadd.f32 %v4388_v43, %v4387_v53 }
 0x3a9   : > { %v4468_v4 = vpop.f32.mrf.mxu0  ;;  %v4390_v47 = vpop.f32.mrf.mxu1 }
 0x3aa   : > { %v3327_v36 = vadd.f32 %v4389_v62, %v4309_v61  ;;  %v4469_v50 = vadd.f32 %v4468_v4, %v4467_v12  ;;  %v4318_v61 = vadd.f32 %v4317_v9, %v4316_v20 }
 0x3ab   : > { %v4470_v6 = vpop.f32.mrf.mxu0  ;;  %v4391_v8 = vpop.f32.mrf.mxu1 }
 0x3ac   : > { %v4392_v1 = vadd.f32 %v4391_v8, %v4390_v47  ;;  %v3472_v7 = vadd.f32 %v4469_v50, %v3327_v36 }
 0x3ad   : > { %v4471_v59 = vpop.f32.mrf.mxu0  ;;  %v4393_v51 = vpop.f32.mrf.mxu1 }
 0x3ae   : > { %v3332_v24 = vadd.f32 %v4392_v1, %v4312_v10  ;;  %v4472_v25 = vadd.f32 %v4471_v59, %v4470_v6  ;;  %v4040_v13 = vrot.slane %v3472_v7, 3  ;;  %v4321_v59 = vadd.f32 %v4320_v28, %v7066_v44 }
 0x3af   : > { %v4473_v33 = vpop.f32.mrf.mxu0  ;;  %v4394_v57 = vpop.f32.mrf.mxu1 }
 0x3b0   : > { %v3477_v52 = vadd.f32 %v4472_v25, %v3332_v24  ;;  %v4395_v58 = vadd.f32 %v4394_v57, %v4393_v51 }
 0x3b1   : > { %v4474_v31 = vpop.f32.mrf.mxu0  ;;  %v4396_v56 = vpop.f32.mrf.mxu1 }
 0x3b2   : > { %v4041_v53 = vrot.slane %v3477_v52, 3  ;;  %v3337_v43 = vadd.f32 %v4395_v58, %v4315_v22  ;;  %v4475_v4 = vadd.f32 %v4474_v31, %v4473_v33  ;;  %v4324_v22 = vadd.f32 %v7074_v35, %v7070_v5 }
 0x3b3   : > { %v4476_v2 = vpop.f32.mrf.mxu0  ;;  %v4397_v54 = vpop.f32.mrf.mxu1 }
 0x3b4   : > { %v4042_v12 = vsel %vm4039_vm2, %v4040_v13, %v4041_v53  ;;  %v4081_v62 = vadd.f32 %v4041_v53, %v6935_v26  ;;  %v4398_v47 = vadd.f32 %v4397_v54, %v4396_v56  ;;  %v3482_v8 = vadd.f32 %v4475_v4, %v3337_v43 }
 0x3b5   : > { %v4080_v15 = vadd.f32 %v4042_v12, %v6939_v23  ;;  %v4477_v42 = vpop.f32.mrf.mxu0  ;;  %v4399_v36 = vpop.f32.mrf.mxu1  ;;  %v4327_v4 = vadd.f32 %v7080_v63, %v7076_v3 }
 0x3b6   : > { %v4097_v6 = vmax.f32 %v4081_v62, 0.0  ;;  %v3342_v10 = vadd.f32 %v4398_v47, %v4318_v61  ;;  %v4478_v50 = vadd.f32 %v4477_v42, %v4476_v2  ;;  %v4043_v23 = vrot.slane %v3482_v8, 3 }
 0x3b7   : > { %v4096_v1 = vmax.f32 %v4080_v15, 0.0  ;;  %v4479_v20 = vpop.f32.mrf.mxu0  ;;  %v4400_v9 = vpop.f32.mrf.mxu1 }
 0x3b8   : > { %v4112_v51 = vsel %vm4039_vm2, %v4097_v6, 0.0  ;;  %v3487_v26 = vadd.f32 %v4478_v50, %v3342_v10  ;;  %v4401_v7 = vadd.f32 %v4400_v9, %v4399_v36  ;;  %v4330_v10 = vadd.f32 %v7086_v16, %v7082_v19 }
 0x3b9   : > { %4124 = vst [vmem:[%s5739_s19 + $0x20] sm:$0xff] %v4096_v1  ;;  %4125 = vst [vmem:[%s5739_s19 + $0x28] sm:$0xff] %v4112_v51  ;;  %v4480_v24 = vpop.f32.mrf.mxu0  ;;  %v4402_v25 = vpop.f32.mrf.mxu1 }
 0x3ba   : > { %v4044_v33 = vrot.slane %v3487_v26, 3  ;;  %v3347_v57 = vadd.f32 %v4401_v7, %v4321_v59  ;;  %v4481_v28 = vadd.f32 %v4480_v24, %v4479_v20 }
 0x3bb   : > { %v4482_v52 = vpop.f32.mrf.mxu0  ;;  %v4403_v58 = vpop.f32.mrf.mxu1 }
 0x3bc   : > { %v4045_v31 = vsel %vm4039_vm2, %v4043_v23, %v4044_v33  ;;  %v4083_v44 = vadd.f32 %v4044_v33, %v6953_v39  ;;  %v4404_v56 = vadd.f32 %v4403_v58, %v4402_v25  ;;  %v3492_v2 = vadd.f32 %v4481_v28, %v3347_v57 }
 0x3bd   : > { %v4082_v13 = vadd.f32 %v4045_v31, %v6957_v32  ;;  %v4483_v53 = vpop.f32.mrf.mxu0  ;;  %v4405_v43 = vpop.f32.mrf.mxu1 }
 0x3be   : > { %v4099_v61 = vmax.f32 %v4083_v44, 0.0  ;;  %v3352_v54 = vadd.f32 %v4404_v56, %v4324_v22  ;;  %v4484_v12 = vadd.f32 %v4483_v53, %v4482_v52  ;;  %v4046_v36 = vrot.slane %v3492_v2, 3 }
 0x3bf   : > { %v4098_v62 = vmax.f32 %v4082_v13, 0.0  ;;  %v4485_v5 = vpop.f32.mrf.mxu0  ;;  %v4406_v35 = vpop.f32.mrf.mxu1 }
 0x3c0   : > { %v4113_v39 = vsel %vm4039_vm2, %v4099_v61, 0.0  ;;  %v3497_v47 = vadd.f32 %v4484_v12, %v3352_v54  ;;  %v4407_v15 = vadd.f32 %v4406_v35, %v4405_v43 }
 0x3c1   : > { %4130 = vst [vmem:[%s5739_s19 + $0x50] sm:$0xff] %v4098_v62  ;;  %4131 = vst [vmem:[%s5739_s19 + $0x58] sm:$0xff] %v4113_v39  ;;  %v4486_v42 = vpop.f32.mrf.mxu0  ;;  %v4408_v32 = vpop.f32.mrf.mxu1 }
 0x3c2   : > { %v4047_v6 = vrot.slane %v3497_v47, 3  ;;  %v3357_v8 = vadd.f32 %v4407_v15, %v4327_v4  ;;  %v4487_v63 = vadd.f32 %v4486_v42, %v4485_v5 }
 0x3c3   : > { %v4488_v50 = vpop.f32.mrf.mxu0  ;;  %v4409_v1 = vpop.f32.mrf.mxu1 }
 0x3c4   : > { %v4048_v20 = vsel %vm4039_vm2, %v4046_v36, %v4047_v6  ;;  %v4085_v3 = vadd.f32 %v4047_v6, %v6971_v48  ;;  %v4410_v9 = vadd.f32 %v4409_v1, %v4408_v32  ;;  %v3502_v24 = vadd.f32 %v4487_v63, %v3357_v8 }
 0x3c5   : > { %v4084_v59 = vadd.f32 %v4048_v20, %v6975_v38  ;;  %v4489_v51 = vpop.f32.mrf.mxu0  ;;  %v4411_v26 = vpop.f32.mrf.mxu1 }
 0x3c6   : > { %v4101_v7 = vmax.f32 %v4085_v3, 0.0  ;;  %v3362_v25 = vadd.f32 %v4410_v9, %v4330_v10  ;;  %v4490_v23 = vadd.f32 %v4489_v51, %v4488_v50  ;;  %v4049_v31 = vrot.slane %v3502_v24, 3 }
 0x3c7   : > { %v4100_v33 = vmax.f32 %v4084_v59, 0.0  ;;  %v4491_v19 = vpop.f32.mrf.mxu0  ;;  %v4412_v16 = vpop.f32.mrf.mxu1 }
 0x3c8   : > { %v4114_v57 = vsel %vm4039_vm2, %v4101_v7, 0.0  ;;  %v3507_v22 = vadd.f32 %v4490_v23, %v3362_v25  ;;  %v4413_v52 = vadd.f32 %v4412_v16, %v4411_v26 }
 0x3c9   : > { %4136 = vst [vmem:[%s5739_s19 + $0x80] sm:$0xff] %v4100_v33  ;;  %4137 = vst [vmem:[%s5739_s19 + $0x88] sm:$0xff] %v4114_v57  ;;  %v4492_v48 = vpop.f32.mrf.mxu0  ;;  %v4414_v58 = vpop.f32.mrf.mxu1 }
 0x3ca   : > { %v4050_v44 = vrot.slane %v3507_v22, 3  ;;  %v3367_v38 = vadd.f32 %v4413_v52, %v7053_v11  ;;  %v4493_v43 = vadd.f32 %v4492_v48, %v4491_v19 }
 0x3cb   : > { %v4494_v28 = vpop.f32.mrf.mxu0  ;;  %v4415_v56 = vpop.f32.mrf.mxu1 }
 0x3cc   : > { %v4051_v13 = vsel %vm4039_vm2, %v4049_v31, %v4050_v44  ;;  %v4087_v53 = vadd.f32 %v4050_v44, %v6989_v0  ;;  %v4416_v61 = vadd.f32 %v4415_v56, %v4414_v58  ;;  %v3512_v5 = vadd.f32 %v4493_v43, %v3367_v38 }
 0x3cd   : > { %v4086_v2 = vadd.f32 %v4051_v13, %v6993_v30  ;;  %v4495_v54 = vpop.f32.mrf.mxu0  ;;  %v4417_v12 = vpop.f32.mrf.mxu1 }
 0x3ce   : > { %v4103_v62 = vmax.f32 %v4087_v53, 0.0  ;;  %v3372_v35 = vadd.f32 %v4416_v61, %v7060_v21  ;;  %v4496_v4 = vadd.f32 %v4495_v54, %v4494_v28  ;;  %v4052_v6 = vrot.slane %v3512_v5, 3 }
 0x3cf   : > { %v4102_v11 = vmax.f32 %v4086_v2, 0.0  ;;  %v4497_v39 = vpop.f32.mrf.mxu0  ;;  %v4418_v47 = vpop.f32.mrf.mxu1 }
 0x3d0   : > { %v4115_v15 = vsel %vm4039_vm2, %v4103_v62, 0.0  ;;  %v3517_v42 = vadd.f32 %v4496_v4, %v3372_v35  ;;  %v4419_v0 = vadd.f32 %v4418_v47, %v4417_v12 }
 0x3d1   : > { %4142 = vst [vmem:[%s5739_s19 + $0xb0] sm:$0xff] %v4102_v11  ;;  %4143 = vst [vmem:[%s5739_s19 + $0xb8] sm:$0xff] %v4115_v15  ;;  %v4498_v32 = vpop.f32.mrf.mxu0  ;;  %v4420_v36 = vpop.f32.mrf.mxu1 }
 0x3d2   : > { %v4053_v30 = vrot.slane %v3517_v42, 3  ;;  %v3377_v8 = vadd.f32 %v4419_v0, %v7062_v45  ;;  %v4499_v20 = vadd.f32 %v4498_v32, %v4497_v39 }
 0x3d3   : > { %v4500_v10 = vpop.f32.mrf.mxu0  ;;  %v4421_v50 = vpop.f32.mrf.mxu1 }
 0x3d4   : > { %v4054_v21 = vsel %vm4039_vm2, %v4052_v6, %v4053_v30  ;;  %v4089_v1 = vadd.f32 %v4053_v30, %v7007_v41  ;;  %v4422_v3 = vadd.f32 %v4421_v50, %v4420_v36  ;;  %v3522_v26 = vadd.f32 %v4499_v20, %v3377_v8 }
 0x3d5   : > { %v4088_v63 = vadd.f32 %v4054_v21, %v7011_v55  ;;  %v4501_v9 = vpop.f32.mrf.mxu0  ;;  %v4423_v59 = vpop.f32.mrf.mxu1 }
 0x3d6   : > { %v4105_v51 = vmax.f32 %v4089_v1, 0.0  ;;  %v3382_v7 = vadd.f32 %v4422_v3, %v7064_v46  ;;  %v4502_v24 = vadd.f32 %v4501_v9, %v4500_v10  ;;  %v4055_v22 = vrot.slane %v3522_v26, 3 }
 0x3d7   : > { %v4104_v45 = vmax.f32 %v4088_v63, 0.0  ;;  %v4503_v25 = vpop.f32.mrf.mxu0  ;;  %v4424_v23 = vpop.f32.mrf.mxu1 }
 0x3d8   : > { %v4116_v33 = vsel %vm4039_vm2, %v4105_v51, 0.0  ;;  %v3527_v19 = vadd.f32 %v4502_v24, %v3382_v7  ;;  %v4425_v41 = vadd.f32 %v4424_v23, %v4423_v59 }
 0x3d9   : > { %4148 = vst [vmem:[%s5739_s19 + $0xe0] sm:$0xff] %v4104_v45  ;;  %4149 = vst [vmem:[%s5739_s19 + $0xe8] sm:$0xff] %v4116_v33  ;;  %v4504_v16 = vpop.f32.mrf.mxu0  ;;  %v4426_v57 = vpop.f32.mrf.mxu1 }
 0x3da   : > { %v4056_v55 = vrot.slane %v3527_v19, 3  ;;  %v3387_v52 = vadd.f32 %v4425_v41, %v7068_v17  ;;  %v4505_v44 = vadd.f32 %v4504_v16, %v4503_v25 }
 0x3db   : > { %v4506_v48 = vpop.f32.mrf.mxu0  ;;  %v4427_v58 = vpop.f32.mrf.mxu1 }
 0x3dc   : > { %v4057_v46 = vsel %vm4039_vm2, %v4055_v22, %v4056_v55  ;;  %v4091_v31 = vadd.f32 %v4056_v55, %v7025_v60  ;;  %v4428_v38 = vadd.f32 %v4427_v58, %v4426_v57  ;;  %v3532_v43 = vadd.f32 %v4505_v44, %v3387_v52 }
 0x3dd   : > { %v4090_v28 = vadd.f32 %v4057_v46, %v7029_v14  ;;  %v4507_v56 = vpop.f32.mrf.mxu0  ;;  %v4429_v13 = vpop.f32.mrf.mxu1 }
 0x3de   : > { %v4107_v53 = vmax.f32 %v4091_v31, 0.0  ;;  %v3392_v61 = vadd.f32 %v4428_v38, %v7072_v37  ;;  %v4508_v2 = vadd.f32 %v4507_v56, %v4506_v48  ;;  %v4058_v11 = vrot.slane %v3532_v43, 3 }
 0x3df   : > { %v4106_v17 = vmax.f32 %v4090_v28, 0.0  ;;  %v4509_v54 = vpop.f32.mrf.mxu0  ;;  %v4430_v12 = vpop.f32.mrf.mxu1 }
 0x3e0   : > { %v4117_v62 = vsel %vm4039_vm2, %v4107_v53, 0.0  ;;  %v3537_v5 = vadd.f32 %v4508_v2, %v3392_v61  ;;  %v4431_v60 = vadd.f32 %v4430_v12, %v4429_v13 }
 0x3e1   : > { %4154 = vst [vmem:[%s5739_s19 + $0x110] sm:$0xff] %v4106_v17  ;;  %4155 = vst [vmem:[%s5739_s19 + $0x118] sm:$0xff] %v4117_v62  ;;  %v4510_v35 = vpop.f32.mrf.mxu0  ;;  %v4432_v4 = vpop.f32.mrf.mxu1 }
 0x3e2   : > { %v4059_v14 = vrot.slane %v3537_v5, 3  ;;  %v3397_v39 = vadd.f32 %v4431_v60, %v7078_v34  ;;  %v4511_v0 = vadd.f32 %v4510_v35, %v4509_v54 }
 0x3e3   : > { %v4512_v47 = vpop.f32.mrf.mxu0  ;;  %v4433_v37 = vpop.f32.mrf.mxu1 }
 0x3e4   : > { %v4060_v15 = vsel %vm4039_vm2, %v4058_v11, %v4059_v14  ;;  %v4093_v42 = vadd.f32 %v4059_v14, %v7043_v40  ;;  %v4434_v32 = vadd.f32 %v4433_v37, %v4432_v4  ;;  %v3542_v8 = vadd.f32 %v4511_v0, %v3397_v39 }
 0x3e5   : > { %v4092_v36 = vadd.f32 %v4060_v15, %v7047_v27  ;;  %v4513_v6 = vpop.f32.mrf.mxu0 }
 0x3e6   : > { %v4109_v30 = vmax.f32 %v4093_v42, 0.0  ;;  %v3402_v10 = vadd.f32 %v4434_v32, %v7084_v29  ;;  %v4514_v34 = vadd.f32 %v4513_v6, %v4512_v47  ;;  %v4061_v20 = vrot.slane %v3542_v8, 3 }
 0x3e7   : > { %v4108_v50 = vmax.f32 %v4092_v36, 0.0 }
 0x3e8   : > { %v4118_v21 = vsel %vm4039_vm2, %v4109_v30, 0.0  ;;  %v3547_v1 = vadd.f32 %v4514_v34, %v3402_v10 }
 0x3e9   : > { %4160 = vst [vmem:[%s5739_s19 + $0x140] sm:$0xff] %v4108_v50  ;;  %4161 = vst [vmem:[%s5739_s19 + $0x148] sm:$0xff] %v4118_v21 }
 0x3ea   : > { %v4062_v40 = vrot.slane %v3547_v1, 3 }
 0x3ec   : > { %v4063_v3 = vsel %vm4039_vm2, %v4061_v20, %v4062_v40  ;;  %v4095_v27 = vadd.f32 %v4062_v40, %v7056_v49 }
 0x3ed   : > { %v4094_v63 = vadd.f32 %v4063_v3, %v7058_v18 }
 0x3ee   : > { %v4111_v9 = vmax.f32 %v4095_v27, 0.0 }
 0x3ef   : > { %v4110_v59 = vmax.f32 %v4094_v63, 0.0 }
 0x3f0   : > { %v4119_v29 = vsel %vm4039_vm2, %v4111_v9, 0.0 }
 0x3f1   : > { %4166 = vst [vmem:[%s5739_s19 + $0x170] sm:$0xff] %v4110_v59  ;;  %4167 = vst [vmem:[%s5739_s19 + $0x178] sm:$0xff] %v4119_v29 }
 0x3f2 PF: > { %p14_p10 = scmp.ge.s32.totalorder %s5036_s6, 4   ;;  %s7527_s12 = smov %s4934_s13 }
 0x3f3   : > { %s7528_s13 = smov %s4938_s14  ;;  %s7529_s14 = smov %s5047_s10 }
 0x3f4   : > { %s7530_s15 = smov %s5036_s6  ;;  %16 = sbr.rel (!%p14_p10) target bundleno = 4 (0x4), region = 80 }
 0x3f9   :  { %4192 = vsyncpa [#allocation3], 1 }
 0x3fa   :  { %4194 = vsyncpa [#allocation3 + $0x1], 1 }
 0x3fb   :  { %4195 = vsyncpa [#allocation5], 1 }

</bundles_post_ra>
